<compile_context>
chip_gen: v6e
topology: v6e:2x2x1
jax: 0.10.0
libtpu: 0.0.40
codegen_flags: <defaults>
</compile_context>

<pallas_src>
import functools

import jax
import jax.numpy as jnp
from jax.experimental import pallas as pl
from jax.experimental.pallas import tpu as pltpu


_COMPILER_PARAMS = pltpu.CompilerParams(
    dimension_semantics=("parallel",),
    vmem_limit_bytes=32 * 1024 * 1024,
)


# ---------------------------------------------------------------------------
# Pallas kernels
# ---------------------------------------------------------------------------
def _conv3x3_kernel(*refs, taps, relu, has_res, has_sc, sc_tap):
    """Direct 3x3 conv (+ folded-BN bias, optional residual add, optional fused
    strided 1x1 shortcut) for one image per grid step.

    Ref order: x, w, b, [res], [w_sc, b_sc], out, [out_sc]
      x   : (P*Hq, Wq, Cin)  bf16  padded image (stride 1) or 4 stride-2
                                   phases stacked along the row axis
      w   : (9, Cin, Cout)   bf16  BN scale folded in, tap-major (i*3+j)
      b   : (1, Cout)        f32
      res : (Ho, Wo, Cout)   bf16
      w_sc: (Cin, Cout) bf16 ; b_sc: (1, Cout) f32
      out : (Ho, Wo, Cout)   bf16  (out_sc likewise)
    """
    it = iter(refs)
    x_ref, w_ref, b_ref = next(it), next(it), next(it)
    res_ref = next(it) if has_res else None
    if has_sc:
        wsc_ref, bsc_ref = next(it), next(it)
    o_ref = next(it)
    osc_ref = next(it) if has_sc else None

    ho_n, wo_n, cout = o_ref.shape
    bias = b_ref[...]                                     # (1, Cout) f32

    def row(ho, carry):
        acc = jnp.zeros((wo_n, cout), jnp.float32)
        for t, (rbase, dj) in enumerate(taps):
            a = x_ref[rbase + ho, pl.ds(dj, wo_n), :]     # (Wo, Cin) bf16
            acc = acc + jnp.dot(a, w_ref[t],
                                preferred_element_type=jnp.float32)
        acc = acc + bias
        if has_res:
            acc = acc + res_ref[ho].astype(jnp.float32)
        if relu:
            acc = jnp.maximum(acc, 0.0)
        o_ref[ho] = acc.astype(o_ref.dtype)

        if has_sc:
            sc_rbase, sc_dj = sc_tap
            a_sc = x_ref[sc_rbase + ho, pl.ds(sc_dj, wo_n), :]
            acc_sc = jnp.dot(a_sc, wsc_ref[...],
                             preferred_element_type=jnp.float32) + bsc_ref[...]
            osc_ref[ho] = acc_sc.astype(osc_ref.dtype)
        return carry

    jax.lax.fori_loop(0, ho_n, row, 0)


def _pool_head_kernel(x_ref, w_ref, b_ref, o_ref):
    """Fused avg_pool2d(4) + flatten + linear head for one sample.

    x : (Hf, Wf, C) bf16 ; w : (F, ncls) f32 (NHWC-pooled row order) ;
    b : (1, ncls) f32 ; out : (1, ncls) f32
    """
    hf, wf, c = x_ref.shape
    acc = b_ref[...]                                      # (1, ncls)
    k = 0
    for hp in range(hf // 4):
        for wp in range(wf // 4):
            win = x_ref[4 * hp:4 * hp + 4, 4 * wp:4 * wp + 4, :]
            pooled = jnp.mean(win.astype(jnp.float32), axis=(0, 1),
                              keepdims=True).reshape(1, c)
            wk = w_ref[pl.ds(k * c, c), :]                # (C, ncls)
            acc = acc + jnp.dot(pooled, wk,
                                preferred_element_type=jnp.float32)
            k += 1
    o_ref[...] = acc


# ---------------------------------------------------------------------------
# Wrappers
# ---------------------------------------------------------------------------
def conv3x3_block(x, w9, b, *, stride, relu=True, residual=None,
                  shortcut_w=None, shortcut_b=None):
    """maybe_relu(conv3x3(x)*bn_scale + bn_bias [+ residual]);
    optionally also returns the fused strided 1x1 shortcut output."""
    n, h, w, cin = x.shape
    cout = w9.shape[-1]
    assert h % stride == 0 and w % stride == 0
    ho, wo = h // stride, w // stride

    xp = jnp.pad(x, ((0, 0), (1, 1), (1, 1), (0, 0)))
    if stride == 1:
        phases = xp                                       # (N, H+2, W+2, C)
        hq, wq = h + 2, w + 2
        taps = tuple((i, j) for i in range(3) for j in range(3))
        sc_tap = (1, 1)
    else:  # stride == 2: decompose the padded image into 4 parity phases so
        # every tap is a plain (non-strided) shifted window inside the kernel.
        hq, wq = ho + 1, wo + 1
        phases = jnp.stack([xp[:, a::2, b::2, :] for a in (0, 1)
                            for b in (0, 1)], axis=1)     # (N, 4, Hq, Wq, C)
        phases = phases.reshape(n, 4 * hq, wq, cin)
        taps = tuple(((2 * (i % 2) + (j % 2)) * hq + i // 2, j // 2)
                     for i in range(3) for j in range(3))
        sc_tap = (3 * hq, 0)                              # phase (1,1) == x[::2,::2]
    p_hq = phases.shape[1]

    inputs = [phases, w9, b]
    in_specs = [
        pl.BlockSpec((None, p_hq, wq, cin), lambda i: (i, 0, 0, 0)),
        pl.BlockSpec((9, cin, cout), lambda i: (0, 0, 0)),
        pl.BlockSpec((1, cout), lambda i: (0, 0)),
    ]
    if residual is not None:
        inputs.append(residual)
        in_specs.append(pl.BlockSpec((None, ho, wo, cout),
                                     lambda i: (i, 0, 0, 0)))
    has_sc = shortcut_w is not None
    if has_sc:
        inputs += [shortcut_w, shortcut_b]
        in_specs += [pl.BlockSpec((cin, cout), lambda i: (0, 0)),
                     pl.BlockSpec((1, cout), lambda i: (0, 0))]

    main_shape = jax.ShapeDtypeStruct((n, ho, wo, cout), jnp.bfloat16)
    main_spec = pl.BlockSpec((None, ho, wo, cout), lambda i: (i, 0, 0, 0))
    if has_sc:
        out_shape = (main_shape,
                     jax.ShapeDtypeStruct((n, ho, wo, cout), jnp.bfloat16))
        out_specs = (main_spec,
                     pl.BlockSpec((None, ho, wo, cout), lambda i: (i, 0, 0, 0)))
    else:
        out_shape, out_specs = main_shape, main_spec

    kernel = functools.partial(
        _conv3x3_kernel, taps=taps, relu=relu,
        has_res=residual is not None, has_sc=has_sc, sc_tap=sc_tap)

    return pl.pallas_call(
        kernel,
        out_shape=out_shape,
        grid=(n,),
        in_specs=in_specs,
        out_specs=out_specs,
        compiler_params=_COMPILER_PARAMS,
    )(*inputs)


def pool_head(x, w_head, b_head):
    """F.avg_pool2d(x, 4) + flatten + linear head, fused into one kernel."""
    n, hf, wf, c = x.shape
    assert hf % 4 == 0 and wf % 4 == 0
    feat = (hf // 4) * (wf // 4) * c
    ncls = w_head.shape[1]
    assert w_head.shape[0] == feat
    out = pl.pallas_call(
        _pool_head_kernel,
        out_shape=jax.ShapeDtypeStruct((n, 1, ncls), jnp.float32),
        grid=(n,),
        in_specs=[pl.BlockSpec((None, hf, wf, c), lambda i: (i, 0, 0, 0)),
                  pl.BlockSpec((feat, ncls), lambda i: (0, 0)),
                  pl.BlockSpec((1, ncls), lambda i: (0, 0))],
        out_specs=pl.BlockSpec((None, 1, ncls), lambda i: (i, 0, 0)),
        compiler_params=_COMPILER_PARAMS,
    )(x, w_head, b_head)
    return out.reshape(n, ncls)


# ---------------------------------------------------------------------------
# Parameter initialization (deterministic, synthetic, BN folded at init)
# ---------------------------------------------------------------------------
def _bn_affine(c):
    gamma = jnp.ones((c,), jnp.float32)
    beta = jnp.zeros((c,), jnp.float32)
    running_mean = jnp.zeros((c,), jnp.float32)
    running_var = jnp.ones((c,), jnp.float32)
    eps = 1e-5
    scale = gamma / jnp.sqrt(running_var + eps)
    bias = beta - running_mean * scale
    return scale, bias


def _conv_w(key, kh, kw, cin, cout):
    fan_in = kh * kw * cin
    std = (2.0 / fan_in) ** 0.5
    return jax.random.normal(key, (kh, kw, cin, cout), jnp.float32) * std


def _fold_conv_bn(w, bn):
    """Fold eval-mode BN scale into the conv weight; return (bf16 taps, f32 bias)."""
    scale, bias = bn
    kh, kw, cin, cout = w.shape
    w_f = (w * scale).reshape(kh * kw, cin, cout).astype(jnp.bfloat16)
    return w_f, bias.reshape(1, cout)


def init_resnet(key, num_blocks, num_classes, nf, input_size):
    keys = iter(jax.random.split(key, 128))
    params = {}
    cin = input_size[0]

    params['conv1_w'], params['conv1_b'] = _fold_conv_bn(
        _conv_w(next(keys), 3, 3, cin, nf), _bn_affine(nf))

    in_planes = nf
    layers = []
    for planes_mult, nb, first_stride in zip([1, 2, 4, 8], num_blocks,
                                             [1, 2, 2, 2]):
        planes = nf * planes_mult
        blocks = []
        for s in [first_stride] + [1] * (nb - 1):
            bp = {'stride': s}
            bp['w1'], bp['b1'] = _fold_conv_bn(
                _conv_w(next(keys), 3, 3, in_planes, planes),
                _bn_affine(planes))
            bp['w2'], bp['b2'] = _fold_conv_bn(
                _conv_w(next(keys), 3, 3, planes, planes), _bn_affine(planes))
            if s != 1 or in_planes != planes:             # BasicBlock shortcut
                sc_scale, sc_bias = _bn_affine(planes)
                w_sc = _conv_w(next(keys), 1, 1, in_planes, planes)
                bp['wsc'] = (w_sc * sc_scale).reshape(
                    in_planes, planes).astype(jnp.bfloat16)
                bp['bsc'] = sc_bias.reshape(1, planes)
            blocks.append(bp)
            in_planes = planes                             # expansion = 1
        layers.append(blocks)
    params['layers'] = layers

    spatial = input_size[-1] // 2 // 2 // 2 // 4
    last_hid = nf * 8 * spatial * spatial
    bound = 1.0 / (last_hid ** 0.5)
    head_w = jax.random.uniform(next(keys), (last_hid, num_classes),
                                jnp.float32, -bound, bound)
    # Permute feature rows from the NCHW flatten order (PyTorch .view) to the
    # NHWC-pooled order produced by the fused pool+head kernel.
    c_last = nf * 8
    head_w = head_w.reshape(c_last, spatial, spatial, num_classes)
    head_w = head_w.transpose(1, 2, 0, 3).reshape(last_hid, num_classes)
    params['head_w'] = head_w
    params['head_b'] = jax.random.uniform(next(keys), (num_classes,),
                                          jnp.float32, -bound,
                                          bound).reshape(1, num_classes)
    params['features_size'] = last_hid
    return params


# ---------------------------------------------------------------------------
# Forward pass (matches ResNet.forward semantics, eval mode)
# ---------------------------------------------------------------------------
def _basic_block(x, bp):
    if 'wsc' in bp:
        out1, shortcut = conv3x3_block(
            x, bp['w1'], bp['b1'], stride=bp['stride'], relu=True,
            shortcut_w=bp['wsc'], shortcut_b=bp['bsc'])
    else:
        out1 = conv3x3_block(x, bp['w1'], bp['b1'], stride=bp['stride'],
                             relu=True)
        shortcut = x
    return conv3x3_block(out1, bp['w2'], bp['b2'], stride=1, relu=True,
                         residual=shortcut)


def resnet_forward(params, x_nchw):
    assert x_nchw.ndim == 4
    x = jnp.transpose(x_nchw, (0, 2, 3, 1)).astype(jnp.bfloat16)  # NCHW->NHWC
    out = conv3x3_block(x, params['conv1_w'], params['conv1_b'], stride=1,
                        relu=True)
    for blocks in params['layers']:
        for bp in blocks:
            out = _basic_block(out, bp)
    return pool_head(out, params['head_w'], params['head_b'])


if __name__ == "__main__":
    key = jax.random.PRNGKey(0)
    kx, kp = jax.random.split(key)

    batch = 2
    num_classes = 10
    nf = 8
    input_size = (3, 32, 32)      # smallest spatial size the pooling math allows
    num_blocks = [1, 1, 1, 1]

    x = jax.random.normal(kx, (batch,) + input_size, jnp.float32)
    params = init_resnet(kp, num_blocks, num_classes, nf, input_size)

    logits = jax.jit(lambda inp: resnet_forward(params, inp))(x)
    jax.block_until_ready(logits)
    assert logits.shape == (batch, num_classes)
    assert bool(jnp.all(jnp.isfinite(logits)))
    print("KERNEL_OK")
</pallas_src>

<mosaic_0001>
module attributes {stable_mosaic.version = 11 : i64} {
  func.func @_conv3x3_kernel(%arg0: i32, %arg1: memref<1x34x34x3xbf16, #tpu.memory_space<vmem>>, %arg2: memref<9x3x8xbf16, #tpu.memory_space<vmem>>, %arg3: memref<1x8xf32, #tpu.memory_space<vmem>>, %arg4: memref<1x32x32x8xbf16, #tpu.memory_space<vmem>>) attributes {dimension_semantics = [#tpu.dimension_semantics<parallel>], iteration_bounds = array<i64: 2>, scalar_prefetch = 0 : i64, scratch_operands = 0 : i64, tpu.core_type = #tpu.core_type<tc>, window_params = [{transform_indices = @transform_0, window_bounds = array<i64: 1, 34, 34, 3>}, {pipeline_mode = #tpu.pipeline_mode<synchronous>, transform_indices = @transform_1, window_bounds = array<i64: 9, 3, 8>}, {pipeline_mode = #tpu.pipeline_mode<synchronous>, transform_indices = @transform_2, window_bounds = array<i64: 1, 8>}, {transform_indices = @transform_3, window_bounds = array<i64: 1, 32, 32, 8>}]} {
    %c0 = arith.constant 0 : index
    %c0_0 = arith.constant 0 : index
    %0 = vector.load %arg3[%c0, %c0_0] : memref<1x8xf32, #tpu.memory_space<vmem>>, vector<1x8xf32>
    %c0_i32 = arith.constant 0 : i32
    %c32_i32 = arith.constant 32 : i32
    %1 = arith.addi %c0_i32, %c32_i32 : i32
    %c1_i32 = arith.constant 1 : i32
    scf.for %arg5 = %c0_i32 to %1 step %c1_i32  : i32 {
      %cst = arith.constant 0.000000e+00 : f32
      %2 = vector.broadcast %cst : f32 to vector<32x8xf32>
      %c0_i32_2 = arith.constant 0 : i32
      %3 = arith.addi %c0_i32_2, %arg5 : i32
      %c0_3 = arith.constant 0 : index
      %4 = arith.index_cast %3 : i32 to index
      %c0_4 = arith.constant 0 : index
      %c0_5 = arith.constant 0 : index
      %5 = vector.load %arg1[%c0_3, %4, %c0_4, %c0_5] : memref<1x34x34x3xbf16, #tpu.memory_space<vmem>>, vector<1x1x32x3xbf16>
      %6 = vector.shape_cast %5 : vector<1x1x32x3xbf16> to vector<32x3xbf16>
      %c0_6 = arith.constant 0 : index
      %c0_7 = arith.constant 0 : index
      %c0_8 = arith.constant 0 : index
      %7 = vector.load %arg2[%c0_6, %c0_7, %c0_8] : memref<9x3x8xbf16, #tpu.memory_space<vmem>>, vector<1x3x8xbf16>
      %8 = vector.shape_cast %7 : vector<1x3x8xbf16> to vector<3x8xbf16>
      %cst_9 = arith.constant dense<0.000000e+00> : vector<32x8xf32>
      %9 = tpu.matmul %6, %8, %cst_9 {dimension_numbers = #tpu.dot_dimension_numbers<[1], [0], [0], [1], [0, 0, 1, 1], [], []>} : vector<32x3xbf16>, vector<3x8xbf16>, vector<32x8xf32> -> vector<32x8xf32>
      %10 = arith.addf %2, %9 : vector<32x8xf32>
      %c0_i32_10 = arith.constant 0 : i32
      %11 = arith.addi %c0_i32_10, %arg5 : i32
      %c0_11 = arith.constant 0 : index
      %12 = arith.index_cast %11 : i32 to index
      %c1 = arith.constant 1 : index
      %c0_12 = arith.constant 0 : index
      %13 = vector.load %arg1[%c0_11, %12, %c1, %c0_12] : memref<1x34x34x3xbf16, #tpu.memory_space<vmem>>, vector<1x1x32x3xbf16>
      %14 = vector.shape_cast %13 : vector<1x1x32x3xbf16> to vector<32x3xbf16>
      %c1_13 = arith.constant 1 : index
      %c0_14 = arith.constant 0 : index
      %c0_15 = arith.constant 0 : index
      %15 = vector.load %arg2[%c1_13, %c0_14, %c0_15] : memref<9x3x8xbf16, #tpu.memory_space<vmem>>, vector<1x3x8xbf16>
      %16 = vector.shape_cast %15 : vector<1x3x8xbf16> to vector<3x8xbf16>
      %cst_16 = arith.constant dense<0.000000e+00> : vector<32x8xf32>
      %17 = tpu.matmul %14, %16, %cst_16 {dimension_numbers = #tpu.dot_dimension_numbers<[1], [0], [0], [1], [0, 0, 1, 1], [], []>} : vector<32x3xbf16>, vector<3x8xbf16>, vector<32x8xf32> -> vector<32x8xf32>
      %18 = arith.addf %10, %17 : vector<32x8xf32>
      %c0_i32_17 = arith.constant 0 : i32
      %19 = arith.addi %c0_i32_17, %arg5 : i32
      %c0_18 = arith.constant 0 : index
      %20 = arith.index_cast %19 : i32 to index
      %c2 = arith.constant 2 : index
      %c0_19 = arith.constant 0 : index
      %21 = vector.load %arg1[%c0_18, %20, %c2, %c0_19] : memref<1x34x34x3xbf16, #tpu.memory_space<vmem>>, vector<1x1x32x3xbf16>
      %22 = vector.shape_cast %21 : vector<1x1x32x3xbf16> to vector<32x3xbf16>
      %c2_20 = arith.constant 2 : index
      %c0_21 = arith.constant 0 : index
      %c0_22 = arith.constant 0 : index
      %23 = vector.load %arg2[%c2_20, %c0_21, %c0_22] : memref<9x3x8xbf16, #tpu.memory_space<vmem>>, vector<1x3x8xbf16>
      %24 = vector.shape_cast %23 : vector<1x3x8xbf16> to vector<3x8xbf16>
      %cst_23 = arith.constant dense<0.000000e+00> : vector<32x8xf32>
      %25 = tpu.matmul %22, %24, %cst_23 {dimension_numbers = #tpu.dot_dimension_numbers<[1], [0], [0], [1], [0, 0, 1, 1], [], []>} : vector<32x3xbf16>, vector<3x8xbf16>, vector<32x8xf32> -> vector<32x8xf32>
      %26 = arith.addf %18, %25 : vector<32x8xf32>
      %c1_i32_24 = arith.constant 1 : i32
      %27 = arith.addi %c1_i32_24, %arg5 : i32
      %c0_25 = arith.constant 0 : index
      %28 = arith.index_cast %27 : i32 to index
      %c0_26 = arith.constant 0 : index
      %c0_27 = arith.constant 0 : index
      %29 = vector.load %arg1[%c0_25, %28, %c0_26, %c0_27] : memref<1x34x34x3xbf16, #tpu.memory_space<vmem>>, vector<1x1x32x3xbf16>
      %30 = vector.shape_cast %29 : vector<1x1x32x3xbf16> to vector<32x3xbf16>
      %c3 = arith.constant 3 : index
      %c0_28 = arith.constant 0 : index
      %c0_29 = arith.constant 0 : index
      %31 = vector.load %arg2[%c3, %c0_28, %c0_29] : memref<9x3x8xbf16, #tpu.memory_space<vmem>>, vector<1x3x8xbf16>
      %32 = vector.shape_cast %31 : vector<1x3x8xbf16> to vector<3x8xbf16>
      %cst_30 = arith.constant dense<0.000000e+00> : vector<32x8xf32>
      %33 = tpu.matmul %30, %32, %cst_30 {dimension_numbers = #tpu.dot_dimension_numbers<[1], [0], [0], [1], [0, 0, 1, 1], [], []>} : vector<32x3xbf16>, vector<3x8xbf16>, vector<32x8xf32> -> vector<32x8xf32>
      %34 = arith.addf %26, %33 : vector<32x8xf32>
      %c1_i32_31 = arith.constant 1 : i32
      %35 = arith.addi %c1_i32_31, %arg5 : i32
      %c0_32 = arith.constant 0 : index
      %36 = arith.index_cast %35 : i32 to index
      %c1_33 = arith.constant 1 : index
      %c0_34 = arith.constant 0 : index
      %37 = vector.load %arg1[%c0_32, %36, %c1_33, %c0_34] : memref<1x34x34x3xbf16, #tpu.memory_space<vmem>>, vector<1x1x32x3xbf16>
      %38 = vector.shape_cast %37 : vector<1x1x32x3xbf16> to vector<32x3xbf16>
      %c4 = arith.constant 4 : index
      %c0_35 = arith.constant 0 : index
      %c0_36 = arith.constant 0 : index
      %39 = vector.load %arg2[%c4, %c0_35, %c0_36] : memref<9x3x8xbf16, #tpu.memory_space<vmem>>, vector<1x3x8xbf16>
      %40 = vector.shape_cast %39 : vector<1x3x8xbf16> to vector<3x8xbf16>
      %cst_37 = arith.constant dense<0.000000e+00> : vector<32x8xf32>
      %41 = tpu.matmul %38, %40, %cst_37 {dimension_numbers = #tpu.dot_dimension_numbers<[1], [0], [0], [1], [0, 0, 1, 1], [], []>} : vector<32x3xbf16>, vector<3x8xbf16>, vector<32x8xf32> -> vector<32x8xf32>
      %42 = arith.addf %34, %41 : vector<32x8xf32>
      %c1_i32_38 = arith.constant 1 : i32
      %43 = arith.addi %c1_i32_38, %arg5 : i32
      %c0_39 = arith.constant 0 : index
      %44 = arith.index_cast %43 : i32 to index
      %c2_40 = arith.constant 2 : index
      %c0_41 = arith.constant 0 : index
      %45 = vector.load %arg1[%c0_39, %44, %c2_40, %c0_41] : memref<1x34x34x3xbf16, #tpu.memory_space<vmem>>, vector<1x1x32x3xbf16>
      %46 = vector.shape_cast %45 : vector<1x1x32x3xbf16> to vector<32x3xbf16>
      %c5 = arith.constant 5 : index
      %c0_42 = arith.constant 0 : index
      %c0_43 = arith.constant 0 : index
      %47 = vector.load %arg2[%c5, %c0_42, %c0_43] : memref<9x3x8xbf16, #tpu.memory_space<vmem>>, vector<1x3x8xbf16>
      %48 = vector.shape_cast %47 : vector<1x3x8xbf16> to vector<3x8xbf16>
      %cst_44 = arith.constant dense<0.000000e+00> : vector<32x8xf32>
      %49 = tpu.matmul %46, %48, %cst_44 {dimension_numbers = #tpu.dot_dimension_numbers<[1], [0], [0], [1], [0, 0, 1, 1], [], []>} : vector<32x3xbf16>, vector<3x8xbf16>, vector<32x8xf32> -> vector<32x8xf32>
      %50 = arith.addf %42, %49 : vector<32x8xf32>
      %c2_i32 = arith.constant 2 : i32
      %51 = arith.addi %c2_i32, %arg5 : i32
      %c0_45 = arith.constant 0 : index
      %52 = arith.index_cast %51 : i32 to index
      %c0_46 = arith.constant 0 : index
      %c0_47 = arith.constant 0 : index
      %53 = vector.load %arg1[%c0_45, %52, %c0_46, %c0_47] : memref<1x34x34x3xbf16, #tpu.memory_space<vmem>>, vector<1x1x32x3xbf16>
      %54 = vector.shape_cast %53 : vector<1x1x32x3xbf16> to vector<32x3xbf16>
      %c6 = arith.constant 6 : index
      %c0_48 = arith.constant 0 : index
      %c0_49 = arith.constant 0 : index
      %55 = vector.load %arg2[%c6, %c0_48, %c0_49] : memref<9x3x8xbf16, #tpu.memory_space<vmem>>, vector<1x3x8xbf16>
      %56 = vector.shape_cast %55 : vector<1x3x8xbf16> to vector<3x8xbf16>
      %cst_50 = arith.constant dense<0.000000e+00> : vector<32x8xf32>
      %57 = tpu.matmul %54, %56, %cst_50 {dimension_numbers = #tpu.dot_dimension_numbers<[1], [0], [0], [1], [0, 0, 1, 1], [], []>} : vector<32x3xbf16>, vector<3x8xbf16>, vector<32x8xf32> -> vector<32x8xf32>
      %58 = arith.addf %50, %57 : vector<32x8xf32>
      %c2_i32_51 = arith.constant 2 : i32
      %59 = arith.addi %c2_i32_51, %arg5 : i32
      %c0_52 = arith.constant 0 : index
      %60 = arith.index_cast %59 : i32 to index
      %c1_53 = arith.constant 1 : index
      %c0_54 = arith.constant 0 : index
      %61 = vector.load %arg1[%c0_52, %60, %c1_53, %c0_54] : memref<1x34x34x3xbf16, #tpu.memory_space<vmem>>, vector<1x1x32x3xbf16>
      %62 = vector.shape_cast %61 : vector<1x1x32x3xbf16> to vector<32x3xbf16>
      %c7 = arith.constant 7 : index
      %c0_55 = arith.constant 0 : index
      %c0_56 = arith.constant 0 : index
      %63 = vector.load %arg2[%c7, %c0_55, %c0_56] : memref<9x3x8xbf16, #tpu.memory_space<vmem>>, vector<1x3x8xbf16>
      %64 = vector.shape_cast %63 : vector<1x3x8xbf16> to vector<3x8xbf16>
      %cst_57 = arith.constant dense<0.000000e+00> : vector<32x8xf32>
      %65 = tpu.matmul %62, %64, %cst_57 {dimension_numbers = #tpu.dot_dimension_numbers<[1], [0], [0], [1], [0, 0, 1, 1], [], []>} : vector<32x3xbf16>, vector<3x8xbf16>, vector<32x8xf32> -> vector<32x8xf32>
      %66 = arith.addf %58, %65 : vector<32x8xf32>
      %c2_i32_58 = arith.constant 2 : i32
      %67 = arith.addi %c2_i32_58, %arg5 : i32
      %c0_59 = arith.constant 0 : index
      %68 = arith.index_cast %67 : i32 to index
      %c2_60 = arith.constant 2 : index
      %c0_61 = arith.constant 0 : index
      %69 = vector.load %arg1[%c0_59, %68, %c2_60, %c0_61] : memref<1x34x34x3xbf16, #tpu.memory_space<vmem>>, vector<1x1x32x3xbf16>
      %70 = vector.shape_cast %69 : vector<1x1x32x3xbf16> to vector<32x3xbf16>
      %c8 = arith.constant 8 : index
      %c0_62 = arith.constant 0 : index
      %c0_63 = arith.constant 0 : index
      %71 = vector.load %arg2[%c8, %c0_62, %c0_63] : memref<9x3x8xbf16, #tpu.memory_space<vmem>>, vector<1x3x8xbf16>
      %72 = vector.shape_cast %71 : vector<1x3x8xbf16> to vector<3x8xbf16>
      %cst_64 = arith.constant dense<0.000000e+00> : vector<32x8xf32>
      %73 = tpu.matmul %70, %72, %cst_64 {dimension_numbers = #tpu.dot_dimension_numbers<[1], [0], [0], [1], [0, 0, 1, 1], [], []>} : vector<32x3xbf16>, vector<3x8xbf16>, vector<32x8xf32> -> vector<32x8xf32>
      %74 = arith.addf %66, %73 : vector<32x8xf32>
      %75 = vector.broadcast %0 : vector<1x8xf32> to vector<32x8xf32>
      %76 = arith.addf %74, %75 : vector<32x8xf32>
      %cst_65 = arith.constant 0.000000e+00 : f32
      %77 = vector.broadcast %cst_65 : f32 to vector<32x8xf32>
      %78 = arith.maximumf %76, %77 : vector<32x8xf32>
      %79 = arith.truncf %78 : vector<32x8xf32> to vector<32x8xbf16>
      %c0_66 = arith.constant 0 : index
      %80 = arith.index_cast %arg5 : i32 to index
      %c0_67 = arith.constant 0 : index
      %c0_68 = arith.constant 0 : index
      %81 = vector.load %arg4[%c0_66, %80, %c0_67, %c0_68] : memref<1x32x32x8xbf16, #tpu.memory_space<vmem>>, vector<1x1x32x8xbf16>
      %82 = vector.shape_cast %81 : vector<1x1x32x8xbf16> to vector<32x8xbf16>
      %83 = vector.shape_cast %79 : vector<32x8xbf16> to vector<1x1x32x8xbf16>
      tpu.vector_store %arg4[%c0_66, %80, %c0_67, %c0_68], %83 {strides = array<i32>} : memref<1x32x32x8xbf16, #tpu.memory_space<vmem>>, vector<1x1x32x8xbf16>,
    }
    %c32_i32_1 = arith.constant 32 : i32
    return
  }
  func.func @transform_0(%arg0: i32) -> (i32, i32, i32, i32) {
    %c0_i32 = arith.constant 0 : i32
    %c0_i32_0 = arith.constant 0 : i32
    %c0_i32_1 = arith.constant 0 : i32
    %c0_i32_2 = arith.constant 0 : i32
    return %arg0, %c0_i32, %c0_i32_0, %c0_i32_1 : i32, i32, i32, i32
  }
  func.func @transform_1(%arg0: i32) -> (i32, i32, i32) {
    %c0_i32 = arith.constant 0 : i32
    %c0_i32_0 = arith.constant 0 : i32
    %c0_i32_1 = arith.constant 0 : i32
    %c0_i32_2 = arith.constant 0 : i32
    return %c0_i32, %c0_i32_0, %c0_i32_1 : i32, i32, i32
  }
  func.func @transform_2(%arg0: i32) -> (i32, i32) {
    %c0_i32 = arith.constant 0 : i32
    %c0_i32_0 = arith.constant 0 : i32
    %c0_i32_1 = arith.constant 0 : i32
    return %c0_i32, %c0_i32_0 : i32, i32
  }
  func.func @transform_3(%arg0: i32) -> (i32, i32, i32, i32) {
    %c0_i32 = arith.constant 0 : i32
    %c0_i32_0 = arith.constant 0 : i32
    %c0_i32_1 = arith.constant 0 : i32
    %c0_i32_2 = arith.constant 0 : i32
    return %arg0, %c0_i32, %c0_i32_0, %c0_i32_1 : i32, i32, i32, i32
  }
}

module attributes {stable_mosaic.version = 11 : i64} {
  func.func @_conv3x3_kernel(%arg0: i32, %arg1: memref<1x34x34x8xbf16, #tpu.memory_space<vmem>>, %arg2: memref<9x8x8xbf16, #tpu.memory_space<vmem>>, %arg3: memref<1x8xf32, #tpu.memory_space<vmem>>, %arg4: memref<1x32x32x8xbf16, #tpu.memory_space<vmem>>) attributes {dimension_semantics = [#tpu.dimension_semantics<parallel>], iteration_bounds = array<i64: 2>, scalar_prefetch = 0 : i64, scratch_operands = 0 : i64, tpu.core_type = #tpu.core_type<tc>, window_params = [{transform_indices = @transform_0, window_bounds = array<i64: 1, 34, 34, 8>}, {pipeline_mode = #tpu.pipeline_mode<synchronous>, transform_indices = @transform_1, window_bounds = array<i64: 9, 8, 8>}, {pipeline_mode = #tpu.pipeline_mode<synchronous>, transform_indices = @transform_2, window_bounds = array<i64: 1, 8>}, {transform_indices = @transform_3, window_bounds = array<i64: 1, 32, 32, 8>}]} {
    %c0 = arith.constant 0 : index
    %c0_0 = arith.constant 0 : index
    %0 = vector.load %arg3[%c0, %c0_0] : memref<1x8xf32, #tpu.memory_space<vmem>>, vector<1x8xf32>
    %c0_i32 = arith.constant 0 : i32
    %c32_i32 = arith.constant 32 : i32
    %1 = arith.addi %c0_i32, %c32_i32 : i32
    %c1_i32 = arith.constant 1 : i32
    scf.for %arg5 = %c0_i32 to %1 step %c1_i32  : i32 {
      %cst = arith.constant 0.000000e+00 : f32
      %2 = vector.broadcast %cst : f32 to vector<32x8xf32>
      %c0_i32_2 = arith.constant 0 : i32
      %3 = arith.addi %c0_i32_2, %arg5 : i32
      %c0_3 = arith.constant 0 : index
      %4 = arith.index_cast %3 : i32 to index
      %c0_4 = arith.constant 0 : index
      %c0_5 = arith.constant 0 : index
      %5 = vector.load %arg1[%c0_3, %4, %c0_4, %c0_5] : memref<1x34x34x8xbf16, #tpu.memory_space<vmem>>, vector<1x1x32x8xbf16>
      %6 = vector.shape_cast %5 : vector<1x1x32x8xbf16> to vector<32x8xbf16>
      %c0_6 = arith.constant 0 : index
      %c0_7 = arith.constant 0 : index
      %c0_8 = arith.constant 0 : index
      %7 = vector.load %arg2[%c0_6, %c0_7, %c0_8] : memref<9x8x8xbf16, #tpu.memory_space<vmem>>, vector<1x8x8xbf16>
      %8 = vector.shape_cast %7 : vector<1x8x8xbf16> to vector<8x8xbf16>
      %cst_9 = arith.constant dense<0.000000e+00> : vector<32x8xf32>
      %9 = tpu.matmul %6, %8, %cst_9 {dimension_numbers = #tpu.dot_dimension_numbers<[1], [0], [0], [1], [0, 0, 1, 1], [], []>} : vector<32x8xbf16>, vector<8x8xbf16>, vector<32x8xf32> -> vector<32x8xf32>
      %10 = arith.addf %2, %9 : vector<32x8xf32>
      %c0_i32_10 = arith.constant 0 : i32
      %11 = arith.addi %c0_i32_10, %arg5 : i32
      %c0_11 = arith.constant 0 : index
      %12 = arith.index_cast %11 : i32 to index
      %c1 = arith.constant 1 : index
      %c0_12 = arith.constant 0 : index
      %13 = vector.load %arg1[%c0_11, %12, %c1, %c0_12] : memref<1x34x34x8xbf16, #tpu.memory_space<vmem>>, vector<1x1x32x8xbf16>
      %14 = vector.shape_cast %13 : vector<1x1x32x8xbf16> to vector<32x8xbf16>
      %c1_13 = arith.constant 1 : index
      %c0_14 = arith.constant 0 : index
      %c0_15 = arith.constant 0 : index
      %15 = vector.load %arg2[%c1_13, %c0_14, %c0_15] : memref<9x8x8xbf16, #tpu.memory_space<vmem>>, vector<1x8x8xbf16>
      %16 = vector.shape_cast %15 : vector<1x8x8xbf16> to vector<8x8xbf16>
      %cst_16 = arith.constant dense<0.000000e+00> : vector<32x8xf32>
      %17 = tpu.matmul %14, %16, %cst_16 {dimension_numbers = #tpu.dot_dimension_numbers<[1], [0], [0], [1], [0, 0, 1, 1], [], []>} : vector<32x8xbf16>, vector<8x8xbf16>, vector<32x8xf32> -> vector<32x8xf32>
      %18 = arith.addf %10, %17 : vector<32x8xf32>
      %c0_i32_17 = arith.constant 0 : i32
      %19 = arith.addi %c0_i32_17, %arg5 : i32
      %c0_18 = arith.constant 0 : index
      %20 = arith.index_cast %19 : i32 to index
      %c2 = arith.constant 2 : index
      %c0_19 = arith.constant 0 : index
      %21 = vector.load %arg1[%c0_18, %20, %c2, %c0_19] : memref<1x34x34x8xbf16, #tpu.memory_space<vmem>>, vector<1x1x32x8xbf16>
      %22 = vector.shape_cast %21 : vector<1x1x32x8xbf16> to vector<32x8xbf16>
      %c2_20 = arith.constant 2 : index
      %c0_21 = arith.constant 0 : index
      %c0_22 = arith.constant 0 : index
      %23 = vector.load %arg2[%c2_20, %c0_21, %c0_22] : memref<9x8x8xbf16, #tpu.memory_space<vmem>>, vector<1x8x8xbf16>
      %24 = vector.shape_cast %23 : vector<1x8x8xbf16> to vector<8x8xbf16>
      %cst_23 = arith.constant dense<0.000000e+00> : vector<32x8xf32>
      %25 = tpu.matmul %22, %24, %cst_23 {dimension_numbers = #tpu.dot_dimension_numbers<[1], [0], [0], [1], [0, 0, 1, 1], [], []>} : vector<32x8xbf16>, vector<8x8xbf16>, vector<32x8xf32> -> vector<32x8xf32>
      %26 = arith.addf %18, %25 : vector<32x8xf32>
      %c1_i32_24 = arith.constant 1 : i32
      %27 = arith.addi %c1_i32_24, %arg5 : i32
      %c0_25 = arith.constant 0 : index
      %28 = arith.index_cast %27 : i32 to index
      %c0_26 = arith.constant 0 : index
      %c0_27 = arith.constant 0 : index
      %29 = vector.load %arg1[%c0_25, %28, %c0_26, %c0_27] : memref<1x34x34x8xbf16, #tpu.memory_space<vmem>>, vector<1x1x32x8xbf16>
      %30 = vector.shape_cast %29 : vector<1x1x32x8xbf16> to vector<32x8xbf16>
      %c3 = arith.constant 3 : index
      %c0_28 = arith.constant 0 : index
      %c0_29 = arith.constant 0 : index
      %31 = vector.load %arg2[%c3, %c0_28, %c0_29] : memref<9x8x8xbf16, #tpu.memory_space<vmem>>, vector<1x8x8xbf16>
      %32 = vector.shape_cast %31 : vector<1x8x8xbf16> to vector<8x8xbf16>
      %cst_30 = arith.constant dense<0.000000e+00> : vector<32x8xf32>
      %33 = tpu.matmul %30, %32, %cst_30 {dimension_numbers = #tpu.dot_dimension_numbers<[1], [0], [0], [1], [0, 0, 1, 1], [], []>} : vector<32x8xbf16>, vector<8x8xbf16>, vector<32x8xf32> -> vector<32x8xf32>
      %34 = arith.addf %26, %33 : vector<32x8xf32>
      %c1_i32_31 = arith.constant 1 : i32
      %35 = arith.addi %c1_i32_31, %arg5 : i32
      %c0_32 = arith.constant 0 : index
      %36 = arith.index_cast %35 : i32 to index
      %c1_33 = arith.constant 1 : index
      %c0_34 = arith.constant 0 : index
      %37 = vector.load %arg1[%c0_32, %36, %c1_33, %c0_34] : memref<1x34x34x8xbf16, #tpu.memory_space<vmem>>, vector<1x1x32x8xbf16>
      %38 = vector.shape_cast %37 : vector<1x1x32x8xbf16> to vector<32x8xbf16>
      %c4 = arith.constant 4 : index
      %c0_35 = arith.constant 0 : index
      %c0_36 = arith.constant 0 : index
      %39 = vector.load %arg2[%c4, %c0_35, %c0_36] : memref<9x8x8xbf16, #tpu.memory_space<vmem>>, vector<1x8x8xbf16>
      %40 = vector.shape_cast %39 : vector<1x8x8xbf16> to vector<8x8xbf16>
      %cst_37 = arith.constant dense<0.000000e+00> : vector<32x8xf32>
      %41 = tpu.matmul %38, %40, %cst_37 {dimension_numbers = #tpu.dot_dimension_numbers<[1], [0], [0], [1], [0, 0, 1, 1], [], []>} : vector<32x8xbf16>, vector<8x8xbf16>, vector<32x8xf32> -> vector<32x8xf32>
      %42 = arith.addf %34, %41 : vector<32x8xf32>
      %c1_i32_38 = arith.constant 1 : i32
      %43 = arith.addi %c1_i32_38, %arg5 : i32
      %c0_39 = arith.constant 0 : index
      %44 = arith.index_cast %43 : i32 to index
      %c2_40 = arith.constant 2 : index
      %c0_41 = arith.constant 0 : index
      %45 = vector.load %arg1[%c0_39, %44, %c2_40, %c0_41] : memref<1x34x34x8xbf16, #tpu.memory_space<vmem>>, vector<1x1x32x8xbf16>
      %46 = vector.shape_cast %45 : vector<1x1x32x8xbf16> to vector<32x8xbf16>
      %c5 = arith.constant 5 : index
      %c0_42 = arith.constant 0 : index
      %c0_43 = arith.constant 0 : index
      %47 = vector.load %arg2[%c5, %c0_42, %c0_43] : memref<9x8x8xbf16, #tpu.memory_space<vmem>>, vector<1x8x8xbf16>
      %48 = vector.shape_cast %47 : vector<1x8x8xbf16> to vector<8x8xbf16>
      %cst_44 = arith.constant dense<0.000000e+00> : vector<32x8xf32>
      %49 = tpu.matmul %46, %48, %cst_44 {dimension_numbers = #tpu.dot_dimension_numbers<[1], [0], [0], [1], [0, 0, 1, 1], [], []>} : vector<32x8xbf16>, vector<8x8xbf16>, vector<32x8xf32> -> vector<32x8xf32>
      %50 = arith.addf %42, %49 : vector<32x8xf32>
      %c2_i32 = arith.constant 2 : i32
      %51 = arith.addi %c2_i32, %arg5 : i32
      %c0_45 = arith.constant 0 : index
      %52 = arith.index_cast %51 : i32 to index
      %c0_46 = arith.constant 0 : index
      %c0_47 = arith.constant 0 : index
      %53 = vector.load %arg1[%c0_45, %52, %c0_46, %c0_47] : memref<1x34x34x8xbf16, #tpu.memory_space<vmem>>, vector<1x1x32x8xbf16>
      %54 = vector.shape_cast %53 : vector<1x1x32x8xbf16> to vector<32x8xbf16>
      %c6 = arith.constant 6 : index
      %c0_48 = arith.constant 0 : index
      %c0_49 = arith.constant 0 : index
      %55 = vector.load %arg2[%c6, %c0_48, %c0_49] : memref<9x8x8xbf16, #tpu.memory_space<vmem>>, vector<1x8x8xbf16>
      %56 = vector.shape_cast %55 : vector<1x8x8xbf16> to vector<8x8xbf16>
      %cst_50 = arith.constant dense<0.000000e+00> : vector<32x8xf32>
      %57 = tpu.matmul %54, %56, %cst_50 {dimension_numbers = #tpu.dot_dimension_numbers<[1], [0], [0], [1], [0, 0, 1, 1], [], []>} : vector<32x8xbf16>, vector<8x8xbf16>, vector<32x8xf32> -> vector<32x8xf32>
      %58 = arith.addf %50, %57 : vector<32x8xf32>
      %c2_i32_51 = arith.constant 2 : i32
      %59 = arith.addi %c2_i32_51, %arg5 : i32
      %c0_52 = arith.constant 0 : index
      %60 = arith.index_cast %59 : i32 to index
      %c1_53 = arith.constant 1 : index
      %c0_54 = arith.constant 0 : index
      %61 = vector.load %arg1[%c0_52, %60, %c1_53, %c0_54] : memref<1x34x34x8xbf16, #tpu.memory_space<vmem>>, vector<1x1x32x8xbf16>
      %62 = vector.shape_cast %61 : vector<1x1x32x8xbf16> to vector<32x8xbf16>
      %c7 = arith.constant 7 : index
      %c0_55 = arith.constant 0 : index
      %c0_56 = arith.constant 0 : index
      %63 = vector.load %arg2[%c7, %c0_55, %c0_56] : memref<9x8x8xbf16, #tpu.memory_space<vmem>>, vector<1x8x8xbf16>
      %64 = vector.shape_cast %63 : vector<1x8x8xbf16> to vector<8x8xbf16>
      %cst_57 = arith.constant dense<0.000000e+00> : vector<32x8xf32>
      %65 = tpu.matmul %62, %64, %cst_57 {dimension_numbers = #tpu.dot_dimension_numbers<[1], [0], [0], [1], [0, 0, 1, 1], [], []>} : vector<32x8xbf16>, vector<8x8xbf16>, vector<32x8xf32> -> vector<32x8xf32>
      %66 = arith.addf %58, %65 : vector<32x8xf32>
      %c2_i32_58 = arith.constant 2 : i32
      %67 = arith.addi %c2_i32_58, %arg5 : i32
      %c0_59 = arith.constant 0 : index
      %68 = arith.index_cast %67 : i32 to index
      %c2_60 = arith.constant 2 : index
      %c0_61 = arith.constant 0 : index
      %69 = vector.load %arg1[%c0_59, %68, %c2_60, %c0_61] : memref<1x34x34x8xbf16, #tpu.memory_space<vmem>>, vector<1x1x32x8xbf16>
      %70 = vector.shape_cast %69 : vector<1x1x32x8xbf16> to vector<32x8xbf16>
      %c8 = arith.constant 8 : index
      %c0_62 = arith.constant 0 : index
      %c0_63 = arith.constant 0 : index
      %71 = vector.load %arg2[%c8, %c0_62, %c0_63] : memref<9x8x8xbf16, #tpu.memory_space<vmem>>, vector<1x8x8xbf16>
      %72 = vector.shape_cast %71 : vector<1x8x8xbf16> to vector<8x8xbf16>
      %cst_64 = arith.constant dense<0.000000e+00> : vector<32x8xf32>
      %73 = tpu.matmul %70, %72, %cst_64 {dimension_numbers = #tpu.dot_dimension_numbers<[1], [0], [0], [1], [0, 0, 1, 1], [], []>} : vector<32x8xbf16>, vector<8x8xbf16>, vector<32x8xf32> -> vector<32x8xf32>
      %74 = arith.addf %66, %73 : vector<32x8xf32>
      %75 = vector.broadcast %0 : vector<1x8xf32> to vector<32x8xf32>
      %76 = arith.addf %74, %75 : vector<32x8xf32>
      %cst_65 = arith.constant 0.000000e+00 : f32
      %77 = vector.broadcast %cst_65 : f32 to vector<32x8xf32>
      %78 = arith.maximumf %76, %77 : vector<32x8xf32>
      %79 = arith.truncf %78 : vector<32x8xf32> to vector<32x8xbf16>
      %c0_66 = arith.constant 0 : index
      %80 = arith.index_cast %arg5 : i32 to index
      %c0_67 = arith.constant 0 : index
      %c0_68 = arith.constant 0 : index
      %81 = vector.load %arg4[%c0_66, %80, %c0_67, %c0_68] : memref<1x32x32x8xbf16, #tpu.memory_space<vmem>>, vector<1x1x32x8xbf16>
      %82 = vector.shape_cast %81 : vector<1x1x32x8xbf16> to vector<32x8xbf16>
      %83 = vector.shape_cast %79 : vector<32x8xbf16> to vector<1x1x32x8xbf16>
      tpu.vector_store %arg4[%c0_66, %80, %c0_67, %c0_68], %83 {strides = array<i32>} : memref<1x32x32x8xbf16, #tpu.memory_space<vmem>>, vector<1x1x32x8xbf16>,
    }
    %c32_i32_1 = arith.constant 32 : i32
    return
  }
  func.func @transform_0(%arg0: i32) -> (i32, i32, i32, i32) {
    %c0_i32 = arith.constant 0 : i32
    %c0_i32_0 = arith.constant 0 : i32
    %c0_i32_1 = arith.constant 0 : i32
    %c0_i32_2 = arith.constant 0 : i32
    return %arg0, %c0_i32, %c0_i32_0, %c0_i32_1 : i32, i32, i32, i32
  }
  func.func @transform_1(%arg0: i32) -> (i32, i32, i32) {
    %c0_i32 = arith.constant 0 : i32
    %c0_i32_0 = arith.constant 0 : i32
    %c0_i32_1 = arith.constant 0 : i32
    %c0_i32_2 = arith.constant 0 : i32
    return %c0_i32, %c0_i32_0, %c0_i32_1 : i32, i32, i32
  }
  func.func @transform_2(%arg0: i32) -> (i32, i32) {
    %c0_i32 = arith.constant 0 : i32
    %c0_i32_0 = arith.constant 0 : i32
    %c0_i32_1 = arith.constant 0 : i32
    return %c0_i32, %c0_i32_0 : i32, i32
  }
  func.func @transform_3(%arg0: i32) -> (i32, i32, i32, i32) {
    %c0_i32 = arith.constant 0 : i32
    %c0_i32_0 = arith.constant 0 : i32
    %c0_i32_1 = arith.constant 0 : i32
    %c0_i32_2 = arith.constant 0 : i32
    return %arg0, %c0_i32, %c0_i32_0, %c0_i32_1 : i32, i32, i32, i32
  }
}

module attributes {stable_mosaic.version = 11 : i64} {
  func.func @_conv3x3_kernel(%arg0: i32, %arg1: memref<1x34x34x8xbf16, #tpu.memory_space<vmem>>, %arg2: memref<9x8x8xbf16, #tpu.memory_space<vmem>>, %arg3: memref<1x8xf32, #tpu.memory_space<vmem>>, %arg4: memref<1x32x32x8xbf16, #tpu.memory_space<vmem>>, %arg5: memref<1x32x32x8xbf16, #tpu.memory_space<vmem>>) attributes {dimension_semantics = [#tpu.dimension_semantics<parallel>], iteration_bounds = array<i64: 2>, scalar_prefetch = 0 : i64, scratch_operands = 0 : i64, tpu.core_type = #tpu.core_type<tc>, window_params = [{transform_indices = @transform_0, window_bounds = array<i64: 1, 34, 34, 8>}, {pipeline_mode = #tpu.pipeline_mode<synchronous>, transform_indices = @transform_1, window_bounds = array<i64: 9, 8, 8>}, {pipeline_mode = #tpu.pipeline_mode<synchronous>, transform_indices = @transform_2, window_bounds = array<i64: 1, 8>}, {transform_indices = @transform_3, window_bounds = array<i64: 1, 32, 32, 8>}, {transform_indices = @transform_4, window_bounds = array<i64: 1, 32, 32, 8>}]} {
    %c0 = arith.constant 0 : index
    %c0_0 = arith.constant 0 : index
    %0 = vector.load %arg3[%c0, %c0_0] : memref<1x8xf32, #tpu.memory_space<vmem>>, vector<1x8xf32>
    %c0_i32 = arith.constant 0 : i32
    %c32_i32 = arith.constant 32 : i32
    %1 = arith.addi %c0_i32, %c32_i32 : i32
    %c1_i32 = arith.constant 1 : i32
    scf.for %arg6 = %c0_i32 to %1 step %c1_i32  : i32 {
      %cst = arith.constant 0.000000e+00 : f32
      %2 = vector.broadcast %cst : f32 to vector<32x8xf32>
      %c0_i32_2 = arith.constant 0 : i32
      %3 = arith.addi %c0_i32_2, %arg6 : i32
      %c0_3 = arith.constant 0 : index
      %4 = arith.index_cast %3 : i32 to index
      %c0_4 = arith.constant 0 : index
      %c0_5 = arith.constant 0 : index
      %5 = vector.load %arg1[%c0_3, %4, %c0_4, %c0_5] : memref<1x34x34x8xbf16, #tpu.memory_space<vmem>>, vector<1x1x32x8xbf16>
      %6 = vector.shape_cast %5 : vector<1x1x32x8xbf16> to vector<32x8xbf16>
      %c0_6 = arith.constant 0 : index
      %c0_7 = arith.constant 0 : index
      %c0_8 = arith.constant 0 : index
      %7 = vector.load %arg2[%c0_6, %c0_7, %c0_8] : memref<9x8x8xbf16, #tpu.memory_space<vmem>>, vector<1x8x8xbf16>
      %8 = vector.shape_cast %7 : vector<1x8x8xbf16> to vector<8x8xbf16>
      %cst_9 = arith.constant dense<0.000000e+00> : vector<32x8xf32>
      %9 = tpu.matmul %6, %8, %cst_9 {dimension_numbers = #tpu.dot_dimension_numbers<[1], [0], [0], [1], [0, 0, 1, 1], [], []>} : vector<32x8xbf16>, vector<8x8xbf16>, vector<32x8xf32> -> vector<32x8xf32>
      %10 = arith.addf %2, %9 : vector<32x8xf32>
      %c0_i32_10 = arith.constant 0 : i32
      %11 = arith.addi %c0_i32_10, %arg6 : i32
      %c0_11 = arith.constant 0 : index
      %12 = arith.index_cast %11 : i32 to index
      %c1 = arith.constant 1 : index
      %c0_12 = arith.constant 0 : index
      %13 = vector.load %arg1[%c0_11, %12, %c1, %c0_12] : memref<1x34x34x8xbf16, #tpu.memory_space<vmem>>, vector<1x1x32x8xbf16>
      %14 = vector.shape_cast %13 : vector<1x1x32x8xbf16> to vector<32x8xbf16>
      %c1_13 = arith.constant 1 : index
      %c0_14 = arith.constant 0 : index
      %c0_15 = arith.constant 0 : index
      %15 = vector.load %arg2[%c1_13, %c0_14, %c0_15] : memref<9x8x8xbf16, #tpu.memory_space<vmem>>, vector<1x8x8xbf16>
      %16 = vector.shape_cast %15 : vector<1x8x8xbf16> to vector<8x8xbf16>
      %cst_16 = arith.constant dense<0.000000e+00> : vector<32x8xf32>
      %17 = tpu.matmul %14, %16, %cst_16 {dimension_numbers = #tpu.dot_dimension_numbers<[1], [0], [0], [1], [0, 0, 1, 1], [], []>} : vector<32x8xbf16>, vector<8x8xbf16>, vector<32x8xf32> -> vector<32x8xf32>
      %18 = arith.addf %10, %17 : vector<32x8xf32>
      %c0_i32_17 = arith.constant 0 : i32
      %19 = arith.addi %c0_i32_17, %arg6 : i32
      %c0_18 = arith.constant 0 : index
      %20 = arith.index_cast %19 : i32 to index
      %c2 = arith.constant 2 : index
      %c0_19 = arith.constant 0 : index
      %21 = vector.load %arg1[%c0_18, %20, %c2, %c0_19] : memref<1x34x34x8xbf16, #tpu.memory_space<vmem>>, vector<1x1x32x8xbf16>
      %22 = vector.shape_cast %21 : vector<1x1x32x8xbf16> to vector<32x8xbf16>
      %c2_20 = arith.constant 2 : index
      %c0_21 = arith.constant 0 : index
      %c0_22 = arith.constant 0 : index
      %23 = vector.load %arg2[%c2_20, %c0_21, %c0_22] : memref<9x8x8xbf16, #tpu.memory_space<vmem>>, vector<1x8x8xbf16>
      %24 = vector.shape_cast %23 : vector<1x8x8xbf16> to vector<8x8xbf16>
      %cst_23 = arith.constant dense<0.000000e+00> : vector<32x8xf32>
      %25 = tpu.matmul %22, %24, %cst_23 {dimension_numbers = #tpu.dot_dimension_numbers<[1], [0], [0], [1], [0, 0, 1, 1], [], []>} : vector<32x8xbf16>, vector<8x8xbf16>, vector<32x8xf32> -> vector<32x8xf32>
      %26 = arith.addf %18, %25 : vector<32x8xf32>
      %c1_i32_24 = arith.constant 1 : i32
      %27 = arith.addi %c1_i32_24, %arg6 : i32
      %c0_25 = arith.constant 0 : index
      %28 = arith.index_cast %27 : i32 to index
      %c0_26 = arith.constant 0 : index
      %c0_27 = arith.constant 0 : index
      %29 = vector.load %arg1[%c0_25, %28, %c0_26, %c0_27] : memref<1x34x34x8xbf16, #tpu.memory_space<vmem>>, vector<1x1x32x8xbf16>
      %30 = vector.shape_cast %29 : vector<1x1x32x8xbf16> to vector<32x8xbf16>
      %c3 = arith.constant 3 : index
      %c0_28 = arith.constant 0 : index
      %c0_29 = arith.constant 0 : index
      %31 = vector.load %arg2[%c3, %c0_28, %c0_29] : memref<9x8x8xbf16, #tpu.memory_space<vmem>>, vector<1x8x8xbf16>
      %32 = vector.shape_cast %31 : vector<1x8x8xbf16> to vector<8x8xbf16>
      %cst_30 = arith.constant dense<0.000000e+00> : vector<32x8xf32>
      %33 = tpu.matmul %30, %32, %cst_30 {dimension_numbers = #tpu.dot_dimension_numbers<[1], [0], [0], [1], [0, 0, 1, 1], [], []>} : vector<32x8xbf16>, vector<8x8xbf16>, vector<32x8xf32> -> vector<32x8xf32>
      %34 = arith.addf %26, %33 : vector<32x8xf32>
      %c1_i32_31 = arith.constant 1 : i32
      %35 = arith.addi %c1_i32_31, %arg6 : i32
      %c0_32 = arith.constant 0 : index
      %36 = arith.index_cast %35 : i32 to index
      %c1_33 = arith.constant 1 : index
      %c0_34 = arith.constant 0 : index
      %37 = vector.load %arg1[%c0_32, %36, %c1_33, %c0_34] : memref<1x34x34x8xbf16, #tpu.memory_space<vmem>>, vector<1x1x32x8xbf16>
      %38 = vector.shape_cast %37 : vector<1x1x32x8xbf16> to vector<32x8xbf16>
      %c4 = arith.constant 4 : index
      %c0_35 = arith.constant 0 : index
      %c0_36 = arith.constant 0 : index
      %39 = vector.load %arg2[%c4, %c0_35, %c0_36] : memref<9x8x8xbf16, #tpu.memory_space<vmem>>, vector<1x8x8xbf16>
      %40 = vector.shape_cast %39 : vector<1x8x8xbf16> to vector<8x8xbf16>
      %cst_37 = arith.constant dense<0.000000e+00> : vector<32x8xf32>
      %41 = tpu.matmul %38, %40, %cst_37 {dimension_numbers = #tpu.dot_dimension_numbers<[1], [0], [0], [1], [0, 0, 1, 1], [], []>} : vector<32x8xbf16>, vector<8x8xbf16>, vector<32x8xf32> -> vector<32x8xf32>
      %42 = arith.addf %34, %41 : vector<32x8xf32>
      %c1_i32_38 = arith.constant 1 : i32
      %43 = arith.addi %c1_i32_38, %arg6 : i32
      %c0_39 = arith.constant 0 : index
      %44 = arith.index_cast %43 : i32 to index
      %c2_40 = arith.constant 2 : index
      %c0_41 = arith.constant 0 : index
      %45 = vector.load %arg1[%c0_39, %44, %c2_40, %c0_41] : memref<1x34x34x8xbf16, #tpu.memory_space<vmem>>, vector<1x1x32x8xbf16>
      %46 = vector.shape_cast %45 : vector<1x1x32x8xbf16> to vector<32x8xbf16>
      %c5 = arith.constant 5 : index
      %c0_42 = arith.constant 0 : index
      %c0_43 = arith.constant 0 : index
      %47 = vector.load %arg2[%c5, %c0_42, %c0_43] : memref<9x8x8xbf16, #tpu.memory_space<vmem>>, vector<1x8x8xbf16>
      %48 = vector.shape_cast %47 : vector<1x8x8xbf16> to vector<8x8xbf16>
      %cst_44 = arith.constant dense<0.000000e+00> : vector<32x8xf32>
      %49 = tpu.matmul %46, %48, %cst_44 {dimension_numbers = #tpu.dot_dimension_numbers<[1], [0], [0], [1], [0, 0, 1, 1], [], []>} : vector<32x8xbf16>, vector<8x8xbf16>, vector<32x8xf32> -> vector<32x8xf32>
      %50 = arith.addf %42, %49 : vector<32x8xf32>
      %c2_i32 = arith.constant 2 : i32
      %51 = arith.addi %c2_i32, %arg6 : i32
      %c0_45 = arith.constant 0 : index
      %52 = arith.index_cast %51 : i32 to index
      %c0_46 = arith.constant 0 : index
      %c0_47 = arith.constant 0 : index
      %53 = vector.load %arg1[%c0_45, %52, %c0_46, %c0_47] : memref<1x34x34x8xbf16, #tpu.memory_space<vmem>>, vector<1x1x32x8xbf16>
      %54 = vector.shape_cast %53 : vector<1x1x32x8xbf16> to vector<32x8xbf16>
      %c6 = arith.constant 6 : index
      %c0_48 = arith.constant 0 : index
      %c0_49 = arith.constant 0 : index
      %55 = vector.load %arg2[%c6, %c0_48, %c0_49] : memref<9x8x8xbf16, #tpu.memory_space<vmem>>, vector<1x8x8xbf16>
      %56 = vector.shape_cast %55 : vector<1x8x8xbf16> to vector<8x8xbf16>
      %cst_50 = arith.constant dense<0.000000e+00> : vector<32x8xf32>
      %57 = tpu.matmul %54, %56, %cst_50 {dimension_numbers = #tpu.dot_dimension_numbers<[1], [0], [0], [1], [0, 0, 1, 1], [], []>} : vector<32x8xbf16>, vector<8x8xbf16>, vector<32x8xf32> -> vector<32x8xf32>
      %58 = arith.addf %50, %57 : vector<32x8xf32>
      %c2_i32_51 = arith.constant 2 : i32
      %59 = arith.addi %c2_i32_51, %arg6 : i32
      %c0_52 = arith.constant 0 : index
      %60 = arith.index_cast %59 : i32 to index
      %c1_53 = arith.constant 1 : index
      %c0_54 = arith.constant 0 : index
      %61 = vector.load %arg1[%c0_52, %60, %c1_53, %c0_54] : memref<1x34x34x8xbf16, #tpu.memory_space<vmem>>, vector<1x1x32x8xbf16>
      %62 = vector.shape_cast %61 : vector<1x1x32x8xbf16> to vector<32x8xbf16>
      %c7 = arith.constant 7 : index
      %c0_55 = arith.constant 0 : index
      %c0_56 = arith.constant 0 : index
      %63 = vector.load %arg2[%c7, %c0_55, %c0_56] : memref<9x8x8xbf16, #tpu.memory_space<vmem>>, vector<1x8x8xbf16>
      %64 = vector.shape_cast %63 : vector<1x8x8xbf16> to vector<8x8xbf16>
      %cst_57 = arith.constant dense<0.000000e+00> : vector<32x8xf32>
      %65 = tpu.matmul %62, %64, %cst_57 {dimension_numbers = #tpu.dot_dimension_numbers<[1], [0], [0], [1], [0, 0, 1, 1], [], []>} : vector<32x8xbf16>, vector<8x8xbf16>, vector<32x8xf32> -> vector<32x8xf32>
      %66 = arith.addf %58, %65 : vector<32x8xf32>
      %c2_i32_58 = arith.constant 2 : i32
      %67 = arith.addi %c2_i32_58, %arg6 : i32
      %c0_59 = arith.constant 0 : index
      %68 = arith.index_cast %67 : i32 to index
      %c2_60 = arith.constant 2 : index
      %c0_61 = arith.constant 0 : index
      %69 = vector.load %arg1[%c0_59, %68, %c2_60, %c0_61] : memref<1x34x34x8xbf16, #tpu.memory_space<vmem>>, vector<1x1x32x8xbf16>
      %70 = vector.shape_cast %69 : vector<1x1x32x8xbf16> to vector<32x8xbf16>
      %c8 = arith.constant 8 : index
      %c0_62 = arith.constant 0 : index
      %c0_63 = arith.constant 0 : index
      %71 = vector.load %arg2[%c8, %c0_62, %c0_63] : memref<9x8x8xbf16, #tpu.memory_space<vmem>>, vector<1x8x8xbf16>
      %72 = vector.shape_cast %71 : vector<1x8x8xbf16> to vector<8x8xbf16>
      %cst_64 = arith.constant dense<0.000000e+00> : vector<32x8xf32>
      %73 = tpu.matmul %70, %72, %cst_64 {dimension_numbers = #tpu.dot_dimension_numbers<[1], [0], [0], [1], [0, 0, 1, 1], [], []>} : vector<32x8xbf16>, vector<8x8xbf16>, vector<32x8xf32> -> vector<32x8xf32>
      %74 = arith.addf %66, %73 : vector<32x8xf32>
      %75 = vector.broadcast %0 : vector<1x8xf32> to vector<32x8xf32>
      %76 = arith.addf %74, %75 : vector<32x8xf32>
      %c0_65 = arith.constant 0 : index
      %77 = arith.index_cast %arg6 : i32 to index
      %c0_66 = arith.constant 0 : index
      %c0_67 = arith.constant 0 : index
      %78 = vector.load %arg4[%c0_65, %77, %c0_66, %c0_67] : memref<1x32x32x8xbf16, #tpu.memory_space<vmem>>, vector<1x1x32x8xbf16>
      %79 = vector.shape_cast %78 : vector<1x1x32x8xbf16> to vector<32x8xbf16>
      %80 = arith.extf %79 : vector<32x8xbf16> to vector<32x8xf32>
      %81 = arith.addf %76, %80 : vector<32x8xf32>
      %cst_68 = arith.constant 0.000000e+00 : f32
      %82 = vector.broadcast %cst_68 : f32 to vector<32x8xf32>
      %83 = arith.maximumf %81, %82 : vector<32x8xf32>
      %84 = arith.truncf %83 : vector<32x8xf32> to vector<32x8xbf16>
      %c0_69 = arith.constant 0 : index
      %85 = arith.index_cast %arg6 : i32 to index
      %c0_70 = arith.constant 0 : index
      %c0_71 = arith.constant 0 : index
      %86 = vector.load %arg5[%c0_69, %85, %c0_70, %c0_71] : memref<1x32x32x8xbf16, #tpu.memory_space<vmem>>, vector<1x1x32x8xbf16>
      %87 = vector.shape_cast %86 : vector<1x1x32x8xbf16> to vector<32x8xbf16>
      %88 = vector.shape_cast %84 : vector<32x8xbf16> to vector<1x1x32x8xbf16>
      tpu.vector_store %arg5[%c0_69, %85, %c0_70, %c0_71], %88 {strides = array<i32>} : memref<1x32x32x8xbf16, #tpu.memory_space<vmem>>, vector<1x1x32x8xbf16>,
    }
    %c32_i32_1 = arith.constant 32 : i32
    return
  }
  func.func @transform_0(%arg0: i32) -> (i32, i32, i32, i32) {
    %c0_i32 = arith.constant 0 : i32
    %c0_i32_0 = arith.constant 0 : i32
    %c0_i32_1 = arith.constant 0 : i32
    %c0_i32_2 = arith.constant 0 : i32
    return %arg0, %c0_i32, %c0_i32_0, %c0_i32_1 : i32, i32, i32, i32
  }
  func.func @transform_1(%arg0: i32) -> (i32, i32, i32) {
    %c0_i32 = arith.constant 0 : i32
    %c0_i32_0 = arith.constant 0 : i32
    %c0_i32_1 = arith.constant 0 : i32
    %c0_i32_2 = arith.constant 0 : i32
    return %c0_i32, %c0_i32_0, %c0_i32_1 : i32, i32, i32
  }
  func.func @transform_2(%arg0: i32) -> (i32, i32) {
    %c0_i32 = arith.constant 0 : i32
    %c0_i32_0 = arith.constant 0 : i32
    %c0_i32_1 = arith.constant 0 : i32
    return %c0_i32, %c0_i32_0 : i32, i32
  }
  func.func @transform_3(%arg0: i32) -> (i32, i32, i32, i32) {
    %c0_i32 = arith.constant 0 : i32
    %c0_i32_0 = arith.constant 0 : i32
    %c0_i32_1 = arith.constant 0 : i32
    %c0_i32_2 = arith.constant 0 : i32
    return %arg0, %c0_i32, %c0_i32_0, %c0_i32_1 : i32, i32, i32, i32
  }
  func.func @transform_4(%arg0: i32) -> (i32, i32, i32, i32) {
    %c0_i32 = arith.constant 0 : i32
    %c0_i32_0 = arith.constant 0 : i32
    %c0_i32_1 = arith.constant 0 : i32
    %c0_i32_2 = arith.constant 0 : i32
    return %arg0, %c0_i32, %c0_i32_0, %c0_i32_1 : i32, i32, i32, i32
  }
}

module attributes {stable_mosaic.version = 11 : i64} {
  func.func @_conv3x3_kernel(%arg0: i32, %arg1: memref<1x68x17x8xbf16, #tpu.memory_space<vmem>>, %arg2: memref<9x8x16xbf16, #tpu.memory_space<vmem>>, %arg3: memref<1x16xf32, #tpu.memory_space<vmem>>, %arg4: memref<8x16xbf16, #tpu.memory_space<vmem>>, %arg5: memref<1x16xf32, #tpu.memory_space<vmem>>, %arg6: memref<1x16x16x16xbf16, #tpu.memory_space<vmem>>, %arg7: memref<1x16x16x16xbf16, #tpu.memory_space<vmem>>) attributes {dimension_semantics = [#tpu.dimension_semantics<parallel>], iteration_bounds = array<i64: 2>, scalar_prefetch = 0 : i64, scratch_operands = 0 : i64, tpu.core_type = #tpu.core_type<tc>, window_params = [{transform_indices = @transform_0, window_bounds = array<i64: 1, 68, 17, 8>}, {pipeline_mode = #tpu.pipeline_mode<synchronous>, transform_indices = @transform_1, window_bounds = array<i64: 9, 8, 16>}, {pipeline_mode = #tpu.pipeline_mode<synchronous>, transform_indices = @transform_2, window_bounds = array<i64: 1, 16>}, {pipeline_mode = #tpu.pipeline_mode<synchronous>, transform_indices = @transform_3, window_bounds = array<i64: 8, 16>}, {pipeline_mode = #tpu.pipeline_mode<synchronous>, transform_indices = @transform_4, window_bounds = array<i64: 1, 16>}, {transform_indices = @transform_5, window_bounds = array<i64: 1, 16, 16, 16>}, {transform_indices = @transform_6, window_bounds = array<i64: 1, 16, 16, 16>}]} {
    %c0 = arith.constant 0 : index
    %c0_0 = arith.constant 0 : index
    %0 = vector.load %arg3[%c0, %c0_0] : memref<1x16xf32, #tpu.memory_space<vmem>>, vector<1x16xf32>
    %c0_i32 = arith.constant 0 : i32
    %c16_i32 = arith.constant 16 : i32
    %1 = arith.addi %c0_i32, %c16_i32 : i32
    %c1_i32 = arith.constant 1 : i32
    scf.for %arg8 = %c0_i32 to %1 step %c1_i32  : i32 {
      %cst = arith.constant 0.000000e+00 : f32
      %2 = vector.broadcast %cst : f32 to vector<16x16xf32>
      %c0_i32_2 = arith.constant 0 : i32
      %3 = arith.addi %c0_i32_2, %arg8 : i32
      %c0_3 = arith.constant 0 : index
      %4 = arith.index_cast %3 : i32 to index
      %c0_4 = arith.constant 0 : index
      %c0_5 = arith.constant 0 : index
      %5 = vector.load %arg1[%c0_3, %4, %c0_4, %c0_5] : memref<1x68x17x8xbf16, #tpu.memory_space<vmem>>, vector<1x1x16x8xbf16>
      %6 = vector.shape_cast %5 : vector<1x1x16x8xbf16> to vector<16x8xbf16>
      %c0_6 = arith.constant 0 : index
      %c0_7 = arith.constant 0 : index
      %c0_8 = arith.constant 0 : index
      %7 = vector.load %arg2[%c0_6, %c0_7, %c0_8] : memref<9x8x16xbf16, #tpu.memory_space<vmem>>, vector<1x8x16xbf16>
      %8 = vector.shape_cast %7 : vector<1x8x16xbf16> to vector<8x16xbf16>
      %cst_9 = arith.constant dense<0.000000e+00> : vector<16x16xf32>
      %9 = tpu.matmul %6, %8, %cst_9 {dimension_numbers = #tpu.dot_dimension_numbers<[1], [0], [0], [1], [0, 0, 1, 1], [], []>} : vector<16x8xbf16>, vector<8x16xbf16>, vector<16x16xf32> -> vector<16x16xf32>
      %10 = arith.addf %2, %9 : vector<16x16xf32>
      %c17_i32 = arith.constant 17 : i32
      %11 = arith.addi %c17_i32, %arg8 : i32
      %c0_10 = arith.constant 0 : index
      %12 = arith.index_cast %11 : i32 to index
      %c0_11 = arith.constant 0 : index
      %c0_12 = arith.constant 0 : index
      %13 = vector.load %arg1[%c0_10, %12, %c0_11, %c0_12] : memref<1x68x17x8xbf16, #tpu.memory_space<vmem>>, vector<1x1x16x8xbf16>
      %14 = vector.shape_cast %13 : vector<1x1x16x8xbf16> to vector<16x8xbf16>
      %c1 = arith.constant 1 : index
      %c0_13 = arith.constant 0 : index
      %c0_14 = arith.constant 0 : index
      %15 = vector.load %arg2[%c1, %c0_13, %c0_14] : memref<9x8x16xbf16, #tpu.memory_space<vmem>>, vector<1x8x16xbf16>
      %16 = vector.shape_cast %15 : vector<1x8x16xbf16> to vector<8x16xbf16>
      %cst_15 = arith.constant dense<0.000000e+00> : vector<16x16xf32>
      %17 = tpu.matmul %14, %16, %cst_15 {dimension_numbers = #tpu.dot_dimension_numbers<[1], [0], [0], [1], [0, 0, 1, 1], [], []>} : vector<16x8xbf16>, vector<8x16xbf16>, vector<16x16xf32> -> vector<16x16xf32>
      %18 = arith.addf %10, %17 : vector<16x16xf32>
      %c0_i32_16 = arith.constant 0 : i32
      %19 = arith.addi %c0_i32_16, %arg8 : i32
      %c0_17 = arith.constant 0 : index
      %20 = arith.index_cast %19 : i32 to index
      %c1_18 = arith.constant 1 : index
      %c0_19 = arith.constant 0 : index
      %21 = vector.load %arg1[%c0_17, %20, %c1_18, %c0_19] : memref<1x68x17x8xbf16, #tpu.memory_space<vmem>>, vector<1x1x16x8xbf16>
      %22 = vector.shape_cast %21 : vector<1x1x16x8xbf16> to vector<16x8xbf16>
      %c2 = arith.constant 2 : index
      %c0_20 = arith.constant 0 : index
      %c0_21 = arith.constant 0 : index
      %23 = vector.load %arg2[%c2, %c0_20, %c0_21] : memref<9x8x16xbf16, #tpu.memory_space<vmem>>, vector<1x8x16xbf16>
      %24 = vector.shape_cast %23 : vector<1x8x16xbf16> to vector<8x16xbf16>
      %cst_22 = arith.constant dense<0.000000e+00> : vector<16x16xf32>
      %25 = tpu.matmul %22, %24, %cst_22 {dimension_numbers = #tpu.dot_dimension_numbers<[1], [0], [0], [1], [0, 0, 1, 1], [], []>} : vector<16x8xbf16>, vector<8x16xbf16>, vector<16x16xf32> -> vector<16x16xf32>
      %26 = arith.addf %18, %25 : vector<16x16xf32>
      %c34_i32 = arith.constant 34 : i32
      %27 = arith.addi %c34_i32, %arg8 : i32
      %c0_23 = arith.constant 0 : index
      %28 = arith.index_cast %27 : i32 to index
      %c0_24 = arith.constant 0 : index
      %c0_25 = arith.constant 0 : index
      %29 = vector.load %arg1[%c0_23, %28, %c0_24, %c0_25] : memref<1x68x17x8xbf16, #tpu.memory_space<vmem>>, vector<1x1x16x8xbf16>
      %30 = vector.shape_cast %29 : vector<1x1x16x8xbf16> to vector<16x8xbf16>
      %c3 = arith.constant 3 : index
      %c0_26 = arith.constant 0 : index
      %c0_27 = arith.constant 0 : index
      %31 = vector.load %arg2[%c3, %c0_26, %c0_27] : memref<9x8x16xbf16, #tpu.memory_space<vmem>>, vector<1x8x16xbf16>
      %32 = vector.shape_cast %31 : vector<1x8x16xbf16> to vector<8x16xbf16>
      %cst_28 = arith.constant dense<0.000000e+00> : vector<16x16xf32>
      %33 = tpu.matmul %30, %32, %cst_28 {dimension_numbers = #tpu.dot_dimension_numbers<[1], [0], [0], [1], [0, 0, 1, 1], [], []>} : vector<16x8xbf16>, vector<8x16xbf16>, vector<16x16xf32> -> vector<16x16xf32>
      %34 = arith.addf %26, %33 : vector<16x16xf32>
      %c51_i32 = arith.constant 51 : i32
      %35 = arith.addi %c51_i32, %arg8 : i32
      %c0_29 = arith.constant 0 : index
      %36 = arith.index_cast %35 : i32 to index
      %c0_30 = arith.constant 0 : index
      %c0_31 = arith.constant 0 : index
      %37 = vector.load %arg1[%c0_29, %36, %c0_30, %c0_31] : memref<1x68x17x8xbf16, #tpu.memory_space<vmem>>, vector<1x1x16x8xbf16>
      %38 = vector.shape_cast %37 : vector<1x1x16x8xbf16> to vector<16x8xbf16>
      %c4 = arith.constant 4 : index
      %c0_32 = arith.constant 0 : index
      %c0_33 = arith.constant 0 : index
      %39 = vector.load %arg2[%c4, %c0_32, %c0_33] : memref<9x8x16xbf16, #tpu.memory_space<vmem>>, vector<1x8x16xbf16>
      %40 = vector.shape_cast %39 : vector<1x8x16xbf16> to vector<8x16xbf16>
      %cst_34 = arith.constant dense<0.000000e+00> : vector<16x16xf32>
      %41 = tpu.matmul %38, %40, %cst_34 {dimension_numbers = #tpu.dot_dimension_numbers<[1], [0], [0], [1], [0, 0, 1, 1], [], []>} : vector<16x8xbf16>, vector<8x16xbf16>, vector<16x16xf32> -> vector<16x16xf32>
      %42 = arith.addf %34, %41 : vector<16x16xf32>
      %c34_i32_35 = arith.constant 34 : i32
      %43 = arith.addi %c34_i32_35, %arg8 : i32
      %c0_36 = arith.constant 0 : index
      %44 = arith.index_cast %43 : i32 to index
      %c1_37 = arith.constant 1 : index
      %c0_38 = arith.constant 0 : index
      %45 = vector.load %arg1[%c0_36, %44, %c1_37, %c0_38] : memref<1x68x17x8xbf16, #tpu.memory_space<vmem>>, vector<1x1x16x8xbf16>
      %46 = vector.shape_cast %45 : vector<1x1x16x8xbf16> to vector<16x8xbf16>
      %c5 = arith.constant 5 : index
      %c0_39 = arith.constant 0 : index
      %c0_40 = arith.constant 0 : index
      %47 = vector.load %arg2[%c5, %c0_39, %c0_40] : memref<9x8x16xbf16, #tpu.memory_space<vmem>>, vector<1x8x16xbf16>
      %48 = vector.shape_cast %47 : vector<1x8x16xbf16> to vector<8x16xbf16>
      %cst_41 = arith.constant dense<0.000000e+00> : vector<16x16xf32>
      %49 = tpu.matmul %46, %48, %cst_41 {dimension_numbers = #tpu.dot_dimension_numbers<[1], [0], [0], [1], [0, 0, 1, 1], [], []>} : vector<16x8xbf16>, vector<8x16xbf16>, vector<16x16xf32> -> vector<16x16xf32>
      %50 = arith.addf %42, %49 : vector<16x16xf32>
      %c1_i32_42 = arith.constant 1 : i32
      %51 = arith.addi %c1_i32_42, %arg8 : i32
      %c0_43 = arith.constant 0 : index
      %52 = arith.index_cast %51 : i32 to index
      %c0_44 = arith.constant 0 : index
      %c0_45 = arith.constant 0 : index
      %53 = vector.load %arg1[%c0_43, %52, %c0_44, %c0_45] : memref<1x68x17x8xbf16, #tpu.memory_space<vmem>>, vector<1x1x16x8xbf16>
      %54 = vector.shape_cast %53 : vector<1x1x16x8xbf16> to vector<16x8xbf16>
      %c6 = arith.constant 6 : index
      %c0_46 = arith.constant 0 : index
      %c0_47 = arith.constant 0 : index
      %55 = vector.load %arg2[%c6, %c0_46, %c0_47] : memref<9x8x16xbf16, #tpu.memory_space<vmem>>, vector<1x8x16xbf16>
      %56 = vector.shape_cast %55 : vector<1x8x16xbf16> to vector<8x16xbf16>
      %cst_48 = arith.constant dense<0.000000e+00> : vector<16x16xf32>
      %57 = tpu.matmul %54, %56, %cst_48 {dimension_numbers = #tpu.dot_dimension_numbers<[1], [0], [0], [1], [0, 0, 1, 1], [], []>} : vector<16x8xbf16>, vector<8x16xbf16>, vector<16x16xf32> -> vector<16x16xf32>
      %58 = arith.addf %50, %57 : vector<16x16xf32>
      %c18_i32 = arith.constant 18 : i32
      %59 = arith.addi %c18_i32, %arg8 : i32
      %c0_49 = arith.constant 0 : index
      %60 = arith.index_cast %59 : i32 to index
      %c0_50 = arith.constant 0 : index
      %c0_51 = arith.constant 0 : index
      %61 = vector.load %arg1[%c0_49, %60, %c0_50, %c0_51] : memref<1x68x17x8xbf16, #tpu.memory_space<vmem>>, vector<1x1x16x8xbf16>
      %62 = vector.shape_cast %61 : vector<1x1x16x8xbf16> to vector<16x8xbf16>
      %c7 = arith.constant 7 : index
      %c0_52 = arith.constant 0 : index
      %c0_53 = arith.constant 0 : index
      %63 = vector.load %arg2[%c7, %c0_52, %c0_53] : memref<9x8x16xbf16, #tpu.memory_space<vmem>>, vector<1x8x16xbf16>
      %64 = vector.shape_cast %63 : vector<1x8x16xbf16> to vector<8x16xbf16>
      %cst_54 = arith.constant dense<0.000000e+00> : vector<16x16xf32>
      %65 = tpu.matmul %62, %64, %cst_54 {dimension_numbers = #tpu.dot_dimension_numbers<[1], [0], [0], [1], [0, 0, 1, 1], [], []>} : vector<16x8xbf16>, vector<8x16xbf16>, vector<16x16xf32> -> vector<16x16xf32>
      %66 = arith.addf %58, %65 : vector<16x16xf32>
      %c1_i32_55 = arith.constant 1 : i32
      %67 = arith.addi %c1_i32_55, %arg8 : i32
      %c0_56 = arith.constant 0 : index
      %68 = arith.index_cast %67 : i32 to index
      %c1_57 = arith.constant 1 : index
      %c0_58 = arith.constant 0 : index
      %69 = vector.load %arg1[%c0_56, %68, %c1_57, %c0_58] : memref<1x68x17x8xbf16, #tpu.memory_space<vmem>>, vector<1x1x16x8xbf16>
      %70 = vector.shape_cast %69 : vector<1x1x16x8xbf16> to vector<16x8xbf16>
      %c8 = arith.constant 8 : index
      %c0_59 = arith.constant 0 : index
      %c0_60 = arith.constant 0 : index
      %71 = vector.load %arg2[%c8, %c0_59, %c0_60] : memref<9x8x16xbf16, #tpu.memory_space<vmem>>, vector<1x8x16xbf16>
      %72 = vector.shape_cast %71 : vector<1x8x16xbf16> to vector<8x16xbf16>
      %cst_61 = arith.constant dense<0.000000e+00> : vector<16x16xf32>
      %73 = tpu.matmul %70, %72, %cst_61 {dimension_numbers = #tpu.dot_dimension_numbers<[1], [0], [0], [1], [0, 0, 1, 1], [], []>} : vector<16x8xbf16>, vector<8x16xbf16>, vector<16x16xf32> -> vector<16x16xf32>
      %74 = arith.addf %66, %73 : vector<16x16xf32>
      %75 = vector.broadcast %0 : vector<1x16xf32> to vector<16x16xf32>
      %76 = arith.addf %74, %75 : vector<16x16xf32>
      %cst_62 = arith.constant 0.000000e+00 : f32
      %77 = vector.broadcast %cst_62 : f32 to vector<16x16xf32>
      %78 = arith.maximumf %76, %77 : vector<16x16xf32>
      %79 = arith.truncf %78 : vector<16x16xf32> to vector<16x16xbf16>
      %c0_63 = arith.constant 0 : index
      %80 = arith.index_cast %arg8 : i32 to index
      %c0_64 = arith.constant 0 : index
      %c0_65 = arith.constant 0 : index
      %81 = vector.load %arg6[%c0_63, %80, %c0_64, %c0_65] : memref<1x16x16x16xbf16, #tpu.memory_space<vmem>>, vector<1x1x16x16xbf16>
      %82 = vector.shape_cast %81 : vector<1x1x16x16xbf16> to vector<16x16xbf16>
      %83 = vector.shape_cast %79 : vector<16x16xbf16> to vector<1x1x16x16xbf16>
      tpu.vector_store %arg6[%c0_63, %80, %c0_64, %c0_65], %83 {strides = array<i32>} : memref<1x16x16x16xbf16, #tpu.memory_space<vmem>>, vector<1x1x16x16xbf16>,
      %c51_i32_66 = arith.constant 51 : i32
      %84 = arith.addi %c51_i32_66, %arg8 : i32
      %c0_67 = arith.constant 0 : index
      %85 = arith.index_cast %84 : i32 to index
      %c0_68 = arith.constant 0 : index
      %c0_69 = arith.constant 0 : index
      %86 = vector.load %arg1[%c0_67, %85, %c0_68, %c0_69] : memref<1x68x17x8xbf16, #tpu.memory_space<vmem>>, vector<1x1x16x8xbf16>
      %87 = vector.shape_cast %86 : vector<1x1x16x8xbf16> to vector<16x8xbf16>
      %c0_70 = arith.constant 0 : index
      %c0_71 = arith.constant 0 : index
      %88 = vector.load %arg4[%c0_70, %c0_71] : memref<8x16xbf16, #tpu.memory_space<vmem>>, vector<8x16xbf16>
      %cst_72 = arith.constant dense<0.000000e+00> : vector<16x16xf32>
      %89 = tpu.matmul %87, %88, %cst_72 {dimension_numbers = #tpu.dot_dimension_numbers<[1], [0], [0], [1], [0, 0, 1, 1], [], []>} : vector<16x8xbf16>, vector<8x16xbf16>, vector<16x16xf32> -> vector<16x16xf32>
      %c0_73 = arith.constant 0 : index
      %c0_74 = arith.constant 0 : index
      %90 = vector.load %arg5[%c0_73, %c0_74] : memref<1x16xf32, #tpu.memory_space<vmem>>, vector<1x16xf32>
      %91 = vector.broadcast %90 : vector<1x16xf32> to vector<16x16xf32>
      %92 = arith.addf %89, %91 : vector<16x16xf32>
      %93 = arith.truncf %92 : vector<16x16xf32> to vector<16x16xbf16>
      %c0_75 = arith.constant 0 : index
      %94 = arith.index_cast %arg8 : i32 to index
      %c0_76 = arith.constant 0 : index
      %c0_77 = arith.constant 0 : index
      %95 = vector.load %arg7[%c0_75, %94, %c0_76, %c0_77] : memref<1x16x16x16xbf16, #tpu.memory_space<vmem>>, vector<1x1x16x16xbf16>
      %96 = vector.shape_cast %95 : vector<1x1x16x16xbf16> to vector<16x16xbf16>
      %97 = vector.shape_cast %93 : vector<16x16xbf16> to vector<1x1x16x16xbf16>
      tpu.vector_store %arg7[%c0_75, %94, %c0_76, %c0_77], %97 {strides = array<i32>} : memref<1x16x16x16xbf16, #tpu.memory_space<vmem>>, vector<1x1x16x16xbf16>,
    }
    %c16_i32_1 = arith.constant 16 : i32
    return
  }
  func.func @transform_0(%arg0: i32) -> (i32, i32, i32, i32) {
    %c0_i32 = arith.constant 0 : i32
    %c0_i32_0 = arith.constant 0 : i32
    %c0_i32_1 = arith.constant 0 : i32
    %c0_i32_2 = arith.constant 0 : i32
    return %arg0, %c0_i32, %c0_i32_0, %c0_i32_1 : i32, i32, i32, i32
  }
  func.func @transform_1(%arg0: i32) -> (i32, i32, i32) {
    %c0_i32 = arith.constant 0 : i32
    %c0_i32_0 = arith.constant 0 : i32
    %c0_i32_1 = arith.constant 0 : i32
    %c0_i32_2 = arith.constant 0 : i32
    return %c0_i32, %c0_i32_0, %c0_i32_1 : i32, i32, i32
  }
  func.func @transform_2(%arg0: i32) -> (i32, i32) {
    %c0_i32 = arith.constant 0 : i32
    %c0_i32_0 = arith.constant 0 : i32
    %c0_i32_1 = arith.constant 0 : i32
    return %c0_i32, %c0_i32_0 : i32, i32
  }
  func.func @transform_3(%arg0: i32) -> (i32, i32) {
    %c0_i32 = arith.constant 0 : i32
    %c0_i32_0 = arith.constant 0 : i32
    %c0_i32_1 = arith.constant 0 : i32
    return %c0_i32, %c0_i32_0 : i32, i32
  }
  func.func @transform_4(%arg0: i32) -> (i32, i32) {
    %c0_i32 = arith.constant 0 : i32
    %c0_i32_0 = arith.constant 0 : i32
    %c0_i32_1 = arith.constant 0 : i32
    return %c0_i32, %c0_i32_0 : i32, i32
  }
  func.func @transform_5(%arg0: i32) -> (i32, i32, i32, i32) {
    %c0_i32 = arith.constant 0 : i32
    %c0_i32_0 = arith.constant 0 : i32
    %c0_i32_1 = arith.constant 0 : i32
    %c0_i32_2 = arith.constant 0 : i32
    return %arg0, %c0_i32, %c0_i32_0, %c0_i32_1 : i32, i32, i32, i32
  }
  func.func @transform_6(%arg0: i32) -> (i32, i32, i32, i32) {
    %c0_i32 = arith.constant 0 : i32
    %c0_i32_0 = arith.constant 0 : i32
    %c0_i32_1 = arith.constant 0 : i32
    %c0_i32_2 = arith.constant 0 : i32
    return %arg0, %c0_i32, %c0_i32_0, %c0_i32_1 : i32, i32, i32, i32
  }
}

module attributes {stable_mosaic.version = 11 : i64} {
  func.func @_conv3x3_kernel(%arg0: i32, %arg1: memref<1x18x18x16xbf16, #tpu.memory_space<vmem>>, %arg2: memref<9x16x16xbf16, #tpu.memory_space<vmem>>, %arg3: memref<1x16xf32, #tpu.memory_space<vmem>>, %arg4: memref<1x16x16x16xbf16, #tpu.memory_space<vmem>>, %arg5: memref<1x16x16x16xbf16, #tpu.memory_space<vmem>>) attributes {dimension_semantics = [#tpu.dimension_semantics<parallel>], iteration_bounds = array<i64: 2>, scalar_prefetch = 0 : i64, scratch_operands = 0 : i64, tpu.core_type = #tpu.core_type<tc>, window_params = [{transform_indices = @transform_0, window_bounds = array<i64: 1, 18, 18, 16>}, {pipeline_mode = #tpu.pipeline_mode<synchronous>, transform_indices = @transform_1, window_bounds = array<i64: 9, 16, 16>}, {pipeline_mode = #tpu.pipeline_mode<synchronous>, transform_indices = @transform_2, window_bounds = array<i64: 1, 16>}, {transform_indices = @transform_3, window_bounds = array<i64: 1, 16, 16, 16>}, {transform_indices = @transform_4, window_bounds = array<i64: 1, 16, 16, 16>}]} {
    %c0 = arith.constant 0 : index
    %c0_0 = arith.constant 0 : index
    %0 = vector.load %arg3[%c0, %c0_0] : memref<1x16xf32, #tpu.memory_space<vmem>>, vector<1x16xf32>
    %c0_i32 = arith.constant 0 : i32
    %c16_i32 = arith.constant 16 : i32
    %1 = arith.addi %c0_i32, %c16_i32 : i32
    %c1_i32 = arith.constant 1 : i32
    scf.for %arg6 = %c0_i32 to %1 step %c1_i32  : i32 {
      %cst = arith.constant 0.000000e+00 : f32
      %2 = vector.broadcast %cst : f32 to vector<16x16xf32>
      %c0_i32_2 = arith.constant 0 : i32
      %3 = arith.addi %c0_i32_2, %arg6 : i32
      %c0_3 = arith.constant 0 : index
      %4 = arith.index_cast %3 : i32 to index
      %c0_4 = arith.constant 0 : index
      %c0_5 = arith.constant 0 : index
      %5 = vector.load %arg1[%c0_3, %4, %c0_4, %c0_5] : memref<1x18x18x16xbf16, #tpu.memory_space<vmem>>, vector<1x1x16x16xbf16>
      %6 = vector.shape_cast %5 : vector<1x1x16x16xbf16> to vector<16x16xbf16>
      %c0_6 = arith.constant 0 : index
      %c0_7 = arith.constant 0 : index
      %c0_8 = arith.constant 0 : index
      %7 = vector.load %arg2[%c0_6, %c0_7, %c0_8] : memref<9x16x16xbf16, #tpu.memory_space<vmem>>, vector<1x16x16xbf16>
      %8 = vector.shape_cast %7 : vector<1x16x16xbf16> to vector<16x16xbf16>
      %cst_9 = arith.constant dense<0.000000e+00> : vector<16x16xf32>
      %9 = tpu.matmul %6, %8, %cst_9 {dimension_numbers = #tpu.dot_dimension_numbers<[1], [0], [0], [1], [0, 0, 1, 1], [], []>} : vector<16x16xbf16>, vector<16x16xbf16>, vector<16x16xf32> -> vector<16x16xf32>
      %10 = arith.addf %2, %9 : vector<16x16xf32>
      %c0_i32_10 = arith.constant 0 : i32
      %11 = arith.addi %c0_i32_10, %arg6 : i32
      %c0_11 = arith.constant 0 : index
      %12 = arith.index_cast %11 : i32 to index
      %c1 = arith.constant 1 : index
      %c0_12 = arith.constant 0 : index
      %13 = vector.load %arg1[%c0_11, %12, %c1, %c0_12] : memref<1x18x18x16xbf16, #tpu.memory_space<vmem>>, vector<1x1x16x16xbf16>
      %14 = vector.shape_cast %13 : vector<1x1x16x16xbf16> to vector<16x16xbf16>
      %c1_13 = arith.constant 1 : index
      %c0_14 = arith.constant 0 : index
      %c0_15 = arith.constant 0 : index
      %15 = vector.load %arg2[%c1_13, %c0_14, %c0_15] : memref<9x16x16xbf16, #tpu.memory_space<vmem>>, vector<1x16x16xbf16>
      %16 = vector.shape_cast %15 : vector<1x16x16xbf16> to vector<16x16xbf16>
      %cst_16 = arith.constant dense<0.000000e+00> : vector<16x16xf32>
      %17 = tpu.matmul %14, %16, %cst_16 {dimension_numbers = #tpu.dot_dimension_numbers<[1], [0], [0], [1], [0, 0, 1, 1], [], []>} : vector<16x16xbf16>, vector<16x16xbf16>, vector<16x16xf32> -> vector<16x16xf32>
      %18 = arith.addf %10, %17 : vector<16x16xf32>
      %c0_i32_17 = arith.constant 0 : i32
      %19 = arith.addi %c0_i32_17, %arg6 : i32
      %c0_18 = arith.constant 0 : index
      %20 = arith.index_cast %19 : i32 to index
      %c2 = arith.constant 2 : index
      %c0_19 = arith.constant 0 : index
      %21 = vector.load %arg1[%c0_18, %20, %c2, %c0_19] : memref<1x18x18x16xbf16, #tpu.memory_space<vmem>>, vector<1x1x16x16xbf16>
      %22 = vector.shape_cast %21 : vector<1x1x16x16xbf16> to vector<16x16xbf16>
      %c2_20 = arith.constant 2 : index
      %c0_21 = arith.constant 0 : index
      %c0_22 = arith.constant 0 : index
      %23 = vector.load %arg2[%c2_20, %c0_21, %c0_22] : memref<9x16x16xbf16, #tpu.memory_space<vmem>>, vector<1x16x16xbf16>
      %24 = vector.shape_cast %23 : vector<1x16x16xbf16> to vector<16x16xbf16>
      %cst_23 = arith.constant dense<0.000000e+00> : vector<16x16xf32>
      %25 = tpu.matmul %22, %24, %cst_23 {dimension_numbers = #tpu.dot_dimension_numbers<[1], [0], [0], [1], [0, 0, 1, 1], [], []>} : vector<16x16xbf16>, vector<16x16xbf16>, vector<16x16xf32> -> vector<16x16xf32>
      %26 = arith.addf %18, %25 : vector<16x16xf32>
      %c1_i32_24 = arith.constant 1 : i32
      %27 = arith.addi %c1_i32_24, %arg6 : i32
      %c0_25 = arith.constant 0 : index
      %28 = arith.index_cast %27 : i32 to index
      %c0_26 = arith.constant 0 : index
      %c0_27 = arith.constant 0 : index
      %29 = vector.load %arg1[%c0_25, %28, %c0_26, %c0_27] : memref<1x18x18x16xbf16, #tpu.memory_space<vmem>>, vector<1x1x16x16xbf16>
      %30 = vector.shape_cast %29 : vector<1x1x16x16xbf16> to vector<16x16xbf16>
      %c3 = arith.constant 3 : index
      %c0_28 = arith.constant 0 : index
      %c0_29 = arith.constant 0 : index
      %31 = vector.load %arg2[%c3, %c0_28, %c0_29] : memref<9x16x16xbf16, #tpu.memory_space<vmem>>, vector<1x16x16xbf16>
      %32 = vector.shape_cast %31 : vector<1x16x16xbf16> to vector<16x16xbf16>
      %cst_30 = arith.constant dense<0.000000e+00> : vector<16x16xf32>
      %33 = tpu.matmul %30, %32, %cst_30 {dimension_numbers = #tpu.dot_dimension_numbers<[1], [0], [0], [1], [0, 0, 1, 1], [], []>} : vector<16x16xbf16>, vector<16x16xbf16>, vector<16x16xf32> -> vector<16x16xf32>
      %34 = arith.addf %26, %33 : vector<16x16xf32>
      %c1_i32_31 = arith.constant 1 : i32
      %35 = arith.addi %c1_i32_31, %arg6 : i32
      %c0_32 = arith.constant 0 : index
      %36 = arith.index_cast %35 : i32 to index
      %c1_33 = arith.constant 1 : index
      %c0_34 = arith.constant 0 : index
      %37 = vector.load %arg1[%c0_32, %36, %c1_33, %c0_34] : memref<1x18x18x16xbf16, #tpu.memory_space<vmem>>, vector<1x1x16x16xbf16>
      %38 = vector.shape_cast %37 : vector<1x1x16x16xbf16> to vector<16x16xbf16>
      %c4 = arith.constant 4 : index
      %c0_35 = arith.constant 0 : index
      %c0_36 = arith.constant 0 : index
      %39 = vector.load %arg2[%c4, %c0_35, %c0_36] : memref<9x16x16xbf16, #tpu.memory_space<vmem>>, vector<1x16x16xbf16>
      %40 = vector.shape_cast %39 : vector<1x16x16xbf16> to vector<16x16xbf16>
      %cst_37 = arith.constant dense<0.000000e+00> : vector<16x16xf32>
      %41 = tpu.matmul %38, %40, %cst_37 {dimension_numbers = #tpu.dot_dimension_numbers<[1], [0], [0], [1], [0, 0, 1, 1], [], []>} : vector<16x16xbf16>, vector<16x16xbf16>, vector<16x16xf32> -> vector<16x16xf32>
      %42 = arith.addf %34, %41 : vector<16x16xf32>
      %c1_i32_38 = arith.constant 1 : i32
      %43 = arith.addi %c1_i32_38, %arg6 : i32
      %c0_39 = arith.constant 0 : index
      %44 = arith.index_cast %43 : i32 to index
      %c2_40 = arith.constant 2 : index
      %c0_41 = arith.constant 0 : index
      %45 = vector.load %arg1[%c0_39, %44, %c2_40, %c0_41] : memref<1x18x18x16xbf16, #tpu.memory_space<vmem>>, vector<1x1x16x16xbf16>
      %46 = vector.shape_cast %45 : vector<1x1x16x16xbf16> to vector<16x16xbf16>
      %c5 = arith.constant 5 : index
      %c0_42 = arith.constant 0 : index
      %c0_43 = arith.constant 0 : index
      %47 = vector.load %arg2[%c5, %c0_42, %c0_43] : memref<9x16x16xbf16, #tpu.memory_space<vmem>>, vector<1x16x16xbf16>
      %48 = vector.shape_cast %47 : vector<1x16x16xbf16> to vector<16x16xbf16>
      %cst_44 = arith.constant dense<0.000000e+00> : vector<16x16xf32>
      %49 = tpu.matmul %46, %48, %cst_44 {dimension_numbers = #tpu.dot_dimension_numbers<[1], [0], [0], [1], [0, 0, 1, 1], [], []>} : vector<16x16xbf16>, vector<16x16xbf16>, vector<16x16xf32> -> vector<16x16xf32>
      %50 = arith.addf %42, %49 : vector<16x16xf32>
      %c2_i32 = arith.constant 2 : i32
      %51 = arith.addi %c2_i32, %arg6 : i32
      %c0_45 = arith.constant 0 : index
      %52 = arith.index_cast %51 : i32 to index
      %c0_46 = arith.constant 0 : index
      %c0_47 = arith.constant 0 : index
      %53 = vector.load %arg1[%c0_45, %52, %c0_46, %c0_47] : memref<1x18x18x16xbf16, #tpu.memory_space<vmem>>, vector<1x1x16x16xbf16>
      %54 = vector.shape_cast %53 : vector<1x1x16x16xbf16> to vector<16x16xbf16>
      %c6 = arith.constant 6 : index
      %c0_48 = arith.constant 0 : index
      %c0_49 = arith.constant 0 : index
      %55 = vector.load %arg2[%c6, %c0_48, %c0_49] : memref<9x16x16xbf16, #tpu.memory_space<vmem>>, vector<1x16x16xbf16>
      %56 = vector.shape_cast %55 : vector<1x16x16xbf16> to vector<16x16xbf16>
      %cst_50 = arith.constant dense<0.000000e+00> : vector<16x16xf32>
      %57 = tpu.matmul %54, %56, %cst_50 {dimension_numbers = #tpu.dot_dimension_numbers<[1], [0], [0], [1], [0, 0, 1, 1], [], []>} : vector<16x16xbf16>, vector<16x16xbf16>, vector<16x16xf32> -> vector<16x16xf32>
      %58 = arith.addf %50, %57 : vector<16x16xf32>
      %c2_i32_51 = arith.constant 2 : i32
      %59 = arith.addi %c2_i32_51, %arg6 : i32
      %c0_52 = arith.constant 0 : index
      %60 = arith.index_cast %59 : i32 to index
      %c1_53 = arith.constant 1 : index
      %c0_54 = arith.constant 0 : index
      %61 = vector.load %arg1[%c0_52, %60, %c1_53, %c0_54] : memref<1x18x18x16xbf16, #tpu.memory_space<vmem>>, vector<1x1x16x16xbf16>
      %62 = vector.shape_cast %61 : vector<1x1x16x16xbf16> to vector<16x16xbf16>
      %c7 = arith.constant 7 : index
      %c0_55 = arith.constant 0 : index
      %c0_56 = arith.constant 0 : index
      %63 = vector.load %arg2[%c7, %c0_55, %c0_56] : memref<9x16x16xbf16, #tpu.memory_space<vmem>>, vector<1x16x16xbf16>
      %64 = vector.shape_cast %63 : vector<1x16x16xbf16> to vector<16x16xbf16>
      %cst_57 = arith.constant dense<0.000000e+00> : vector<16x16xf32>
      %65 = tpu.matmul %62, %64, %cst_57 {dimension_numbers = #tpu.dot_dimension_numbers<[1], [0], [0], [1], [0, 0, 1, 1], [], []>} : vector<16x16xbf16>, vector<16x16xbf16>, vector<16x16xf32> -> vector<16x16xf32>
      %66 = arith.addf %58, %65 : vector<16x16xf32>
      %c2_i32_58 = arith.constant 2 : i32
      %67 = arith.addi %c2_i32_58, %arg6 : i32
      %c0_59 = arith.constant 0 : index
      %68 = arith.index_cast %67 : i32 to index
      %c2_60 = arith.constant 2 : index
      %c0_61 = arith.constant 0 : index
      %69 = vector.load %arg1[%c0_59, %68, %c2_60, %c0_61] : memref<1x18x18x16xbf16, #tpu.memory_space<vmem>>, vector<1x1x16x16xbf16>
      %70 = vector.shape_cast %69 : vector<1x1x16x16xbf16> to vector<16x16xbf16>
      %c8 = arith.constant 8 : index
      %c0_62 = arith.constant 0 : index
      %c0_63 = arith.constant 0 : index
      %71 = vector.load %arg2[%c8, %c0_62, %c0_63] : memref<9x16x16xbf16, #tpu.memory_space<vmem>>, vector<1x16x16xbf16>
      %72 = vector.shape_cast %71 : vector<1x16x16xbf16> to vector<16x16xbf16>
      %cst_64 = arith.constant dense<0.000000e+00> : vector<16x16xf32>
      %73 = tpu.matmul %70, %72, %cst_64 {dimension_numbers = #tpu.dot_dimension_numbers<[1], [0], [0], [1], [0, 0, 1, 1], [], []>} : vector<16x16xbf16>, vector<16x16xbf16>, vector<16x16xf32> -> vector<16x16xf32>
      %74 = arith.addf %66, %73 : vector<16x16xf32>
      %75 = vector.broadcast %0 : vector<1x16xf32> to vector<16x16xf32>
      %76 = arith.addf %74, %75 : vector<16x16xf32>
      %c0_65 = arith.constant 0 : index
      %77 = arith.index_cast %arg6 : i32 to index
      %c0_66 = arith.constant 0 : index
      %c0_67 = arith.constant 0 : index
      %78 = vector.load %arg4[%c0_65, %77, %c0_66, %c0_67] : memref<1x16x16x16xbf16, #tpu.memory_space<vmem>>, vector<1x1x16x16xbf16>
      %79 = vector.shape_cast %78 : vector<1x1x16x16xbf16> to vector<16x16xbf16>
      %80 = arith.extf %79 : vector<16x16xbf16> to vector<16x16xf32>
      %81 = arith.addf %76, %80 : vector<16x16xf32>
      %cst_68 = arith.constant 0.000000e+00 : f32
      %82 = vector.broadcast %cst_68 : f32 to vector<16x16xf32>
      %83 = arith.maximumf %81, %82 : vector<16x16xf32>
      %84 = arith.truncf %83 : vector<16x16xf32> to vector<16x16xbf16>
      %c0_69 = arith.constant 0 : index
      %85 = arith.index_cast %arg6 : i32 to index
      %c0_70 = arith.constant 0 : index
      %c0_71 = arith.constant 0 : index
      %86 = vector.load %arg5[%c0_69, %85, %c0_70, %c0_71] : memref<1x16x16x16xbf16, #tpu.memory_space<vmem>>, vector<1x1x16x16xbf16>
      %87 = vector.shape_cast %86 : vector<1x1x16x16xbf16> to vector<16x16xbf16>
      %88 = vector.shape_cast %84 : vector<16x16xbf16> to vector<1x1x16x16xbf16>
      tpu.vector_store %arg5[%c0_69, %85, %c0_70, %c0_71], %88 {strides = array<i32>} : memref<1x16x16x16xbf16, #tpu.memory_space<vmem>>, vector<1x1x16x16xbf16>,
    }
    %c16_i32_1 = arith.constant 16 : i32
    return
  }
  func.func @transform_0(%arg0: i32) -> (i32, i32, i32, i32) {
    %c0_i32 = arith.constant 0 : i32
    %c0_i32_0 = arith.constant 0 : i32
    %c0_i32_1 = arith.constant 0 : i32
    %c0_i32_2 = arith.constant 0 : i32
    return %arg0, %c0_i32, %c0_i32_0, %c0_i32_1 : i32, i32, i32, i32
  }
  func.func @transform_1(%arg0: i32) -> (i32, i32, i32) {
    %c0_i32 = arith.constant 0 : i32
    %c0_i32_0 = arith.constant 0 : i32
    %c0_i32_1 = arith.constant 0 : i32
    %c0_i32_2 = arith.constant 0 : i32
    return %c0_i32, %c0_i32_0, %c0_i32_1 : i32, i32, i32
  }
  func.func @transform_2(%arg0: i32) -> (i32, i32) {
    %c0_i32 = arith.constant 0 : i32
    %c0_i32_0 = arith.constant 0 : i32
    %c0_i32_1 = arith.constant 0 : i32
    return %c0_i32, %c0_i32_0 : i32, i32
  }
  func.func @transform_3(%arg0: i32) -> (i32, i32, i32, i32) {
    %c0_i32 = arith.constant 0 : i32
    %c0_i32_0 = arith.constant 0 : i32
    %c0_i32_1 = arith.constant 0 : i32
    %c0_i32_2 = arith.constant 0 : i32
    return %arg0, %c0_i32, %c0_i32_0, %c0_i32_1 : i32, i32, i32, i32
  }
  func.func @transform_4(%arg0: i32) -> (i32, i32, i32, i32) {
    %c0_i32 = arith.constant 0 : i32
    %c0_i32_0 = arith.constant 0 : i32
    %c0_i32_1 = arith.constant 0 : i32
    %c0_i32_2 = arith.constant 0 : i32
    return %arg0, %c0_i32, %c0_i32_0, %c0_i32_1 : i32, i32, i32, i32
  }
}

module attributes {stable_mosaic.version = 11 : i64} {
  func.func @_conv3x3_kernel(%arg0: i32, %arg1: memref<1x36x9x16xbf16, #tpu.memory_space<vmem>>, %arg2: memref<9x16x32xbf16, #tpu.memory_space<vmem>>, %arg3: memref<1x32xf32, #tpu.memory_space<vmem>>, %arg4: memref<16x32xbf16, #tpu.memory_space<vmem>>, %arg5: memref<1x32xf32, #tpu.memory_space<vmem>>, %arg6: memref<1x8x8x32xbf16, #tpu.memory_space<vmem>>, %arg7: memref<1x8x8x32xbf16, #tpu.memory_space<vmem>>) attributes {dimension_semantics = [#tpu.dimension_semantics<parallel>], iteration_bounds = array<i64: 2>, scalar_prefetch = 0 : i64, scratch_operands = 0 : i64, tpu.core_type = #tpu.core_type<tc>, window_params = [{transform_indices = @transform_0, window_bounds = array<i64: 1, 36, 9, 16>}, {pipeline_mode = #tpu.pipeline_mode<synchronous>, transform_indices = @transform_1, window_bounds = array<i64: 9, 16, 32>}, {pipeline_mode = #tpu.pipeline_mode<synchronous>, transform_indices = @transform_2, window_bounds = array<i64: 1, 32>}, {pipeline_mode = #tpu.pipeline_mode<synchronous>, transform_indices = @transform_3, window_bounds = array<i64: 16, 32>}, {pipeline_mode = #tpu.pipeline_mode<synchronous>, transform_indices = @transform_4, window_bounds = array<i64: 1, 32>}, {transform_indices = @transform_5, window_bounds = array<i64: 1, 8, 8, 32>}, {transform_indices = @transform_6, window_bounds = array<i64: 1, 8, 8, 32>}]} {
    %c0 = arith.constant 0 : index
    %c0_0 = arith.constant 0 : index
    %0 = vector.load %arg3[%c0, %c0_0] : memref<1x32xf32, #tpu.memory_space<vmem>>, vector<1x32xf32>
    %c0_i32 = arith.constant 0 : i32
    %c8_i32 = arith.constant 8 : i32
    %1 = arith.addi %c0_i32, %c8_i32 : i32
    %c1_i32 = arith.constant 1 : i32
    scf.for %arg8 = %c0_i32 to %1 step %c1_i32  : i32 {
      %cst = arith.constant 0.000000e+00 : f32
      %2 = vector.broadcast %cst : f32 to vector<8x32xf32>
      %c0_i32_2 = arith.constant 0 : i32
      %3 = arith.addi %c0_i32_2, %arg8 : i32
      %c0_3 = arith.constant 0 : index
      %4 = arith.index_cast %3 : i32 to index
      %c0_4 = arith.constant 0 : index
      %c0_5 = arith.constant 0 : index
      %5 = vector.load %arg1[%c0_3, %4, %c0_4, %c0_5] : memref<1x36x9x16xbf16, #tpu.memory_space<vmem>>, vector<1x1x8x16xbf16>
      %6 = vector.shape_cast %5 : vector<1x1x8x16xbf16> to vector<8x16xbf16>
      %c0_6 = arith.constant 0 : index
      %c0_7 = arith.constant 0 : index
      %c0_8 = arith.constant 0 : index
      %7 = vector.load %arg2[%c0_6, %c0_7, %c0_8] : memref<9x16x32xbf16, #tpu.memory_space<vmem>>, vector<1x16x32xbf16>
      %8 = vector.shape_cast %7 : vector<1x16x32xbf16> to vector<16x32xbf16>
      %cst_9 = arith.constant dense<0.000000e+00> : vector<8x32xf32>
      %9 = tpu.matmul %6, %8, %cst_9 {dimension_numbers = #tpu.dot_dimension_numbers<[1], [0], [0], [1], [0, 0, 1, 1], [], []>} : vector<8x16xbf16>, vector<16x32xbf16>, vector<8x32xf32> -> vector<8x32xf32>
      %10 = arith.addf %2, %9 : vector<8x32xf32>
      %c9_i32 = arith.constant 9 : i32
      %11 = arith.addi %c9_i32, %arg8 : i32
      %c0_10 = arith.constant 0 : index
      %12 = arith.index_cast %11 : i32 to index
      %c0_11 = arith.constant 0 : index
      %c0_12 = arith.constant 0 : index
      %13 = vector.load %arg1[%c0_10, %12, %c0_11, %c0_12] : memref<1x36x9x16xbf16, #tpu.memory_space<vmem>>, vector<1x1x8x16xbf16>
      %14 = vector.shape_cast %13 : vector<1x1x8x16xbf16> to vector<8x16xbf16>
      %c1 = arith.constant 1 : index
      %c0_13 = arith.constant 0 : index
      %c0_14 = arith.constant 0 : index
      %15 = vector.load %arg2[%c1, %c0_13, %c0_14] : memref<9x16x32xbf16, #tpu.memory_space<vmem>>, vector<1x16x32xbf16>
      %16 = vector.shape_cast %15 : vector<1x16x32xbf16> to vector<16x32xbf16>
      %cst_15 = arith.constant dense<0.000000e+00> : vector<8x32xf32>
      %17 = tpu.matmul %14, %16, %cst_15 {dimension_numbers = #tpu.dot_dimension_numbers<[1], [0], [0], [1], [0, 0, 1, 1], [], []>} : vector<8x16xbf16>, vector<16x32xbf16>, vector<8x32xf32> -> vector<8x32xf32>
      %18 = arith.addf %10, %17 : vector<8x32xf32>
      %c0_i32_16 = arith.constant 0 : i32
      %19 = arith.addi %c0_i32_16, %arg8 : i32
      %c0_17 = arith.constant 0 : index
      %20 = arith.index_cast %19 : i32 to index
      %c1_18 = arith.constant 1 : index
      %c0_19 = arith.constant 0 : index
      %21 = vector.load %arg1[%c0_17, %20, %c1_18, %c0_19] : memref<1x36x9x16xbf16, #tpu.memory_space<vmem>>, vector<1x1x8x16xbf16>
      %22 = vector.shape_cast %21 : vector<1x1x8x16xbf16> to vector<8x16xbf16>
      %c2 = arith.constant 2 : index
      %c0_20 = arith.constant 0 : index
      %c0_21 = arith.constant 0 : index
      %23 = vector.load %arg2[%c2, %c0_20, %c0_21] : memref<9x16x32xbf16, #tpu.memory_space<vmem>>, vector<1x16x32xbf16>
      %24 = vector.shape_cast %23 : vector<1x16x32xbf16> to vector<16x32xbf16>
      %cst_22 = arith.constant dense<0.000000e+00> : vector<8x32xf32>
      %25 = tpu.matmul %22, %24, %cst_22 {dimension_numbers = #tpu.dot_dimension_numbers<[1], [0], [0], [1], [0, 0, 1, 1], [], []>} : vector<8x16xbf16>, vector<16x32xbf16>, vector<8x32xf32> -> vector<8x32xf32>
      %26 = arith.addf %18, %25 : vector<8x32xf32>
      %c18_i32 = arith.constant 18 : i32
      %27 = arith.addi %c18_i32, %arg8 : i32
      %c0_23 = arith.constant 0 : index
      %28 = arith.index_cast %27 : i32 to index
      %c0_24 = arith.constant 0 : index
      %c0_25 = arith.constant 0 : index
      %29 = vector.load %arg1[%c0_23, %28, %c0_24, %c0_25] : memref<1x36x9x16xbf16, #tpu.memory_space<vmem>>, vector<1x1x8x16xbf16>
      %30 = vector.shape_cast %29 : vector<1x1x8x16xbf16> to vector<8x16xbf16>
      %c3 = arith.constant 3 : index
      %c0_26 = arith.constant 0 : index
      %c0_27 = arith.constant 0 : index
      %31 = vector.load %arg2[%c3, %c0_26, %c0_27] : memref<9x16x32xbf16, #tpu.memory_space<vmem>>, vector<1x16x32xbf16>
      %32 = vector.shape_cast %31 : vector<1x16x32xbf16> to vector<16x32xbf16>
      %cst_28 = arith.constant dense<0.000000e+00> : vector<8x32xf32>
      %33 = tpu.matmul %30, %32, %cst_28 {dimension_numbers = #tpu.dot_dimension_numbers<[1], [0], [0], [1], [0, 0, 1, 1], [], []>} : vector<8x16xbf16>, vector<16x32xbf16>, vector<8x32xf32> -> vector<8x32xf32>
      %34 = arith.addf %26, %33 : vector<8x32xf32>
      %c27_i32 = arith.constant 27 : i32
      %35 = arith.addi %c27_i32, %arg8 : i32
      %c0_29 = arith.constant 0 : index
      %36 = arith.index_cast %35 : i32 to index
      %c0_30 = arith.constant 0 : index
      %c0_31 = arith.constant 0 : index
      %37 = vector.load %arg1[%c0_29, %36, %c0_30, %c0_31] : memref<1x36x9x16xbf16, #tpu.memory_space<vmem>>, vector<1x1x8x16xbf16>
      %38 = vector.shape_cast %37 : vector<1x1x8x16xbf16> to vector<8x16xbf16>
      %c4 = arith.constant 4 : index
      %c0_32 = arith.constant 0 : index
      %c0_33 = arith.constant 0 : index
      %39 = vector.load %arg2[%c4, %c0_32, %c0_33] : memref<9x16x32xbf16, #tpu.memory_space<vmem>>, vector<1x16x32xbf16>
      %40 = vector.shape_cast %39 : vector<1x16x32xbf16> to vector<16x32xbf16>
      %cst_34 = arith.constant dense<0.000000e+00> : vector<8x32xf32>
      %41 = tpu.matmul %38, %40, %cst_34 {dimension_numbers = #tpu.dot_dimension_numbers<[1], [0], [0], [1], [0, 0, 1, 1], [], []>} : vector<8x16xbf16>, vector<16x32xbf16>, vector<8x32xf32> -> vector<8x32xf32>
      %42 = arith.addf %34, %41 : vector<8x32xf32>
      %c18_i32_35 = arith.constant 18 : i32
      %43 = arith.addi %c18_i32_35, %arg8 : i32
      %c0_36 = arith.constant 0 : index
      %44 = arith.index_cast %43 : i32 to index
      %c1_37 = arith.constant 1 : index
      %c0_38 = arith.constant 0 : index
      %45 = vector.load %arg1[%c0_36, %44, %c1_37, %c0_38] : memref<1x36x9x16xbf16, #tpu.memory_space<vmem>>, vector<1x1x8x16xbf16>
      %46 = vector.shape_cast %45 : vector<1x1x8x16xbf16> to vector<8x16xbf16>
      %c5 = arith.constant 5 : index
      %c0_39 = arith.constant 0 : index
      %c0_40 = arith.constant 0 : index
      %47 = vector.load %arg2[%c5, %c0_39, %c0_40] : memref<9x16x32xbf16, #tpu.memory_space<vmem>>, vector<1x16x32xbf16>
      %48 = vector.shape_cast %47 : vector<1x16x32xbf16> to vector<16x32xbf16>
      %cst_41 = arith.constant dense<0.000000e+00> : vector<8x32xf32>
      %49 = tpu.matmul %46, %48, %cst_41 {dimension_numbers = #tpu.dot_dimension_numbers<[1], [0], [0], [1], [0, 0, 1, 1], [], []>} : vector<8x16xbf16>, vector<16x32xbf16>, vector<8x32xf32> -> vector<8x32xf32>
      %50 = arith.addf %42, %49 : vector<8x32xf32>
      %c1_i32_42 = arith.constant 1 : i32
      %51 = arith.addi %c1_i32_42, %arg8 : i32
      %c0_43 = arith.constant 0 : index
      %52 = arith.index_cast %51 : i32 to index
      %c0_44 = arith.constant 0 : index
      %c0_45 = arith.constant 0 : index
      %53 = vector.load %arg1[%c0_43, %52, %c0_44, %c0_45] : memref<1x36x9x16xbf16, #tpu.memory_space<vmem>>, vector<1x1x8x16xbf16>
      %54 = vector.shape_cast %53 : vector<1x1x8x16xbf16> to vector<8x16xbf16>
      %c6 = arith.constant 6 : index
      %c0_46 = arith.constant 0 : index
      %c0_47 = arith.constant 0 : index
      %55 = vector.load %arg2[%c6, %c0_46, %c0_47] : memref<9x16x32xbf16, #tpu.memory_space<vmem>>, vector<1x16x32xbf16>
      %56 = vector.shape_cast %55 : vector<1x16x32xbf16> to vector<16x32xbf16>
      %cst_48 = arith.constant dense<0.000000e+00> : vector<8x32xf32>
      %57 = tpu.matmul %54, %56, %cst_48 {dimension_numbers = #tpu.dot_dimension_numbers<[1], [0], [0], [1], [0, 0, 1, 1], [], []>} : vector<8x16xbf16>, vector<16x32xbf16>, vector<8x32xf32> -> vector<8x32xf32>
      %58 = arith.addf %50, %57 : vector<8x32xf32>
      %c10_i32 = arith.constant 10 : i32
      %59 = arith.addi %c10_i32, %arg8 : i32
      %c0_49 = arith.constant 0 : index
      %60 = arith.index_cast %59 : i32 to index
      %c0_50 = arith.constant 0 : index
      %c0_51 = arith.constant 0 : index
      %61 = vector.load %arg1[%c0_49, %60, %c0_50, %c0_51] : memref<1x36x9x16xbf16, #tpu.memory_space<vmem>>, vector<1x1x8x16xbf16>
      %62 = vector.shape_cast %61 : vector<1x1x8x16xbf16> to vector<8x16xbf16>
      %c7 = arith.constant 7 : index
      %c0_52 = arith.constant 0 : index
      %c0_53 = arith.constant 0 : index
      %63 = vector.load %arg2[%c7, %c0_52, %c0_53] : memref<9x16x32xbf16, #tpu.memory_space<vmem>>, vector<1x16x32xbf16>
      %64 = vector.shape_cast %63 : vector<1x16x32xbf16> to vector<16x32xbf16>
      %cst_54 = arith.constant dense<0.000000e+00> : vector<8x32xf32>
      %65 = tpu.matmul %62, %64, %cst_54 {dimension_numbers = #tpu.dot_dimension_numbers<[1], [0], [0], [1], [0, 0, 1, 1], [], []>} : vector<8x16xbf16>, vector<16x32xbf16>, vector<8x32xf32> -> vector<8x32xf32>
      %66 = arith.addf %58, %65 : vector<8x32xf32>
      %c1_i32_55 = arith.constant 1 : i32
      %67 = arith.addi %c1_i32_55, %arg8 : i32
      %c0_56 = arith.constant 0 : index
      %68 = arith.index_cast %67 : i32 to index
      %c1_57 = arith.constant 1 : index
      %c0_58 = arith.constant 0 : index
      %69 = vector.load %arg1[%c0_56, %68, %c1_57, %c0_58] : memref<1x36x9x16xbf16, #tpu.memory_space<vmem>>, vector<1x1x8x16xbf16>
      %70 = vector.shape_cast %69 : vector<1x1x8x16xbf16> to vector<8x16xbf16>
      %c8 = arith.constant 8 : index
      %c0_59 = arith.constant 0 : index
      %c0_60 = arith.constant 0 : index
      %71 = vector.load %arg2[%c8, %c0_59, %c0_60] : memref<9x16x32xbf16, #tpu.memory_space<vmem>>, vector<1x16x32xbf16>
      %72 = vector.shape_cast %71 : vector<1x16x32xbf16> to vector<16x32xbf16>
      %cst_61 = arith.constant dense<0.000000e+00> : vector<8x32xf32>
      %73 = tpu.matmul %70, %72, %cst_61 {dimension_numbers = #tpu.dot_dimension_numbers<[1], [0], [0], [1], [0, 0, 1, 1], [], []>} : vector<8x16xbf16>, vector<16x32xbf16>, vector<8x32xf32> -> vector<8x32xf32>
      %74 = arith.addf %66, %73 : vector<8x32xf32>
      %75 = vector.broadcast %0 : vector<1x32xf32> to vector<8x32xf32>
      %76 = arith.addf %74, %75 : vector<8x32xf32>
      %cst_62 = arith.constant 0.000000e+00 : f32
      %77 = vector.broadcast %cst_62 : f32 to vector<8x32xf32>
      %78 = arith.maximumf %76, %77 : vector<8x32xf32>
      %79 = arith.truncf %78 : vector<8x32xf32> to vector<8x32xbf16>
      %c0_63 = arith.constant 0 : index
      %80 = arith.index_cast %arg8 : i32 to index
      %c0_64 = arith.constant 0 : index
      %c0_65 = arith.constant 0 : index
      %81 = vector.load %arg6[%c0_63, %80, %c0_64, %c0_65] : memref<1x8x8x32xbf16, #tpu.memory_space<vmem>>, vector<1x1x8x32xbf16>
      %82 = vector.shape_cast %81 : vector<1x1x8x32xbf16> to vector<8x32xbf16>
      %83 = vector.shape_cast %79 : vector<8x32xbf16> to vector<1x1x8x32xbf16>
      tpu.vector_store %arg6[%c0_63, %80, %c0_64, %c0_65], %83 {strides = array<i32>} : memref<1x8x8x32xbf16, #tpu.memory_space<vmem>>, vector<1x1x8x32xbf16>,
      %c27_i32_66 = arith.constant 27 : i32
      %84 = arith.addi %c27_i32_66, %arg8 : i32
      %c0_67 = arith.constant 0 : index
      %85 = arith.index_cast %84 : i32 to index
      %c0_68 = arith.constant 0 : index
      %c0_69 = arith.constant 0 : index
      %86 = vector.load %arg1[%c0_67, %85, %c0_68, %c0_69] : memref<1x36x9x16xbf16, #tpu.memory_space<vmem>>, vector<1x1x8x16xbf16>
      %87 = vector.shape_cast %86 : vector<1x1x8x16xbf16> to vector<8x16xbf16>
      %c0_70 = arith.constant 0 : index
      %c0_71 = arith.constant 0 : index
      %88 = vector.load %arg4[%c0_70, %c0_71] : memref<16x32xbf16, #tpu.memory_space<vmem>>, vector<16x32xbf16>
      %cst_72 = arith.constant dense<0.000000e+00> : vector<8x32xf32>
      %89 = tpu.matmul %87, %88, %cst_72 {dimension_numbers = #tpu.dot_dimension_numbers<[1], [0], [0], [1], [0, 0, 1, 1], [], []>} : vector<8x16xbf16>, vector<16x32xbf16>, vector<8x32xf32> -> vector<8x32xf32>
      %c0_73 = arith.constant 0 : index
      %c0_74 = arith.constant 0 : index
      %90 = vector.load %arg5[%c0_73, %c0_74] : memref<1x32xf32, #tpu.memory_space<vmem>>, vector<1x32xf32>
      %91 = vector.broadcast %90 : vector<1x32xf32> to vector<8x32xf32>
      %92 = arith.addf %89, %91 : vector<8x32xf32>
      %93 = arith.truncf %92 : vector<8x32xf32> to vector<8x32xbf16>
      %c0_75 = arith.constant 0 : index
      %94 = arith.index_cast %arg8 : i32 to index
      %c0_76 = arith.constant 0 : index
      %c0_77 = arith.constant 0 : index
      %95 = vector.load %arg7[%c0_75, %94, %c0_76, %c0_77] : memref<1x8x8x32xbf16, #tpu.memory_space<vmem>>, vector<1x1x8x32xbf16>
      %96 = vector.shape_cast %95 : vector<1x1x8x32xbf16> to vector<8x32xbf16>
      %97 = vector.shape_cast %93 : vector<8x32xbf16> to vector<1x1x8x32xbf16>
      tpu.vector_store %arg7[%c0_75, %94, %c0_76, %c0_77], %97 {strides = array<i32>} : memref<1x8x8x32xbf16, #tpu.memory_space<vmem>>, vector<1x1x8x32xbf16>,
    }
    %c8_i32_1 = arith.constant 8 : i32
    return
  }
  func.func @transform_0(%arg0: i32) -> (i32, i32, i32, i32) {
    %c0_i32 = arith.constant 0 : i32
    %c0_i32_0 = arith.constant 0 : i32
    %c0_i32_1 = arith.constant 0 : i32
    %c0_i32_2 = arith.constant 0 : i32
    return %arg0, %c0_i32, %c0_i32_0, %c0_i32_1 : i32, i32, i32, i32
  }
  func.func @transform_1(%arg0: i32) -> (i32, i32, i32) {
    %c0_i32 = arith.constant 0 : i32
    %c0_i32_0 = arith.constant 0 : i32
    %c0_i32_1 = arith.constant 0 : i32
    %c0_i32_2 = arith.constant 0 : i32
    return %c0_i32, %c0_i32_0, %c0_i32_1 : i32, i32, i32
  }
  func.func @transform_2(%arg0: i32) -> (i32, i32) {
    %c0_i32 = arith.constant 0 : i32
    %c0_i32_0 = arith.constant 0 : i32
    %c0_i32_1 = arith.constant 0 : i32
    return %c0_i32, %c0_i32_0 : i32, i32
  }
  func.func @transform_3(%arg0: i32) -> (i32, i32) {
    %c0_i32 = arith.constant 0 : i32
    %c0_i32_0 = arith.constant 0 : i32
    %c0_i32_1 = arith.constant 0 : i32
    return %c0_i32, %c0_i32_0 : i32, i32
  }
  func.func @transform_4(%arg0: i32) -> (i32, i32) {
    %c0_i32 = arith.constant 0 : i32
    %c0_i32_0 = arith.constant 0 : i32
    %c0_i32_1 = arith.constant 0 : i32
    return %c0_i32, %c0_i32_0 : i32, i32
  }
  func.func @transform_5(%arg0: i32) -> (i32, i32, i32, i32) {
    %c0_i32 = arith.constant 0 : i32
    %c0_i32_0 = arith.constant 0 : i32
    %c0_i32_1 = arith.constant 0 : i32
    %c0_i32_2 = arith.constant 0 : i32
    return %arg0, %c0_i32, %c0_i32_0, %c0_i32_1 : i32, i32, i32, i32
  }
  func.func @transform_6(%arg0: i32) -> (i32, i32, i32, i32) {
    %c0_i32 = arith.constant 0 : i32
    %c0_i32_0 = arith.constant 0 : i32
    %c0_i32_1 = arith.constant 0 : i32
    %c0_i32_2 = arith.constant 0 : i32
    return %arg0, %c0_i32, %c0_i32_0, %c0_i32_1 : i32, i32, i32, i32
  }
}

module attributes {stable_mosaic.version = 11 : i64} {
  func.func @_conv3x3_kernel(%arg0: i32, %arg1: memref<1x10x10x32xbf16, #tpu.memory_space<vmem>>, %arg2: memref<9x32x32xbf16, #tpu.memory_space<vmem>>, %arg3: memref<1x32xf32, #tpu.memory_space<vmem>>, %arg4: memref<1x8x8x32xbf16, #tpu.memory_space<vmem>>, %arg5: memref<1x8x8x32xbf16, #tpu.memory_space<vmem>>) attributes {dimension_semantics = [#tpu.dimension_semantics<parallel>], iteration_bounds = array<i64: 2>, scalar_prefetch = 0 : i64, scratch_operands = 0 : i64, tpu.core_type = #tpu.core_type<tc>, window_params = [{transform_indices = @transform_0, window_bounds = array<i64: 1, 10, 10, 32>}, {pipeline_mode = #tpu.pipeline_mode<synchronous>, transform_indices = @transform_1, window_bounds = array<i64: 9, 32, 32>}, {pipeline_mode = #tpu.pipeline_mode<synchronous>, transform_indices = @transform_2, window_bounds = array<i64: 1, 32>}, {transform_indices = @transform_3, window_bounds = array<i64: 1, 8, 8, 32>}, {transform_indices = @transform_4, window_bounds = array<i64: 1, 8, 8, 32>}]} {
    %c0 = arith.constant 0 : index
    %c0_0 = arith.constant 0 : index
    %0 = vector.load %arg3[%c0, %c0_0] : memref<1x32xf32, #tpu.memory_space<vmem>>, vector<1x32xf32>
    %c0_i32 = arith.constant 0 : i32
    %c8_i32 = arith.constant 8 : i32
    %1 = arith.addi %c0_i32, %c8_i32 : i32
    %c1_i32 = arith.constant 1 : i32
    scf.for %arg6 = %c0_i32 to %1 step %c1_i32  : i32 {
      %cst = arith.constant 0.000000e+00 : f32
      %2 = vector.broadcast %cst : f32 to vector<8x32xf32>
      %c0_i32_2 = arith.constant 0 : i32
      %3 = arith.addi %c0_i32_2, %arg6 : i32
      %c0_3 = arith.constant 0 : index
      %4 = arith.index_cast %3 : i32 to index
      %c0_4 = arith.constant 0 : index
      %c0_5 = arith.constant 0 : index
      %5 = vector.load %arg1[%c0_3, %4, %c0_4, %c0_5] : memref<1x10x10x32xbf16, #tpu.memory_space<vmem>>, vector<1x1x8x32xbf16>
      %6 = vector.shape_cast %5 : vector<1x1x8x32xbf16> to vector<8x32xbf16>
      %c0_6 = arith.constant 0 : index
      %c0_7 = arith.constant 0 : index
      %c0_8 = arith.constant 0 : index
      %7 = vector.load %arg2[%c0_6, %c0_7, %c0_8] : memref<9x32x32xbf16, #tpu.memory_space<vmem>>, vector<1x32x32xbf16>
      %8 = vector.shape_cast %7 : vector<1x32x32xbf16> to vector<32x32xbf16>
      %cst_9 = arith.constant dense<0.000000e+00> : vector<8x32xf32>
      %9 = tpu.matmul %6, %8, %cst_9 {dimension_numbers = #tpu.dot_dimension_numbers<[1], [0], [0], [1], [0, 0, 1, 1], [], []>} : vector<8x32xbf16>, vector<32x32xbf16>, vector<8x32xf32> -> vector<8x32xf32>
      %10 = arith.addf %2, %9 : vector<8x32xf32>
      %c0_i32_10 = arith.constant 0 : i32
      %11 = arith.addi %c0_i32_10, %arg6 : i32
      %c0_11 = arith.constant 0 : index
      %12 = arith.index_cast %11 : i32 to index
      %c1 = arith.constant 1 : index
      %c0_12 = arith.constant 0 : index
      %13 = vector.load %arg1[%c0_11, %12, %c1, %c0_12] : memref<1x10x10x32xbf16, #tpu.memory_space<vmem>>, vector<1x1x8x32xbf16>
      %14 = vector.shape_cast %13 : vector<1x1x8x32xbf16> to vector<8x32xbf16>
      %c1_13 = arith.constant 1 : index
      %c0_14 = arith.constant 0 : index
      %c0_15 = arith.constant 0 : index
      %15 = vector.load %arg2[%c1_13, %c0_14, %c0_15] : memref<9x32x32xbf16, #tpu.memory_space<vmem>>, vector<1x32x32xbf16>
      %16 = vector.shape_cast %15 : vector<1x32x32xbf16> to vector<32x32xbf16>
      %cst_16 = arith.constant dense<0.000000e+00> : vector<8x32xf32>
      %17 = tpu.matmul %14, %16, %cst_16 {dimension_numbers = #tpu.dot_dimension_numbers<[1], [0], [0], [1], [0, 0, 1, 1], [], []>} : vector<8x32xbf16>, vector<32x32xbf16>, vector<8x32xf32> -> vector<8x32xf32>
      %18 = arith.addf %10, %17 : vector<8x32xf32>
      %c0_i32_17 = arith.constant 0 : i32
      %19 = arith.addi %c0_i32_17, %arg6 : i32
      %c0_18 = arith.constant 0 : index
      %20 = arith.index_cast %19 : i32 to index
      %c2 = arith.constant 2 : index
      %c0_19 = arith.constant 0 : index
      %21 = vector.load %arg1[%c0_18, %20, %c2, %c0_19] : memref<1x10x10x32xbf16, #tpu.memory_space<vmem>>, vector<1x1x8x32xbf16>
      %22 = vector.shape_cast %21 : vector<1x1x8x32xbf16> to vector<8x32xbf16>
      %c2_20 = arith.constant 2 : index
      %c0_21 = arith.constant 0 : index
      %c0_22 = arith.constant 0 : index
      %23 = vector.load %arg2[%c2_20, %c0_21, %c0_22] : memref<9x32x32xbf16, #tpu.memory_space<vmem>>, vector<1x32x32xbf16>
      %24 = vector.shape_cast %23 : vector<1x32x32xbf16> to vector<32x32xbf16>
      %cst_23 = arith.constant dense<0.000000e+00> : vector<8x32xf32>
      %25 = tpu.matmul %22, %24, %cst_23 {dimension_numbers = #tpu.dot_dimension_numbers<[1], [0], [0], [1], [0, 0, 1, 1], [], []>} : vector<8x32xbf16>, vector<32x32xbf16>, vector<8x32xf32> -> vector<8x32xf32>
      %26 = arith.addf %18, %25 : vector<8x32xf32>
      %c1_i32_24 = arith.constant 1 : i32
      %27 = arith.addi %c1_i32_24, %arg6 : i32
      %c0_25 = arith.constant 0 : index
      %28 = arith.index_cast %27 : i32 to index
      %c0_26 = arith.constant 0 : index
      %c0_27 = arith.constant 0 : index
      %29 = vector.load %arg1[%c0_25, %28, %c0_26, %c0_27] : memref<1x10x10x32xbf16, #tpu.memory_space<vmem>>, vector<1x1x8x32xbf16>
      %30 = vector.shape_cast %29 : vector<1x1x8x32xbf16> to vector<8x32xbf16>
      %c3 = arith.constant 3 : index
      %c0_28 = arith.constant 0 : index
      %c0_29 = arith.constant 0 : index
      %31 = vector.load %arg2[%c3, %c0_28, %c0_29] : memref<9x32x32xbf16, #tpu.memory_space<vmem>>, vector<1x32x32xbf16>
      %32 = vector.shape_cast %31 : vector<1x32x32xbf16> to vector<32x32xbf16>
      %cst_30 = arith.constant dense<0.000000e+00> : vector<8x32xf32>
      %33 = tpu.matmul %30, %32, %cst_30 {dimension_numbers = #tpu.dot_dimension_numbers<[1], [0], [0], [1], [0, 0, 1, 1], [], []>} : vector<8x32xbf16>, vector<32x32xbf16>, vector<8x32xf32> -> vector<8x32xf32>
      %34 = arith.addf %26, %33 : vector<8x32xf32>
      %c1_i32_31 = arith.constant 1 : i32
      %35 = arith.addi %c1_i32_31, %arg6 : i32
      %c0_32 = arith.constant 0 : index
      %36 = arith.index_cast %35 : i32 to index
      %c1_33 = arith.constant 1 : index
      %c0_34 = arith.constant 0 : index
      %37 = vector.load %arg1[%c0_32, %36, %c1_33, %c0_34] : memref<1x10x10x32xbf16, #tpu.memory_space<vmem>>, vector<1x1x8x32xbf16>
      %38 = vector.shape_cast %37 : vector<1x1x8x32xbf16> to vector<8x32xbf16>
      %c4 = arith.constant 4 : index
      %c0_35 = arith.constant 0 : index
      %c0_36 = arith.constant 0 : index
      %39 = vector.load %arg2[%c4, %c0_35, %c0_36] : memref<9x32x32xbf16, #tpu.memory_space<vmem>>, vector<1x32x32xbf16>
      %40 = vector.shape_cast %39 : vector<1x32x32xbf16> to vector<32x32xbf16>
      %cst_37 = arith.constant dense<0.000000e+00> : vector<8x32xf32>
      %41 = tpu.matmul %38, %40, %cst_37 {dimension_numbers = #tpu.dot_dimension_numbers<[1], [0], [0], [1], [0, 0, 1, 1], [], []>} : vector<8x32xbf16>, vector<32x32xbf16>, vector<8x32xf32> -> vector<8x32xf32>
      %42 = arith.addf %34, %41 : vector<8x32xf32>
      %c1_i32_38 = arith.constant 1 : i32
      %43 = arith.addi %c1_i32_38, %arg6 : i32
      %c0_39 = arith.constant 0 : index
      %44 = arith.index_cast %43 : i32 to index
      %c2_40 = arith.constant 2 : index
      %c0_41 = arith.constant 0 : index
      %45 = vector.load %arg1[%c0_39, %44, %c2_40, %c0_41] : memref<1x10x10x32xbf16, #tpu.memory_space<vmem>>, vector<1x1x8x32xbf16>
      %46 = vector.shape_cast %45 : vector<1x1x8x32xbf16> to vector<8x32xbf16>
      %c5 = arith.constant 5 : index
      %c0_42 = arith.constant 0 : index
      %c0_43 = arith.constant 0 : index
      %47 = vector.load %arg2[%c5, %c0_42, %c0_43] : memref<9x32x32xbf16, #tpu.memory_space<vmem>>, vector<1x32x32xbf16>
      %48 = vector.shape_cast %47 : vector<1x32x32xbf16> to vector<32x32xbf16>
      %cst_44 = arith.constant dense<0.000000e+00> : vector<8x32xf32>
      %49 = tpu.matmul %46, %48, %cst_44 {dimension_numbers = #tpu.dot_dimension_numbers<[1], [0], [0], [1], [0, 0, 1, 1], [], []>} : vector<8x32xbf16>, vector<32x32xbf16>, vector<8x32xf32> -> vector<8x32xf32>
      %50 = arith.addf %42, %49 : vector<8x32xf32>
      %c2_i32 = arith.constant 2 : i32
      %51 = arith.addi %c2_i32, %arg6 : i32
      %c0_45 = arith.constant 0 : index
      %52 = arith.index_cast %51 : i32 to index
      %c0_46 = arith.constant 0 : index
      %c0_47 = arith.constant 0 : index
      %53 = vector.load %arg1[%c0_45, %52, %c0_46, %c0_47] : memref<1x10x10x32xbf16, #tpu.memory_space<vmem>>, vector<1x1x8x32xbf16>
      %54 = vector.shape_cast %53 : vector<1x1x8x32xbf16> to vector<8x32xbf16>
      %c6 = arith.constant 6 : index
      %c0_48 = arith.constant 0 : index
      %c0_49 = arith.constant 0 : index
      %55 = vector.load %arg2[%c6, %c0_48, %c0_49] : memref<9x32x32xbf16, #tpu.memory_space<vmem>>, vector<1x32x32xbf16>
      %56 = vector.shape_cast %55 : vector<1x32x32xbf16> to vector<32x32xbf16>
      %cst_50 = arith.constant dense<0.000000e+00> : vector<8x32xf32>
      %57 = tpu.matmul %54, %56, %cst_50 {dimension_numbers = #tpu.dot_dimension_numbers<[1], [0], [0], [1], [0, 0, 1, 1], [], []>} : vector<8x32xbf16>, vector<32x32xbf16>, vector<8x32xf32> -> vector<8x32xf32>
      %58 = arith.addf %50, %57 : vector<8x32xf32>
      %c2_i32_51 = arith.constant 2 : i32
      %59 = arith.addi %c2_i32_51, %arg6 : i32
      %c0_52 = arith.constant 0 : index
      %60 = arith.index_cast %59 : i32 to index
      %c1_53 = arith.constant 1 : index
      %c0_54 = arith.constant 0 : index
      %61 = vector.load %arg1[%c0_52, %60, %c1_53, %c0_54] : memref<1x10x10x32xbf16, #tpu.memory_space<vmem>>, vector<1x1x8x32xbf16>
      %62 = vector.shape_cast %61 : vector<1x1x8x32xbf16> to vector<8x32xbf16>
      %c7 = arith.constant 7 : index
      %c0_55 = arith.constant 0 : index
      %c0_56 = arith.constant 0 : index
      %63 = vector.load %arg2[%c7, %c0_55, %c0_56] : memref<9x32x32xbf16, #tpu.memory_space<vmem>>, vector<1x32x32xbf16>
      %64 = vector.shape_cast %63 : vector<1x32x32xbf16> to vector<32x32xbf16>
      %cst_57 = arith.constant dense<0.000000e+00> : vector<8x32xf32>
      %65 = tpu.matmul %62, %64, %cst_57 {dimension_numbers = #tpu.dot_dimension_numbers<[1], [0], [0], [1], [0, 0, 1, 1], [], []>} : vector<8x32xbf16>, vector<32x32xbf16>, vector<8x32xf32> -> vector<8x32xf32>
      %66 = arith.addf %58, %65 : vector<8x32xf32>
      %c2_i32_58 = arith.constant 2 : i32
      %67 = arith.addi %c2_i32_58, %arg6 : i32
      %c0_59 = arith.constant 0 : index
      %68 = arith.index_cast %67 : i32 to index
      %c2_60 = arith.constant 2 : index
      %c0_61 = arith.constant 0 : index
      %69 = vector.load %arg1[%c0_59, %68, %c2_60, %c0_61] : memref<1x10x10x32xbf16, #tpu.memory_space<vmem>>, vector<1x1x8x32xbf16>
      %70 = vector.shape_cast %69 : vector<1x1x8x32xbf16> to vector<8x32xbf16>
      %c8 = arith.constant 8 : index
      %c0_62 = arith.constant 0 : index
      %c0_63 = arith.constant 0 : index
      %71 = vector.load %arg2[%c8, %c0_62, %c0_63] : memref<9x32x32xbf16, #tpu.memory_space<vmem>>, vector<1x32x32xbf16>
      %72 = vector.shape_cast %71 : vector<1x32x32xbf16> to vector<32x32xbf16>
      %cst_64 = arith.constant dense<0.000000e+00> : vector<8x32xf32>
      %73 = tpu.matmul %70, %72, %cst_64 {dimension_numbers = #tpu.dot_dimension_numbers<[1], [0], [0], [1], [0, 0, 1, 1], [], []>} : vector<8x32xbf16>, vector<32x32xbf16>, vector<8x32xf32> -> vector<8x32xf32>
      %74 = arith.addf %66, %73 : vector<8x32xf32>
      %75 = vector.broadcast %0 : vector<1x32xf32> to vector<8x32xf32>
      %76 = arith.addf %74, %75 : vector<8x32xf32>
      %c0_65 = arith.constant 0 : index
      %77 = arith.index_cast %arg6 : i32 to index
      %c0_66 = arith.constant 0 : index
      %c0_67 = arith.constant 0 : index
      %78 = vector.load %arg4[%c0_65, %77, %c0_66, %c0_67] : memref<1x8x8x32xbf16, #tpu.memory_space<vmem>>, vector<1x1x8x32xbf16>
      %79 = vector.shape_cast %78 : vector<1x1x8x32xbf16> to vector<8x32xbf16>
      %80 = arith.extf %79 : vector<8x32xbf16> to vector<8x32xf32>
      %81 = arith.addf %76, %80 : vector<8x32xf32>
      %cst_68 = arith.constant 0.000000e+00 : f32
      %82 = vector.broadcast %cst_68 : f32 to vector<8x32xf32>
      %83 = arith.maximumf %81, %82 : vector<8x32xf32>
      %84 = arith.truncf %83 : vector<8x32xf32> to vector<8x32xbf16>
      %c0_69 = arith.constant 0 : index
      %85 = arith.index_cast %arg6 : i32 to index
      %c0_70 = arith.constant 0 : index
      %c0_71 = arith.constant 0 : index
      %86 = vector.load %arg5[%c0_69, %85, %c0_70, %c0_71] : memref<1x8x8x32xbf16, #tpu.memory_space<vmem>>, vector<1x1x8x32xbf16>
      %87 = vector.shape_cast %86 : vector<1x1x8x32xbf16> to vector<8x32xbf16>
      %88 = vector.shape_cast %84 : vector<8x32xbf16> to vector<1x1x8x32xbf16>
      tpu.vector_store %arg5[%c0_69, %85, %c0_70, %c0_71], %88 {strides = array<i32>} : memref<1x8x8x32xbf16, #tpu.memory_space<vmem>>, vector<1x1x8x32xbf16>,
    }
    %c8_i32_1 = arith.constant 8 : i32
    return
  }
  func.func @transform_0(%arg0: i32) -> (i32, i32, i32, i32) {
    %c0_i32 = arith.constant 0 : i32
    %c0_i32_0 = arith.constant 0 : i32
    %c0_i32_1 = arith.constant 0 : i32
    %c0_i32_2 = arith.constant 0 : i32
    return %arg0, %c0_i32, %c0_i32_0, %c0_i32_1 : i32, i32, i32, i32
  }
  func.func @transform_1(%arg0: i32) -> (i32, i32, i32) {
    %c0_i32 = arith.constant 0 : i32
    %c0_i32_0 = arith.constant 0 : i32
    %c0_i32_1 = arith.constant 0 : i32
    %c0_i32_2 = arith.constant 0 : i32
    return %c0_i32, %c0_i32_0, %c0_i32_1 : i32, i32, i32
  }
  func.func @transform_2(%arg0: i32) -> (i32, i32) {
    %c0_i32 = arith.constant 0 : i32
    %c0_i32_0 = arith.constant 0 : i32
    %c0_i32_1 = arith.constant 0 : i32
    return %c0_i32, %c0_i32_0 : i32, i32
  }
  func.func @transform_3(%arg0: i32) -> (i32, i32, i32, i32) {
    %c0_i32 = arith.constant 0 : i32
    %c0_i32_0 = arith.constant 0 : i32
    %c0_i32_1 = arith.constant 0 : i32
    %c0_i32_2 = arith.constant 0 : i32
    return %arg0, %c0_i32, %c0_i32_0, %c0_i32_1 : i32, i32, i32, i32
  }
  func.func @transform_4(%arg0: i32) -> (i32, i32, i32, i32) {
    %c0_i32 = arith.constant 0 : i32
    %c0_i32_0 = arith.constant 0 : i32
    %c0_i32_1 = arith.constant 0 : i32
    %c0_i32_2 = arith.constant 0 : i32
    return %arg0, %c0_i32, %c0_i32_0, %c0_i32_1 : i32, i32, i32, i32
  }
}

module attributes {stable_mosaic.version = 11 : i64} {
  func.func @_conv3x3_kernel(%arg0: i32, %arg1: memref<1x20x5x32xbf16, #tpu.memory_space<vmem>>, %arg2: memref<9x32x64xbf16, #tpu.memory_space<vmem>>, %arg3: memref<1x64xf32, #tpu.memory_space<vmem>>, %arg4: memref<32x64xbf16, #tpu.memory_space<vmem>>, %arg5: memref<1x64xf32, #tpu.memory_space<vmem>>, %arg6: memref<1x4x4x64xbf16, #tpu.memory_space<vmem>>, %arg7: memref<1x4x4x64xbf16, #tpu.memory_space<vmem>>) attributes {dimension_semantics = [#tpu.dimension_semantics<parallel>], iteration_bounds = array<i64: 2>, scalar_prefetch = 0 : i64, scratch_operands = 0 : i64, tpu.core_type = #tpu.core_type<tc>, window_params = [{transform_indices = @transform_0, window_bounds = array<i64: 1, 20, 5, 32>}, {pipeline_mode = #tpu.pipeline_mode<synchronous>, transform_indices = @transform_1, window_bounds = array<i64: 9, 32, 64>}, {pipeline_mode = #tpu.pipeline_mode<synchronous>, transform_indices = @transform_2, window_bounds = array<i64: 1, 64>}, {pipeline_mode = #tpu.pipeline_mode<synchronous>, transform_indices = @transform_3, window_bounds = array<i64: 32, 64>}, {pipeline_mode = #tpu.pipeline_mode<synchronous>, transform_indices = @transform_4, window_bounds = array<i64: 1, 64>}, {transform_indices = @transform_5, window_bounds = array<i64: 1, 4, 4, 64>}, {transform_indices = @transform_6, window_bounds = array<i64: 1, 4, 4, 64>}]} {
    %c0 = arith.constant 0 : index
    %c0_0 = arith.constant 0 : index
    %0 = vector.load %arg3[%c0, %c0_0] : memref<1x64xf32, #tpu.memory_space<vmem>>, vector<1x64xf32>
    %c0_i32 = arith.constant 0 : i32
    %c4_i32 = arith.constant 4 : i32
    %1 = arith.addi %c0_i32, %c4_i32 : i32
    %c1_i32 = arith.constant 1 : i32
    scf.for %arg8 = %c0_i32 to %1 step %c1_i32  : i32 {
      %cst = arith.constant 0.000000e+00 : f32
      %2 = vector.broadcast %cst : f32 to vector<4x64xf32>
      %c0_i32_2 = arith.constant 0 : i32
      %3 = arith.addi %c0_i32_2, %arg8 : i32
      %c0_3 = arith.constant 0 : index
      %4 = arith.index_cast %3 : i32 to index
      %c0_4 = arith.constant 0 : index
      %c0_5 = arith.constant 0 : index
      %5 = vector.load %arg1[%c0_3, %4, %c0_4, %c0_5] : memref<1x20x5x32xbf16, #tpu.memory_space<vmem>>, vector<1x1x4x32xbf16>
      %6 = vector.shape_cast %5 : vector<1x1x4x32xbf16> to vector<4x32xbf16>
      %c0_6 = arith.constant 0 : index
      %c0_7 = arith.constant 0 : index
      %c0_8 = arith.constant 0 : index
      %7 = vector.load %arg2[%c0_6, %c0_7, %c0_8] : memref<9x32x64xbf16, #tpu.memory_space<vmem>>, vector<1x32x64xbf16>
      %8 = vector.shape_cast %7 : vector<1x32x64xbf16> to vector<32x64xbf16>
      %cst_9 = arith.constant dense<0.000000e+00> : vector<4x64xf32>
      %9 = tpu.matmul %6, %8, %cst_9 {dimension_numbers = #tpu.dot_dimension_numbers<[1], [0], [0], [1], [0, 0, 1, 1], [], []>} : vector<4x32xbf16>, vector<32x64xbf16>, vector<4x64xf32> -> vector<4x64xf32>
      %10 = arith.addf %2, %9 : vector<4x64xf32>
      %c5_i32 = arith.constant 5 : i32
      %11 = arith.addi %c5_i32, %arg8 : i32
      %c0_10 = arith.constant 0 : index
      %12 = arith.index_cast %11 : i32 to index
      %c0_11 = arith.constant 0 : index
      %c0_12 = arith.constant 0 : index
      %13 = vector.load %arg1[%c0_10, %12, %c0_11, %c0_12] : memref<1x20x5x32xbf16, #tpu.memory_space<vmem>>, vector<1x1x4x32xbf16>
      %14 = vector.shape_cast %13 : vector<1x1x4x32xbf16> to vector<4x32xbf16>
      %c1 = arith.constant 1 : index
      %c0_13 = arith.constant 0 : index
      %c0_14 = arith.constant 0 : index
      %15 = vector.load %arg2[%c1, %c0_13, %c0_14] : memref<9x32x64xbf16, #tpu.memory_space<vmem>>, vector<1x32x64xbf16>
      %16 = vector.shape_cast %15 : vector<1x32x64xbf16> to vector<32x64xbf16>
      %cst_15 = arith.constant dense<0.000000e+00> : vector<4x64xf32>
      %17 = tpu.matmul %14, %16, %cst_15 {dimension_numbers = #tpu.dot_dimension_numbers<[1], [0], [0], [1], [0, 0, 1, 1], [], []>} : vector<4x32xbf16>, vector<32x64xbf16>, vector<4x64xf32> -> vector<4x64xf32>
      %18 = arith.addf %10, %17 : vector<4x64xf32>
      %c0_i32_16 = arith.constant 0 : i32
      %19 = arith.addi %c0_i32_16, %arg8 : i32
      %c0_17 = arith.constant 0 : index
      %20 = arith.index_cast %19 : i32 to index
      %c1_18 = arith.constant 1 : index
      %c0_19 = arith.constant 0 : index
      %21 = vector.load %arg1[%c0_17, %20, %c1_18, %c0_19] : memref<1x20x5x32xbf16, #tpu.memory_space<vmem>>, vector<1x1x4x32xbf16>
      %22 = vector.shape_cast %21 : vector<1x1x4x32xbf16> to vector<4x32xbf16>
      %c2 = arith.constant 2 : index
      %c0_20 = arith.constant 0 : index
      %c0_21 = arith.constant 0 : index
      %23 = vector.load %arg2[%c2, %c0_20, %c0_21] : memref<9x32x64xbf16, #tpu.memory_space<vmem>>, vector<1x32x64xbf16>
      %24 = vector.shape_cast %23 : vector<1x32x64xbf16> to vector<32x64xbf16>
      %cst_22 = arith.constant dense<0.000000e+00> : vector<4x64xf32>
      %25 = tpu.matmul %22, %24, %cst_22 {dimension_numbers = #tpu.dot_dimension_numbers<[1], [0], [0], [1], [0, 0, 1, 1], [], []>} : vector<4x32xbf16>, vector<32x64xbf16>, vector<4x64xf32> -> vector<4x64xf32>
      %26 = arith.addf %18, %25 : vector<4x64xf32>
      %c10_i32 = arith.constant 10 : i32
      %27 = arith.addi %c10_i32, %arg8 : i32
      %c0_23 = arith.constant 0 : index
      %28 = arith.index_cast %27 : i32 to index
      %c0_24 = arith.constant 0 : index
      %c0_25 = arith.constant 0 : index
      %29 = vector.load %arg1[%c0_23, %28, %c0_24, %c0_25] : memref<1x20x5x32xbf16, #tpu.memory_space<vmem>>, vector<1x1x4x32xbf16>
      %30 = vector.shape_cast %29 : vector<1x1x4x32xbf16> to vector<4x32xbf16>
      %c3 = arith.constant 3 : index
      %c0_26 = arith.constant 0 : index
      %c0_27 = arith.constant 0 : index
      %31 = vector.load %arg2[%c3, %c0_26, %c0_27] : memref<9x32x64xbf16, #tpu.memory_space<vmem>>, vector<1x32x64xbf16>
      %32 = vector.shape_cast %31 : vector<1x32x64xbf16> to vector<32x64xbf16>
      %cst_28 = arith.constant dense<0.000000e+00> : vector<4x64xf32>
      %33 = tpu.matmul %30, %32, %cst_28 {dimension_numbers = #tpu.dot_dimension_numbers<[1], [0], [0], [1], [0, 0, 1, 1], [], []>} : vector<4x32xbf16>, vector<32x64xbf16>, vector<4x64xf32> -> vector<4x64xf32>
      %34 = arith.addf %26, %33 : vector<4x64xf32>
      %c15_i32 = arith.constant 15 : i32
      %35 = arith.addi %c15_i32, %arg8 : i32
      %c0_29 = arith.constant 0 : index
      %36 = arith.index_cast %35 : i32 to index
      %c0_30 = arith.constant 0 : index
      %c0_31 = arith.constant 0 : index
      %37 = vector.load %arg1[%c0_29, %36, %c0_30, %c0_31] : memref<1x20x5x32xbf16, #tpu.memory_space<vmem>>, vector<1x1x4x32xbf16>
      %38 = vector.shape_cast %37 : vector<1x1x4x32xbf16> to vector<4x32xbf16>
      %c4 = arith.constant 4 : index
      %c0_32 = arith.constant 0 : index
      %c0_33 = arith.constant 0 : index
      %39 = vector.load %arg2[%c4, %c0_32, %c0_33] : memref<9x32x64xbf16, #tpu.memory_space<vmem>>, vector<1x32x64xbf16>
      %40 = vector.shape_cast %39 : vector<1x32x64xbf16> to vector<32x64xbf16>
      %cst_34 = arith.constant dense<0.000000e+00> : vector<4x64xf32>
      %41 = tpu.matmul %38, %40, %cst_34 {dimension_numbers = #tpu.dot_dimension_numbers<[1], [0], [0], [1], [0, 0, 1, 1], [], []>} : vector<4x32xbf16>, vector<32x64xbf16>, vector<4x64xf32> -> vector<4x64xf32>
      %42 = arith.addf %34, %41 : vector<4x64xf32>
      %c10_i32_35 = arith.constant 10 : i32
      %43 = arith.addi %c10_i32_35, %arg8 : i32
      %c0_36 = arith.constant 0 : index
      %44 = arith.index_cast %43 : i32 to index
      %c1_37 = arith.constant 1 : index
      %c0_38 = arith.constant 0 : index
      %45 = vector.load %arg1[%c0_36, %44, %c1_37, %c0_38] : memref<1x20x5x32xbf16, #tpu.memory_space<vmem>>, vector<1x1x4x32xbf16>
      %46 = vector.shape_cast %45 : vector<1x1x4x32xbf16> to vector<4x32xbf16>
      %c5 = arith.constant 5 : index
      %c0_39 = arith.constant 0 : index
      %c0_40 = arith.constant 0 : index
      %47 = vector.load %arg2[%c5, %c0_39, %c0_40] : memref<9x32x64xbf16, #tpu.memory_space<vmem>>, vector<1x32x64xbf16>
      %48 = vector.shape_cast %47 : vector<1x32x64xbf16> to vector<32x64xbf16>
      %cst_41 = arith.constant dense<0.000000e+00> : vector<4x64xf32>
      %49 = tpu.matmul %46, %48, %cst_41 {dimension_numbers = #tpu.dot_dimension_numbers<[1], [0], [0], [1], [0, 0, 1, 1], [], []>} : vector<4x32xbf16>, vector<32x64xbf16>, vector<4x64xf32> -> vector<4x64xf32>
      %50 = arith.addf %42, %49 : vector<4x64xf32>
      %c1_i32_42 = arith.constant 1 : i32
      %51 = arith.addi %c1_i32_42, %arg8 : i32
      %c0_43 = arith.constant 0 : index
      %52 = arith.index_cast %51 : i32 to index
      %c0_44 = arith.constant 0 : index
      %c0_45 = arith.constant 0 : index
      %53 = vector.load %arg1[%c0_43, %52, %c0_44, %c0_45] : memref<1x20x5x32xbf16, #tpu.memory_space<vmem>>, vector<1x1x4x32xbf16>
      %54 = vector.shape_cast %53 : vector<1x1x4x32xbf16> to vector<4x32xbf16>
      %c6 = arith.constant 6 : index
      %c0_46 = arith.constant 0 : index
      %c0_47 = arith.constant 0 : index
      %55 = vector.load %arg2[%c6, %c0_46, %c0_47] : memref<9x32x64xbf16, #tpu.memory_space<vmem>>, vector<1x32x64xbf16>
      %56 = vector.shape_cast %55 : vector<1x32x64xbf16> to vector<32x64xbf16>
      %cst_48 = arith.constant dense<0.000000e+00> : vector<4x64xf32>
      %57 = tpu.matmul %54, %56, %cst_48 {dimension_numbers = #tpu.dot_dimension_numbers<[1], [0], [0], [1], [0, 0, 1, 1], [], []>} : vector<4x32xbf16>, vector<32x64xbf16>, vector<4x64xf32> -> vector<4x64xf32>
      %58 = arith.addf %50, %57 : vector<4x64xf32>
      %c6_i32 = arith.constant 6 : i32
      %59 = arith.addi %c6_i32, %arg8 : i32
      %c0_49 = arith.constant 0 : index
      %60 = arith.index_cast %59 : i32 to index
      %c0_50 = arith.constant 0 : index
      %c0_51 = arith.constant 0 : index
      %61 = vector.load %arg1[%c0_49, %60, %c0_50, %c0_51] : memref<1x20x5x32xbf16, #tpu.memory_space<vmem>>, vector<1x1x4x32xbf16>
      %62 = vector.shape_cast %61 : vector<1x1x4x32xbf16> to vector<4x32xbf16>
      %c7 = arith.constant 7 : index
      %c0_52 = arith.constant 0 : index
      %c0_53 = arith.constant 0 : index
      %63 = vector.load %arg2[%c7, %c0_52, %c0_53] : memref<9x32x64xbf16, #tpu.memory_space<vmem>>, vector<1x32x64xbf16>
      %64 = vector.shape_cast %63 : vector<1x32x64xbf16> to vector<32x64xbf16>
      %cst_54 = arith.constant dense<0.000000e+00> : vector<4x64xf32>
      %65 = tpu.matmul %62, %64, %cst_54 {dimension_numbers = #tpu.dot_dimension_numbers<[1], [0], [0], [1], [0, 0, 1, 1], [], []>} : vector<4x32xbf16>, vector<32x64xbf16>, vector<4x64xf32> -> vector<4x64xf32>
      %66 = arith.addf %58, %65 : vector<4x64xf32>
      %c1_i32_55 = arith.constant 1 : i32
      %67 = arith.addi %c1_i32_55, %arg8 : i32
      %c0_56 = arith.constant 0 : index
      %68 = arith.index_cast %67 : i32 to index
      %c1_57 = arith.constant 1 : index
      %c0_58 = arith.constant 0 : index
      %69 = vector.load %arg1[%c0_56, %68, %c1_57, %c0_58] : memref<1x20x5x32xbf16, #tpu.memory_space<vmem>>, vector<1x1x4x32xbf16>
      %70 = vector.shape_cast %69 : vector<1x1x4x32xbf16> to vector<4x32xbf16>
      %c8 = arith.constant 8 : index
      %c0_59 = arith.constant 0 : index
      %c0_60 = arith.constant 0 : index
      %71 = vector.load %arg2[%c8, %c0_59, %c0_60] : memref<9x32x64xbf16, #tpu.memory_space<vmem>>, vector<1x32x64xbf16>
      %72 = vector.shape_cast %71 : vector<1x32x64xbf16> to vector<32x64xbf16>
      %cst_61 = arith.constant dense<0.000000e+00> : vector<4x64xf32>
      %73 = tpu.matmul %70, %72, %cst_61 {dimension_numbers = #tpu.dot_dimension_numbers<[1], [0], [0], [1], [0, 0, 1, 1], [], []>} : vector<4x32xbf16>, vector<32x64xbf16>, vector<4x64xf32> -> vector<4x64xf32>
      %74 = arith.addf %66, %73 : vector<4x64xf32>
      %75 = vector.broadcast %0 : vector<1x64xf32> to vector<4x64xf32>
      %76 = arith.addf %74, %75 : vector<4x64xf32>
      %cst_62 = arith.constant 0.000000e+00 : f32
      %77 = vector.broadcast %cst_62 : f32 to vector<4x64xf32>
      %78 = arith.maximumf %76, %77 : vector<4x64xf32>
      %79 = arith.truncf %78 : vector<4x64xf32> to vector<4x64xbf16>
      %c0_63 = arith.constant 0 : index
      %80 = arith.index_cast %arg8 : i32 to index
      %c0_64 = arith.constant 0 : index
      %c0_65 = arith.constant 0 : index
      %81 = vector.load %arg6[%c0_63, %80, %c0_64, %c0_65] : memref<1x4x4x64xbf16, #tpu.memory_space<vmem>>, vector<1x1x4x64xbf16>
      %82 = vector.shape_cast %81 : vector<1x1x4x64xbf16> to vector<4x64xbf16>
      %83 = vector.shape_cast %79 : vector<4x64xbf16> to vector<1x1x4x64xbf16>
      tpu.vector_store %arg6[%c0_63, %80, %c0_64, %c0_65], %83 {strides = array<i32>} : memref<1x4x4x64xbf16, #tpu.memory_space<vmem>>, vector<1x1x4x64xbf16>,
      %c15_i32_66 = arith.constant 15 : i32
      %84 = arith.addi %c15_i32_66, %arg8 : i32
      %c0_67 = arith.constant 0 : index
      %85 = arith.index_cast %84 : i32 to index
      %c0_68 = arith.constant 0 : index
      %c0_69 = arith.constant 0 : index
      %86 = vector.load %arg1[%c0_67, %85, %c0_68, %c0_69] : memref<1x20x5x32xbf16, #tpu.memory_space<vmem>>, vector<1x1x4x32xbf16>
      %87 = vector.shape_cast %86 : vector<1x1x4x32xbf16> to vector<4x32xbf16>
      %c0_70 = arith.constant 0 : index
      %c0_71 = arith.constant 0 : index
      %88 = vector.load %arg4[%c0_70, %c0_71] : memref<32x64xbf16, #tpu.memory_space<vmem>>, vector<32x64xbf16>
      %cst_72 = arith.constant dense<0.000000e+00> : vector<4x64xf32>
      %89 = tpu.matmul %87, %88, %cst_72 {dimension_numbers = #tpu.dot_dimension_numbers<[1], [0], [0], [1], [0, 0, 1, 1], [], []>} : vector<4x32xbf16>, vector<32x64xbf16>, vector<4x64xf32> -> vector<4x64xf32>
      %c0_73 = arith.constant 0 : index
      %c0_74 = arith.constant 0 : index
      %90 = vector.load %arg5[%c0_73, %c0_74] : memref<1x64xf32, #tpu.memory_space<vmem>>, vector<1x64xf32>
      %91 = vector.broadcast %90 : vector<1x64xf32> to vector<4x64xf32>
      %92 = arith.addf %89, %91 : vector<4x64xf32>
      %93 = arith.truncf %92 : vector<4x64xf32> to vector<4x64xbf16>
      %c0_75 = arith.constant 0 : index
      %94 = arith.index_cast %arg8 : i32 to index
      %c0_76 = arith.constant 0 : index
      %c0_77 = arith.constant 0 : index
      %95 = vector.load %arg7[%c0_75, %94, %c0_76, %c0_77] : memref<1x4x4x64xbf16, #tpu.memory_space<vmem>>, vector<1x1x4x64xbf16>
      %96 = vector.shape_cast %95 : vector<1x1x4x64xbf16> to vector<4x64xbf16>
      %97 = vector.shape_cast %93 : vector<4x64xbf16> to vector<1x1x4x64xbf16>
      tpu.vector_store %arg7[%c0_75, %94, %c0_76, %c0_77], %97 {strides = array<i32>} : memref<1x4x4x64xbf16, #tpu.memory_space<vmem>>, vector<1x1x4x64xbf16>,
    }
    %c4_i32_1 = arith.constant 4 : i32
    return
  }
  func.func @transform_0(%arg0: i32) -> (i32, i32, i32, i32) {
    %c0_i32 = arith.constant 0 : i32
    %c0_i32_0 = arith.constant 0 : i32
    %c0_i32_1 = arith.constant 0 : i32
    %c0_i32_2 = arith.constant 0 : i32
    return %arg0, %c0_i32, %c0_i32_0, %c0_i32_1 : i32, i32, i32, i32
  }
  func.func @transform_1(%arg0: i32) -> (i32, i32, i32) {
    %c0_i32 = arith.constant 0 : i32
    %c0_i32_0 = arith.constant 0 : i32
    %c0_i32_1 = arith.constant 0 : i32
    %c0_i32_2 = arith.constant 0 : i32
    return %c0_i32, %c0_i32_0, %c0_i32_1 : i32, i32, i32
  }
  func.func @transform_2(%arg0: i32) -> (i32, i32) {
    %c0_i32 = arith.constant 0 : i32
    %c0_i32_0 = arith.constant 0 : i32
    %c0_i32_1 = arith.constant 0 : i32
    return %c0_i32, %c0_i32_0 : i32, i32
  }
  func.func @transform_3(%arg0: i32) -> (i32, i32) {
    %c0_i32 = arith.constant 0 : i32
    %c0_i32_0 = arith.constant 0 : i32
    %c0_i32_1 = arith.constant 0 : i32
    return %c0_i32, %c0_i32_0 : i32, i32
  }
  func.func @transform_4(%arg0: i32) -> (i32, i32) {
    %c0_i32 = arith.constant 0 : i32
    %c0_i32_0 = arith.constant 0 : i32
    %c0_i32_1 = arith.constant 0 : i32
    return %c0_i32, %c0_i32_0 : i32, i32
  }
  func.func @transform_5(%arg0: i32) -> (i32, i32, i32, i32) {
    %c0_i32 = arith.constant 0 : i32
    %c0_i32_0 = arith.constant 0 : i32
    %c0_i32_1 = arith.constant 0 : i32
    %c0_i32_2 = arith.constant 0 : i32
    return %arg0, %c0_i32, %c0_i32_0, %c0_i32_1 : i32, i32, i32, i32
  }
  func.func @transform_6(%arg0: i32) -> (i32, i32, i32, i32) {
    %c0_i32 = arith.constant 0 : i32
    %c0_i32_0 = arith.constant 0 : i32
    %c0_i32_1 = arith.constant 0 : i32
    %c0_i32_2 = arith.constant 0 : i32
    return %arg0, %c0_i32, %c0_i32_0, %c0_i32_1 : i32, i32, i32, i32
  }
}

module attributes {stable_mosaic.version = 11 : i64} {
  func.func @_conv3x3_kernel(%arg0: i32, %arg1: memref<1x6x6x64xbf16, #tpu.memory_space<vmem>>, %arg2: memref<9x64x64xbf16, #tpu.memory_space<vmem>>, %arg3: memref<1x64xf32, #tpu.memory_space<vmem>>, %arg4: memref<1x4x4x64xbf16, #tpu.memory_space<vmem>>, %arg5: memref<1x4x4x64xbf16, #tpu.memory_space<vmem>>) attributes {dimension_semantics = [#tpu.dimension_semantics<parallel>], iteration_bounds = array<i64: 2>, scalar_prefetch = 0 : i64, scratch_operands = 0 : i64, tpu.core_type = #tpu.core_type<tc>, window_params = [{transform_indices = @transform_0, window_bounds = array<i64: 1, 6, 6, 64>}, {pipeline_mode = #tpu.pipeline_mode<synchronous>, transform_indices = @transform_1, window_bounds = array<i64: 9, 64, 64>}, {pipeline_mode = #tpu.pipeline_mode<synchronous>, transform_indices = @transform_2, window_bounds = array<i64: 1, 64>}, {transform_indices = @transform_3, window_bounds = array<i64: 1, 4, 4, 64>}, {transform_indices = @transform_4, window_bounds = array<i64: 1, 4, 4, 64>}]} {
    %c0 = arith.constant 0 : index
    %c0_0 = arith.constant 0 : index
    %0 = vector.load %arg3[%c0, %c0_0] : memref<1x64xf32, #tpu.memory_space<vmem>>, vector<1x64xf32>
    %c0_i32 = arith.constant 0 : i32
    %c4_i32 = arith.constant 4 : i32
    %1 = arith.addi %c0_i32, %c4_i32 : i32
    %c1_i32 = arith.constant 1 : i32
    scf.for %arg6 = %c0_i32 to %1 step %c1_i32  : i32 {
      %cst = arith.constant 0.000000e+00 : f32
      %2 = vector.broadcast %cst : f32 to vector<4x64xf32>
      %c0_i32_2 = arith.constant 0 : i32
      %3 = arith.addi %c0_i32_2, %arg6 : i32
      %c0_3 = arith.constant 0 : index
      %4 = arith.index_cast %3 : i32 to index
      %c0_4 = arith.constant 0 : index
      %c0_5 = arith.constant 0 : index
      %5 = vector.load %arg1[%c0_3, %4, %c0_4, %c0_5] : memref<1x6x6x64xbf16, #tpu.memory_space<vmem>>, vector<1x1x4x64xbf16>
      %6 = vector.shape_cast %5 : vector<1x1x4x64xbf16> to vector<4x64xbf16>
      %c0_6 = arith.constant 0 : index
      %c0_7 = arith.constant 0 : index
      %c0_8 = arith.constant 0 : index
      %7 = vector.load %arg2[%c0_6, %c0_7, %c0_8] : memref<9x64x64xbf16, #tpu.memory_space<vmem>>, vector<1x64x64xbf16>
      %8 = vector.shape_cast %7 : vector<1x64x64xbf16> to vector<64x64xbf16>
      %cst_9 = arith.constant dense<0.000000e+00> : vector<4x64xf32>
      %9 = tpu.matmul %6, %8, %cst_9 {dimension_numbers = #tpu.dot_dimension_numbers<[1], [0], [0], [1], [0, 0, 1, 1], [], []>} : vector<4x64xbf16>, vector<64x64xbf16>, vector<4x64xf32> -> vector<4x64xf32>
      %10 = arith.addf %2, %9 : vector<4x64xf32>
      %c0_i32_10 = arith.constant 0 : i32
      %11 = arith.addi %c0_i32_10, %arg6 : i32
      %c0_11 = arith.constant 0 : index
      %12 = arith.index_cast %11 : i32 to index
      %c1 = arith.constant 1 : index
      %c0_12 = arith.constant 0 : index
      %13 = vector.load %arg1[%c0_11, %12, %c1, %c0_12] : memref<1x6x6x64xbf16, #tpu.memory_space<vmem>>, vector<1x1x4x64xbf16>
      %14 = vector.shape_cast %13 : vector<1x1x4x64xbf16> to vector<4x64xbf16>
      %c1_13 = arith.constant 1 : index
      %c0_14 = arith.constant 0 : index
      %c0_15 = arith.constant 0 : index
      %15 = vector.load %arg2[%c1_13, %c0_14, %c0_15] : memref<9x64x64xbf16, #tpu.memory_space<vmem>>, vector<1x64x64xbf16>
      %16 = vector.shape_cast %15 : vector<1x64x64xbf16> to vector<64x64xbf16>
      %cst_16 = arith.constant dense<0.000000e+00> : vector<4x64xf32>
      %17 = tpu.matmul %14, %16, %cst_16 {dimension_numbers = #tpu.dot_dimension_numbers<[1], [0], [0], [1], [0, 0, 1, 1], [], []>} : vector<4x64xbf16>, vector<64x64xbf16>, vector<4x64xf32> -> vector<4x64xf32>
      %18 = arith.addf %10, %17 : vector<4x64xf32>
      %c0_i32_17 = arith.constant 0 : i32
      %19 = arith.addi %c0_i32_17, %arg6 : i32
      %c0_18 = arith.constant 0 : index
      %20 = arith.index_cast %19 : i32 to index
      %c2 = arith.constant 2 : index
      %c0_19 = arith.constant 0 : index
      %21 = vector.load %arg1[%c0_18, %20, %c2, %c0_19] : memref<1x6x6x64xbf16, #tpu.memory_space<vmem>>, vector<1x1x4x64xbf16>
      %22 = vector.shape_cast %21 : vector<1x1x4x64xbf16> to vector<4x64xbf16>
      %c2_20 = arith.constant 2 : index
      %c0_21 = arith.constant 0 : index
      %c0_22 = arith.constant 0 : index
      %23 = vector.load %arg2[%c2_20, %c0_21, %c0_22] : memref<9x64x64xbf16, #tpu.memory_space<vmem>>, vector<1x64x64xbf16>
      %24 = vector.shape_cast %23 : vector<1x64x64xbf16> to vector<64x64xbf16>
      %cst_23 = arith.constant dense<0.000000e+00> : vector<4x64xf32>
      %25 = tpu.matmul %22, %24, %cst_23 {dimension_numbers = #tpu.dot_dimension_numbers<[1], [0], [0], [1], [0, 0, 1, 1], [], []>} : vector<4x64xbf16>, vector<64x64xbf16>, vector<4x64xf32> -> vector<4x64xf32>
      %26 = arith.addf %18, %25 : vector<4x64xf32>
      %c1_i32_24 = arith.constant 1 : i32
      %27 = arith.addi %c1_i32_24, %arg6 : i32
      %c0_25 = arith.constant 0 : index
      %28 = arith.index_cast %27 : i32 to index
      %c0_26 = arith.constant 0 : index
      %c0_27 = arith.constant 0 : index
      %29 = vector.load %arg1[%c0_25, %28, %c0_26, %c0_27] : memref<1x6x6x64xbf16, #tpu.memory_space<vmem>>, vector<1x1x4x64xbf16>
      %30 = vector.shape_cast %29 : vector<1x1x4x64xbf16> to vector<4x64xbf16>
      %c3 = arith.constant 3 : index
      %c0_28 = arith.constant 0 : index
      %c0_29 = arith.constant 0 : index
      %31 = vector.load %arg2[%c3, %c0_28, %c0_29] : memref<9x64x64xbf16, #tpu.memory_space<vmem>>, vector<1x64x64xbf16>
      %32 = vector.shape_cast %31 : vector<1x64x64xbf16> to vector<64x64xbf16>
      %cst_30 = arith.constant dense<0.000000e+00> : vector<4x64xf32>
      %33 = tpu.matmul %30, %32, %cst_30 {dimension_numbers = #tpu.dot_dimension_numbers<[1], [0], [0], [1], [0, 0, 1, 1], [], []>} : vector<4x64xbf16>, vector<64x64xbf16>, vector<4x64xf32> -> vector<4x64xf32>
      %34 = arith.addf %26, %33 : vector<4x64xf32>
      %c1_i32_31 = arith.constant 1 : i32
      %35 = arith.addi %c1_i32_31, %arg6 : i32
      %c0_32 = arith.constant 0 : index
      %36 = arith.index_cast %35 : i32 to index
      %c1_33 = arith.constant 1 : index
      %c0_34 = arith.constant 0 : index
      %37 = vector.load %arg1[%c0_32, %36, %c1_33, %c0_34] : memref<1x6x6x64xbf16, #tpu.memory_space<vmem>>, vector<1x1x4x64xbf16>
      %38 = vector.shape_cast %37 : vector<1x1x4x64xbf16> to vector<4x64xbf16>
      %c4 = arith.constant 4 : index
      %c0_35 = arith.constant 0 : index
      %c0_36 = arith.constant 0 : index
      %39 = vector.load %arg2[%c4, %c0_35, %c0_36] : memref<9x64x64xbf16, #tpu.memory_space<vmem>>, vector<1x64x64xbf16>
      %40 = vector.shape_cast %39 : vector<1x64x64xbf16> to vector<64x64xbf16>
      %cst_37 = arith.constant dense<0.000000e+00> : vector<4x64xf32>
      %41 = tpu.matmul %38, %40, %cst_37 {dimension_numbers = #tpu.dot_dimension_numbers<[1], [0], [0], [1], [0, 0, 1, 1], [], []>} : vector<4x64xbf16>, vector<64x64xbf16>, vector<4x64xf32> -> vector<4x64xf32>
      %42 = arith.addf %34, %41 : vector<4x64xf32>
      %c1_i32_38 = arith.constant 1 : i32
      %43 = arith.addi %c1_i32_38, %arg6 : i32
      %c0_39 = arith.constant 0 : index
      %44 = arith.index_cast %43 : i32 to index
      %c2_40 = arith.constant 2 : index
      %c0_41 = arith.constant 0 : index
      %45 = vector.load %arg1[%c0_39, %44, %c2_40, %c0_41] : memref<1x6x6x64xbf16, #tpu.memory_space<vmem>>, vector<1x1x4x64xbf16>
      %46 = vector.shape_cast %45 : vector<1x1x4x64xbf16> to vector<4x64xbf16>
      %c5 = arith.constant 5 : index
      %c0_42 = arith.constant 0 : index
      %c0_43 = arith.constant 0 : index
      %47 = vector.load %arg2[%c5, %c0_42, %c0_43] : memref<9x64x64xbf16, #tpu.memory_space<vmem>>, vector<1x64x64xbf16>
      %48 = vector.shape_cast %47 : vector<1x64x64xbf16> to vector<64x64xbf16>
      %cst_44 = arith.constant dense<0.000000e+00> : vector<4x64xf32>
      %49 = tpu.matmul %46, %48, %cst_44 {dimension_numbers = #tpu.dot_dimension_numbers<[1], [0], [0], [1], [0, 0, 1, 1], [], []>} : vector<4x64xbf16>, vector<64x64xbf16>, vector<4x64xf32> -> vector<4x64xf32>
      %50 = arith.addf %42, %49 : vector<4x64xf32>
      %c2_i32 = arith.constant 2 : i32
      %51 = arith.addi %c2_i32, %arg6 : i32
      %c0_45 = arith.constant 0 : index
      %52 = arith.index_cast %51 : i32 to index
      %c0_46 = arith.constant 0 : index
      %c0_47 = arith.constant 0 : index
      %53 = vector.load %arg1[%c0_45, %52, %c0_46, %c0_47] : memref<1x6x6x64xbf16, #tpu.memory_space<vmem>>, vector<1x1x4x64xbf16>
      %54 = vector.shape_cast %53 : vector<1x1x4x64xbf16> to vector<4x64xbf16>
      %c6 = arith.constant 6 : index
      %c0_48 = arith.constant 0 : index
      %c0_49 = arith.constant 0 : index
      %55 = vector.load %arg2[%c6, %c0_48, %c0_49] : memref<9x64x64xbf16, #tpu.memory_space<vmem>>, vector<1x64x64xbf16>
      %56 = vector.shape_cast %55 : vector<1x64x64xbf16> to vector<64x64xbf16>
      %cst_50 = arith.constant dense<0.000000e+00> : vector<4x64xf32>
      %57 = tpu.matmul %54, %56, %cst_50 {dimension_numbers = #tpu.dot_dimension_numbers<[1], [0], [0], [1], [0, 0, 1, 1], [], []>} : vector<4x64xbf16>, vector<64x64xbf16>, vector<4x64xf32> -> vector<4x64xf32>
      %58 = arith.addf %50, %57 : vector<4x64xf32>
      %c2_i32_51 = arith.constant 2 : i32
      %59 = arith.addi %c2_i32_51, %arg6 : i32
      %c0_52 = arith.constant 0 : index
      %60 = arith.index_cast %59 : i32 to index
      %c1_53 = arith.constant 1 : index
      %c0_54 = arith.constant 0 : index
      %61 = vector.load %arg1[%c0_52, %60, %c1_53, %c0_54] : memref<1x6x6x64xbf16, #tpu.memory_space<vmem>>, vector<1x1x4x64xbf16>
      %62 = vector.shape_cast %61 : vector<1x1x4x64xbf16> to vector<4x64xbf16>
      %c7 = arith.constant 7 : index
      %c0_55 = arith.constant 0 : index
      %c0_56 = arith.constant 0 : index
      %63 = vector.load %arg2[%c7, %c0_55, %c0_56] : memref<9x64x64xbf16, #tpu.memory_space<vmem>>, vector<1x64x64xbf16>
      %64 = vector.shape_cast %63 : vector<1x64x64xbf16> to vector<64x64xbf16>
      %cst_57 = arith.constant dense<0.000000e+00> : vector<4x64xf32>
      %65 = tpu.matmul %62, %64, %cst_57 {dimension_numbers = #tpu.dot_dimension_numbers<[1], [0], [0], [1], [0, 0, 1, 1], [], []>} : vector<4x64xbf16>, vector<64x64xbf16>, vector<4x64xf32> -> vector<4x64xf32>
      %66 = arith.addf %58, %65 : vector<4x64xf32>
      %c2_i32_58 = arith.constant 2 : i32
      %67 = arith.addi %c2_i32_58, %arg6 : i32
      %c0_59 = arith.constant 0 : index
      %68 = arith.index_cast %67 : i32 to index
      %c2_60 = arith.constant 2 : index
      %c0_61 = arith.constant 0 : index
      %69 = vector.load %arg1[%c0_59, %68, %c2_60, %c0_61] : memref<1x6x6x64xbf16, #tpu.memory_space<vmem>>, vector<1x1x4x64xbf16>
      %70 = vector.shape_cast %69 : vector<1x1x4x64xbf16> to vector<4x64xbf16>
      %c8 = arith.constant 8 : index
      %c0_62 = arith.constant 0 : index
      %c0_63 = arith.constant 0 : index
      %71 = vector.load %arg2[%c8, %c0_62, %c0_63] : memref<9x64x64xbf16, #tpu.memory_space<vmem>>, vector<1x64x64xbf16>
      %72 = vector.shape_cast %71 : vector<1x64x64xbf16> to vector<64x64xbf16>
      %cst_64 = arith.constant dense<0.000000e+00> : vector<4x64xf32>
      %73 = tpu.matmul %70, %72, %cst_64 {dimension_numbers = #tpu.dot_dimension_numbers<[1], [0], [0], [1], [0, 0, 1, 1], [], []>} : vector<4x64xbf16>, vector<64x64xbf16>, vector<4x64xf32> -> vector<4x64xf32>
      %74 = arith.addf %66, %73 : vector<4x64xf32>
      %75 = vector.broadcast %0 : vector<1x64xf32> to vector<4x64xf32>
      %76 = arith.addf %74, %75 : vector<4x64xf32>
      %c0_65 = arith.constant 0 : index
      %77 = arith.index_cast %arg6 : i32 to index
      %c0_66 = arith.constant 0 : index
      %c0_67 = arith.constant 0 : index
      %78 = vector.load %arg4[%c0_65, %77, %c0_66, %c0_67] : memref<1x4x4x64xbf16, #tpu.memory_space<vmem>>, vector<1x1x4x64xbf16>
      %79 = vector.shape_cast %78 : vector<1x1x4x64xbf16> to vector<4x64xbf16>
      %80 = arith.extf %79 : vector<4x64xbf16> to vector<4x64xf32>
      %81 = arith.addf %76, %80 : vector<4x64xf32>
      %cst_68 = arith.constant 0.000000e+00 : f32
      %82 = vector.broadcast %cst_68 : f32 to vector<4x64xf32>
      %83 = arith.maximumf %81, %82 : vector<4x64xf32>
      %84 = arith.truncf %83 : vector<4x64xf32> to vector<4x64xbf16>
      %c0_69 = arith.constant 0 : index
      %85 = arith.index_cast %arg6 : i32 to index
      %c0_70 = arith.constant 0 : index
      %c0_71 = arith.constant 0 : index
      %86 = vector.load %arg5[%c0_69, %85, %c0_70, %c0_71] : memref<1x4x4x64xbf16, #tpu.memory_space<vmem>>, vector<1x1x4x64xbf16>
      %87 = vector.shape_cast %86 : vector<1x1x4x64xbf16> to vector<4x64xbf16>
      %88 = vector.shape_cast %84 : vector<4x64xbf16> to vector<1x1x4x64xbf16>
      tpu.vector_store %arg5[%c0_69, %85, %c0_70, %c0_71], %88 {strides = array<i32>} : memref<1x4x4x64xbf16, #tpu.memory_space<vmem>>, vector<1x1x4x64xbf16>,
    }
    %c4_i32_1 = arith.constant 4 : i32
    return
  }
  func.func @transform_0(%arg0: i32) -> (i32, i32, i32, i32) {
    %c0_i32 = arith.constant 0 : i32
    %c0_i32_0 = arith.constant 0 : i32
    %c0_i32_1 = arith.constant 0 : i32
    %c0_i32_2 = arith.constant 0 : i32
    return %arg0, %c0_i32, %c0_i32_0, %c0_i32_1 : i32, i32, i32, i32
  }
  func.func @transform_1(%arg0: i32) -> (i32, i32, i32) {
    %c0_i32 = arith.constant 0 : i32
    %c0_i32_0 = arith.constant 0 : i32
    %c0_i32_1 = arith.constant 0 : i32
    %c0_i32_2 = arith.constant 0 : i32
    return %c0_i32, %c0_i32_0, %c0_i32_1 : i32, i32, i32
  }
  func.func @transform_2(%arg0: i32) -> (i32, i32) {
    %c0_i32 = arith.constant 0 : i32
    %c0_i32_0 = arith.constant 0 : i32
    %c0_i32_1 = arith.constant 0 : i32
    return %c0_i32, %c0_i32_0 : i32, i32
  }
  func.func @transform_3(%arg0: i32) -> (i32, i32, i32, i32) {
    %c0_i32 = arith.constant 0 : i32
    %c0_i32_0 = arith.constant 0 : i32
    %c0_i32_1 = arith.constant 0 : i32
    %c0_i32_2 = arith.constant 0 : i32
    return %arg0, %c0_i32, %c0_i32_0, %c0_i32_1 : i32, i32, i32, i32
  }
  func.func @transform_4(%arg0: i32) -> (i32, i32, i32, i32) {
    %c0_i32 = arith.constant 0 : i32
    %c0_i32_0 = arith.constant 0 : i32
    %c0_i32_1 = arith.constant 0 : i32
    %c0_i32_2 = arith.constant 0 : i32
    return %arg0, %c0_i32, %c0_i32_0, %c0_i32_1 : i32, i32, i32, i32
  }
}

module attributes {stable_mosaic.version = 11 : i64} {
  func.func @_pool_head_kernel(%arg0: i32, %arg1: memref<1x4x4x64xbf16, #tpu.memory_space<vmem>>, %arg2: memref<64x10xf32, #tpu.memory_space<vmem>>, %arg3: memref<1x10xf32, #tpu.memory_space<vmem>>, %arg4: memref<1x1x10xf32, #tpu.memory_space<vmem>>) attributes {dimension_semantics = [#tpu.dimension_semantics<parallel>], iteration_bounds = array<i64: 2>, scalar_prefetch = 0 : i64, scratch_operands = 0 : i64, tpu.core_type = #tpu.core_type<tc>, window_params = [{transform_indices = @transform_0, window_bounds = array<i64: 1, 4, 4, 64>}, {pipeline_mode = #tpu.pipeline_mode<synchronous>, transform_indices = @transform_1, window_bounds = array<i64: 64, 10>}, {pipeline_mode = #tpu.pipeline_mode<synchronous>, transform_indices = @transform_2, window_bounds = array<i64: 1, 10>}, {transform_indices = @transform_3, window_bounds = array<i64: 1, 1, 10>}]} {
    %c0 = arith.constant 0 : index
    %c0_0 = arith.constant 0 : index
    %0 = vector.load %arg3[%c0, %c0_0] : memref<1x10xf32, #tpu.memory_space<vmem>>, vector<1x10xf32>
    %c0_1 = arith.constant 0 : index
    %c0_2 = arith.constant 0 : index
    %c0_3 = arith.constant 0 : index
    %c0_4 = arith.constant 0 : index
    %1 = vector.load %arg1[%c0_1, %c0_2, %c0_3, %c0_4] : memref<1x4x4x64xbf16, #tpu.memory_space<vmem>>, vector<1x4x4x64xbf16>
    %2 = vector.shape_cast %1 : vector<1x4x4x64xbf16> to vector<4x4x64xbf16>
    %3 = arith.extf %2 : vector<4x4x64xbf16> to vector<4x4x64xf32>
    %cst = arith.constant dense<0.000000e+00> : vector<64xf32>
    %4 = vector.multi_reduction <add>, %3, %cst [0, 1] : vector<4x4x64xf32> to vector<64xf32>
    %5 = vector.shape_cast %4 : vector<64xf32> to vector<1x1x64xf32>
    %cst_5 = arith.constant 1.600000e+01 : f32
    %6 = vector.broadcast %cst_5 : f32 to vector<1x1x64xf32>
    %7 = arith.divf %5, %6 : vector<1x1x64xf32>
    %8 = vector.shape_cast %7 : vector<1x1x64xf32> to vector<1x64xf32>
    %c0_6 = arith.constant 0 : index
    %c0_7 = arith.constant 0 : index
    %9 = vector.load %arg2[%c0_6, %c0_7] : memref<64x10xf32, #tpu.memory_space<vmem>>, vector<64x10xf32>
    %cst_8 = arith.constant dense<0.000000e+00> : vector<1x10xf32>
    %10 = tpu.matmul %8, %9, %cst_8 {dimension_numbers = #tpu.dot_dimension_numbers<[1], [0], [0], [1], [0, 0, 1, 1], [], []>} : vector<1x64xf32>, vector<64x10xf32>, vector<1x10xf32> -> vector<1x10xf32>
    %11 = arith.addf %0, %10 : vector<1x10xf32>
    %c0_9 = arith.constant 0 : index
    %c0_10 = arith.constant 0 : index
    %c0_11 = arith.constant 0 : index
    %12 = vector.load %arg4[%c0_9, %c0_10, %c0_11] : memref<1x1x10xf32, #tpu.memory_space<vmem>>, vector<1x1x10xf32>
    %13 = vector.shape_cast %12 : vector<1x1x10xf32> to vector<1x10xf32>
    %14 = vector.shape_cast %11 : vector<1x10xf32> to vector<1x1x10xf32>
    tpu.vector_store %arg4[%c0_9, %c0_10, %c0_11], %14 {strides = array<i32>} : memref<1x1x10xf32, #tpu.memory_space<vmem>>, vector<1x1x10xf32>,
    return
  }
  func.func @transform_0(%arg0: i32) -> (i32, i32, i32, i32) {
    %c0_i32 = arith.constant 0 : i32
    %c0_i32_0 = arith.constant 0 : i32
    %c0_i32_1 = arith.constant 0 : i32
    %c0_i32_2 = arith.constant 0 : i32
    return %arg0, %c0_i32, %c0_i32_0, %c0_i32_1 : i32, i32, i32, i32
  }
  func.func @transform_1(%arg0: i32) -> (i32, i32) {
    %c0_i32 = arith.constant 0 : i32
    %c0_i32_0 = arith.constant 0 : i32
    %c0_i32_1 = arith.constant 0 : i32
    return %c0_i32, %c0_i32_0 : i32, i32
  }
  func.func @transform_2(%arg0: i32) -> (i32, i32) {
    %c0_i32 = arith.constant 0 : i32
    %c0_i32_0 = arith.constant 0 : i32
    %c0_i32_1 = arith.constant 0 : i32
    return %c0_i32, %c0_i32_0 : i32, i32
  }
  func.func @transform_3(%arg0: i32) -> (i32, i32, i32) {
    %c0_i32 = arith.constant 0 : i32
    %c0_i32_0 = arith.constant 0 : i32
    %c0_i32_1 = arith.constant 0 : i32
    return %arg0, %c0_i32, %c0_i32_0 : i32, i32, i32
  }
}

</mosaic_0001>

<bundles_post_ra>
// kernel: _lambda_.10
= control target key start
LH: loop header
LB: loop body
LE: loop exit
PB: predicated region body
PF: predicated region fallthrough
CT: control target
= control target key end

     0   :  { %s1278_s12 = smov 0   ;;  %s1424_s0 = inlined_call_operand.vmem [shape: bf16[2,34,34,3], index: 0, kind: input, shape index: {}]   ;;  %s1425_s1 = inlined_call_operand.vmem [shape: bf16[9,3,8], index: 1, kind: input, shape index: {}]   ;;  %s1426_s2 = inlined_call_operand.vmem [shape: f32[1,8], index: 2, kind: input, shape index: {}]   ;;  %s1427_s3 = inlined_call_operand.vmem [shape: bf16[2,32,32,8], index: 3, kind: output, shape index: {}]  }
   0x1 LB: > { %s1039_s13 = sadd.s32 4294967295, %s1251_s12   ;;  %p1043_p0 = scmp.ge.s32.totalorder %s1251_s12, 1  ;;  %s1251_s12 = sphi %s1278_s12, %s13_s12  }
   0x2   : > { %p137_p1 = scmp.lt.s32.totalorder %s1251_s12, 3 }
   0x4   : > { %p138_p2 = pnand %p1043_p0, %p137_p1 }
   0x5   : > { %p161_p3 = scmp.lt.s32.totalorder (!%p138_p2), %s1039_s13, 1  ;;  %s1301_s24 = smov (!%p138_p2), 0  }
   0x6   : > { %141 = sbr.rel (%p138_p2) target bundleno = 269 (0x10d), region = 32 }
   0xb   : > { %v1289_v0 = vld [vmem:[%s1426_s2] ss:$0 sm:$0xff]  ;;  %s1429_s13 = smov (!%p161_p3, %s1039_s13), 1 }
   0xc   : > { %s1207_s16 = smul.u32 680, %s1429_s13  ;;  %s1119_s17 = sshll.u32 %s1429_s13, 9 }
   0xd   : > { %s1294_s20 = scalar_lea.vmem %s1427_s3, %s1119_s17 }
   0xe   : > { %s1299_s23 = scalar_lea.vmem %s1424_s0, %s1207_s16 }
   0xf LB: >> { %v1048_v1 = vld [vmem:[%s1425_s1 + $0x2] sm:$0x3]  ;;  %vm231_vm0 = vcmask 1040384   ;;  %vm232_vm1 = vcmask 1041408   ;;  %v1257_v2 = vmov 65535   ;;  %s1120_s29 = smul.u32 20, %s1255_s24  ;;  %s1255_s24 = sphi %s1301_s24, %s178_s24  }
  0x10   : >> { %v233_v3 = vsel %vm231_vm0, 4294967295, %v1257_v2  ;;  %v186_v4 = vld [vmem:[%s1425_s1] sm:$0x3]  ;;  %v1056_v6 = vld [vmem:[%s1425_s1 + $0x4] sm:$0x3]  ;;  %vm224_vm3 = vcmask 23552  }
  0x11   : >> { %v1312_v5 = vsel %vm232_vm1, %v233_v3, 0  ;;  %v1064_v7 = vld [vmem:[%s1425_s1 + $0x6] sm:$0x3]  ;;  %s1326_s7 = scalar_lea.vmem %s1299_s23, %s1120_s29  ;;  %vm203_vm2 = vsmask.f32 7424  ;;  %vm349_vm4 = vcmask 1046528  }
  0x12   : >> { %v236_v8 = vand.u32 %v1048_v1, %v1312_v5  ;;  %v292_v9 = vand.u32 %v1312_v5, %v186_v4  ;;  %v362_v10 = vand.u32 %v1056_v6, %v1312_v5  ;;  %v444_v11 = vand.u32 %v1064_v7, %v1312_v5  ;;  %v1081_v12 = vld [vmem:[%s1425_s1 + $0xa] sm:$0x3]  ;;  %v182_v13 = vld [vmem:[%s1326_s7] sm:$0xf]  ;;  %v183_v14 = vld [vmem:[%s1326_s7 + $0x4] sm:$0xf] }
  0x13   : >> { %v1049_v15 = vcombine.low %v182_v13, %v183_v14  ;;  %v1334_v16 = vld [vmem:[%s1326_s7 + $0x8] sm:$0xff]   ;;  %v1337_v17 = vld [vmem:[%s1326_s7 + $0x10] ss:$0 sps:$4 sm:$0x11]   ;;  %v343_v18 = vld [vmem:[%s1326_s7] sm:$0xe]  ;;  %v619_v20 = vand.u32 %v1081_v12, %v1312_v5 }
  0x14   : >> { %1153 = vmatprep.subr.bf16.mxu0 %v236_v8  ;;  %1159 = vmatprep.subr.bf16.mxu1 %v292_v9  ;;  %v1229_v19 = vld [vmem:[%s1326_s7 + $0x14] sm:$0xff]   ;;  %v212_v23 = vshll.u32 %v1334_v16, 16  ;;  %v216_v24 = vshrl.u32 %v1334_v16, 16  ;;  %v220_v25 = vshll.u32 %v1337_v17, 16  ;;  %v1057_v26 = vcombine.low %v343_v18, %v183_v14  ;;  %v1074_v28 = vld [vmem:[%s1425_s1 + $0x8] sm:$0x3] }
  0x15   : >> { %1154 = vmatpush3.bf16.msra.mxu0 %v236_v8  ;;  %1160 = vmatpush3.bf16.msra.mxu1 %v292_v9  ;;  %v205_v21 = vshrl.u32 %v1049_v15, 16  ;;  %v207_v22 = vshll.u32 %v1049_v15, 16  ;;  %v351_v27 = vrot.slane %v1334_v16, 1  ;;  %v1069_v33 = vld [vmem:[%s1326_s7 + $0x14] sm:$0xf]  ;;  %v1232_v39 = vld [vmem:[%s1326_s7 + $0x1c] sm:$0xff]   ;;  %v546_v41 = vand.u32 %v1074_v28, %v1312_v5 }
  0x16   : >> { %1165 = vmatprep.subr.bf16.mxu0 %v362_v10  ;;  %1171 = vmatprep.subr.bf16.mxu1 %v444_v11  ;;  %v214_v30 = vrot.slane %v212_v23, 1  ;;  %v222_v31 = vrot.slane %v220_v25, 1  ;;  %v350_v32 = vrot.slane %v1057_v26, 1  ;;  %v1070_v34 = vld [vmem:[%s1326_s7 + $0x18] sm:$0xf]  ;;  %v1230_v45 = vld [vmem:[%s1326_s7 + $0x1c] sm:$0xff]  }
  0x17   : >> { %1161 = vmatprep.mubr.msk.bf16.mxu1 %vm224_vm3, %v1049_v15  ;;  %v209_v29 = vrot.slane %v207_v22, 1  ;;  %v1099_v35 = vld [vmem:[%s1425_s1 + $0xe] sm:$0x3]  ;;  %v1075_v38 = vcombine.low %v1069_v33, %v1070_v34  ;;  %v1080_v42 = vld [vmem:[%s1326_s7 + $0x14] sm:$0xe]  ;;  %v527_v48 = vshll.u32 %v1232_v39, 16 }
  0x18   : >> { %1162 = vmatmul.mubr.msk.bf16.vlgmr.msra.gmra.mxu1 %vm224_vm3, %v1334_v16  ;;  %v218_v37 = vor.u32 %v216_v24, %v214_v30  ;;  %v352_v40 = vsel %vm349_vm4, %v350_v32, %v351_v27  ;;  %v1082_v49 = vcombine.low %v1080_v42, %v1070_v34  ;;  %v608_v50 = vrot.slane %v1232_v39, 1  ;;  %v1367_v51 = vld [vmem:[%s1326_s7 + $0x30] sm:$0xff]   ;;  %v1234_v53 = vld [vmem:[%s1326_s7 + $0x24] ss:$0 sps:$4 sm:$0x11]   ;;  %v1235_v26 = vld [vmem:[%s1326_s7 + $0x28] sm:$0xff]  }
  0x19   : >> { %1172 = vmatpush3.bf16.msra.mxu1 %v444_v11  ;;  %1173 = vmatprep.mubr.msk.bf16.mxu1 %vm224_vm3, %v1229_v19  ;;  %v210_v36 = vor.u32 %v209_v29, %v205_v21  ;;  %v520_v46 = vshrl.u32 %v1075_v38, 16  ;;  %v522_v47 = vshll.u32 %v1075_v38, 16  ;;  %v803_v54 = vand.u32 %v1099_v35, %v1312_v5  ;;  %v1094_v55 = vld [vmem:[%s1326_s7 + $0x28] sm:$0xf]  ;;  %v1089_v58 = vld [vmem:[%s1425_s1 + $0xc] sm:$0x3] }
  0x1a   : >> { %1183 = vmatprep.subr.bf16.mxu1 %v619_v20  ;;  %v223_v44 = vsel %vm203_vm2, %v218_v37, %v222_v31  ;;  %v353_v56 = vrot.slane %v1337_v17, 1  ;;  %v607_v57 = vrot.slane %v1082_v49, 1  ;;  %v1095_v59 = vld [vmem:[%s1326_s7 + $0x2c] sm:$0xf]  ;;  %v529_v61 = vrot.slane %v527_v48, 1  ;;  %v1238_v32 = vld [vmem:[%s1326_s7 + $0x30] sm:$0xff]  }
  0x1b   : >> { %v215_v43 = vsel %vm203_vm2, %v210_v36, %v214_v30  ;;  %v524_v52 = vrot.slane %v522_v47, 1  ;;  %v1100_v62 = vcombine.low %v1094_v55, %v1095_v59  ;;  %v610_v1 = vrot.slane %v1234_v53, 1  ;;  %v1239_v6 = vld [vmem:[%s1326_s7 + $0x38] ss:$0 sps:$4 sm:$0x11]   ;;  %s1125_s19 = sshll.u32 %s1255_s24, 4 }
  0x1c   : >> { %1155 = vmatprep.mubr.msk.bf16.mxu0 %vm224_vm3, %v215_v43  ;;  %v609_v63 = vsel %vm349_vm4, %v607_v57, %v608_v50  ;;  %v784_v2 = vshll.u32 %v1367_v51, 16  ;;  %v354_v7 = vsel %vm349_vm4, %v351_v27, %v353_v56  ;;  %v531_v8 = vshrl.u32 %v1232_v39, 16  ;;  %v1106_v22 = vld [vmem:[%s1425_s1 + $0x10] sm:$0x3]  ;;  %v1105_v24 = vld [vmem:[%s1326_s7 + $0x28] sm:$0xe]  ;;  %s963_s21 = scalar_lea.vmem %s1294_s20, %s1125_s19 }
  0x1d   : >> { %1156 = vmatmul.mubr.msk.bf16.vlgmr.msra.gmra.mxu0 %vm224_vm3, %v223_v44  ;;  %v525_v60 = vor.u32 %v524_v52, %v520_v46  ;;  %v777_v3 = vshrl.u32 %v1100_v62, 16  ;;  %v779_v4 = vshll.u32 %v1100_v62, 16  ;;  %v535_v9 = vshll.u32 %v1234_v53, 16  ;;  %s178_s24 = sadd.s32 1, %s1255_s24  }
  0x1e   : >> { %1166 = vmatpush3.bf16.msra.mxu0 %v362_v10  ;;  %1167 = vmatprep.mubr.msk.bf16.mxu0 %vm224_vm3, %v352_v40  ;;  %v701_v11 = vand.u32 %v1089_v58, %v1312_v5  ;;  %v786_v13 = vrot.slane %v784_v2, 1  ;;  %v611_v14 = vsel %vm349_vm4, %v608_v50, %v610_v1  ;;  %v788_v15 = vshrl.u32 %v1367_v51, 16  ;;  %p175_p4 = scmp.ge.s32.totalorder %s178_s24, 32  }
  0x1f   : >> { %1177 = vmatprep.subr.bf16.mxu0 %v546_v41  ;;  %v530_v10 = vsel %vm203_vm2, %v525_v60, %v529_v61  ;;  %v781_v12 = vrot.slane %v779_v4, 1  ;;  %v792_v16 = vshll.u32 %v1239_v6, 16  ;;  %v533_v18 = vor.u32 %v531_v8, %v529_v61 }
  0x20   : >> { %1174 = vmatmul.mubr.msk.bf16.vlgmr.msra.gmra.mxu1 %vm224_vm3, %v1230_v45  ;;  %v537_v19 = vrot.slane %v535_v9, 1  ;;  %v790_v21 = vor.u32 %v788_v15, %v786_v13  ;;  %v876_v27 = vand.u32 %v1106_v22, %v1312_v5  ;;  %v1107_v28 = vcombine.low %v1105_v24, %v1095_v59 }
  0x21   : >> { %1184 = vmatpush3.bf16.msra.mxu1 %v619_v20  ;;  %1185 = vmatprep.mubr.msk.bf16.mxu1 %vm224_vm3, %v609_v63  ;;  %v782_v17 = vor.u32 %v781_v12, %v777_v3  ;;  %v794_v23 = vrot.slane %v792_v16, 1  ;;  %v865_v31 = vrot.slane %v1367_v51, 1  ;;  %v867_v5 = vrot.slane %v1239_v6, 1 }
  0x22   : >> { %1195 = vmatprep.subr.bf16.mxu1 %v803_v54  ;;  %v538_v25 = vsel %vm203_vm2, %v533_v18, %v537_v19  ;;  %v864_v30 = vrot.slane %v1107_v28, 1  ;;  %vm964_vm5 = vcmask 60416  }
  0x23   : >> { %v787_v20 = vsel %vm203_vm2, %v782_v17, %v786_v13  ;;  %v795_v29 = vsel %vm203_vm2, %v790_v21, %v794_v23  ;;  %v868_v34 = vsel %vm349_vm4, %v865_v31, %v867_v5 }
  0x24   : >> { %v866_v33 = vsel %vm349_vm4, %v864_v30, %v865_v31 }
  0x25   : >> { %1168 = vmatmul.mubr.msk.bf16.vlgmr.msra.gmra.mxu0 %vm224_vm3, %v354_v7 }
  0x26   : >> { %1178 = vmatpush3.bf16.msra.mxu0 %v546_v41  ;;  %1179 = vmatprep.mubr.msk.bf16.mxu0 %vm224_vm3, %v530_v10 }
  0x27   : >> { %1189 = vmatprep.subr.bf16.mxu0 %v701_v11 }
  0x28   : >> { %1186 = vmatmul.mubr.msk.bf16.vlgmr.msra.gmra.mxu1 %vm224_vm3, %v611_v14 }
  0x29   : >> { %1196 = vmatpush3.bf16.msra.mxu1 %v803_v54  ;;  %1197 = vmatprep.mubr.msk.bf16.mxu1 %vm224_vm3, %v787_v20 }
  0x2d   : >> { %1180 = vmatmul.mubr.msk.bf16.vlgmr.msra.gmra.mxu0 %vm224_vm3, %v538_v25 }
  0x2e   : >> { %1190 = vmatpush3.bf16.msra.mxu0 %v701_v11  ;;  %1191 = vmatprep.mubr.msk.bf16.mxu0 %vm224_vm3, %v1235_v26 }
  0x2f   : >> { %1201 = vmatprep.subr.bf16.mxu0 %v876_v27 }
  0x30   : >> { %1198 = vmatmul.mubr.msk.bf16.vlgmr.msra.gmra.mxu1 %vm224_vm3, %v795_v29 }
  0x35   : >> { %1192 = vmatmul.mubr.msk.bf16.vlgmr.msra.gmra.mxu0 %vm224_vm3, %v1238_v32 }
  0x36   : >> { %1202 = vmatpush3.bf16.msra.mxu0 %v876_v27  ;;  %1203 = vmatprep.mubr.msk.bf16.mxu0 %vm224_vm3, %v866_v33 }
  0x3d   : >> { %1204 = vmatmul.mubr.msk.bf16.vlgmr.msra.gmra.mxu0 %vm224_vm3, %v868_v34 }
  0xd8   : >> { %v1163_v35 = vpop.f32.mrf.mxu1 }
  0xda   : >> { %v328_v36 = vpop.f32.mrf.mxu1 }
  0xdc   : >> { %v1164_v37 = vpop.f32.mrf.mxu1 }
  0xdd   : >> { %v1157_v39 = vpop.f32.mrf.mxu0 }
  0xde   : >> { %v331_v38 = vpop.f32.mrf.mxu1  ;;  %v337_v52 = vadd.f32 %v1163_v35, %v1157_v39 }
  0xdf   : >> { %v272_v40 = vpop.f32.mrf.mxu0 }
  0xe0   : >> { %v1175_v41 = vpop.f32.mrf.mxu1  ;;  %v329_v54 = vadd.f32 %v328_v36, %v272_v40 }
  0xe1   : >> { %v1158_v42 = vpop.f32.mrf.mxu0 }
  0xe2   : >> { %v480_v43 = vpop.f32.mrf.mxu1  ;;  %v340_v58 = vadd.f32 %v1164_v37, %v1158_v42 }
  0xe3   : >> { %v275_v44 = vpop.f32.mrf.mxu0 }
  0xe4   : >> { %v1176_v45 = vpop.f32.mrf.mxu1  ;;  %v332_v61 = vadd.f32 %v331_v38, %v275_v44 }
  0xe5   : >> { %v1169_v46 = vpop.f32.mrf.mxu0 }
  0xe6   : >> { %v483_v47 = vpop.f32.mrf.mxu1  ;;  %v415_v55 = vadd.f32 %v1169_v46, %v337_v52 }
  0xe7   : >> { %v398_v48 = vpop.f32.mrf.mxu0 }
  0xe8   : >> { %v1187_v49 = vpop.f32.mrf.mxu1  ;;  %v413_v59 = vadd.f32 %v398_v48, %v329_v54  ;;  %v497_v62 = vadd.f32 %v1175_v41, %v415_v55 }
  0xe9   : >> { %v1170_v50 = vpop.f32.mrf.mxu0 }
  0xea   : >> { %v655_v51 = vpop.f32.mrf.mxu1  ;;  %v416_v63 = vadd.f32 %v1170_v50, %v340_v58  ;;  %v495_v3 = vadd.f32 %v480_v43, %v413_v59 }
  0xeb   : >> { %v401_v53 = vpop.f32.mrf.mxu0 }
  0xec   : >> { %v1188_v57 = vpop.f32.mrf.mxu1  ;;  %v414_v4 = vadd.f32 %v401_v53, %v332_v61  ;;  %v498_v8 = vadd.f32 %v1176_v45, %v416_v63 }
  0xed   : >> { %v1181_v56 = vpop.f32.mrf.mxu0 }
  0xee   : >> { %v658_v2 = vpop.f32.mrf.mxu1  ;;  %v599_v6 = vadd.f32 %v1181_v56, %v497_v62  ;;  %v496_v12 = vadd.f32 %v483_v47, %v414_v4 }
  0xef   : >> { %v582_v60 = vpop.f32.mrf.mxu0 }
  0xf0   : >> { %v597_v9 = vadd.f32 %v582_v60, %v495_v3  ;;  %v1199_v11 = vpop.f32.mrf.mxu1  ;;  %v672_v13 = vadd.f32 %v1187_v49, %v599_v6 }
  0xf1   : >> { %v1182_v1 = vpop.f32.mrf.mxu0 }
  0xf2   : >> { %v600_v14 = vadd.f32 %v1182_v1, %v498_v8  ;;  %v670_v16 = vadd.f32 %v655_v51, %v597_v9  ;;  %v839_v19 = vpop.f32.mrf.mxu1 }
  0xf3   : >> { %v585_v7 = vpop.f32.mrf.mxu0 }
  0xf4   : >> { %v598_v17 = vadd.f32 %v585_v7, %v496_v12  ;;  %v673_v21 = vadd.f32 %v1188_v57, %v600_v14  ;;  %v1200_v27 = vpop.f32.mrf.mxu1 }
  0xf5   : >> { %v1193_v10 = vpop.f32.mrf.mxu0 }
  0xf6   : >> { %v754_v18 = vadd.f32 %v1193_v10, %v672_v13  ;;  %v671_v24 = vadd.f32 %v658_v2, %v598_v17  ;;  %v842_v35 = vpop.f32.mrf.mxu1 }
  0xf7   : >> { %v737_v15 = vpop.f32.mrf.mxu0 }
  0xf8   : >> { %v752_v22 = vadd.f32 %v737_v15, %v670_v16  ;;  %v856_v25 = vadd.f32 %v1199_v11, %v754_v18 }
  0xf9   : >> { %v1194_v20 = vpop.f32.mrf.mxu0 }
  0xfa   : >> { %v755_v26 = vadd.f32 %v1194_v20, %v673_v21  ;;  %v854_v29 = vadd.f32 %v839_v19, %v752_v22 }
  0xfb   : >> { %v740_v23 = vpop.f32.mrf.mxu0 }
  0xfc   : >> { %v753_v30 = vadd.f32 %v740_v23, %v671_v24  ;;  %v857_v33 = vadd.f32 %v1200_v27, %v755_v26 }
  0xfd   : >> { %v1205_v28 = vpop.f32.mrf.mxu0 }
  0xfe   : >> { %v929_v31 = vadd.f32 %v1205_v28, %v856_v25  ;;  %v855_v37 = vadd.f32 %v842_v35, %v753_v30 }
  0xff   : >> { %v912_v32 = vpop.f32.mrf.mxu0 }
 0x100   : >> { %v939_v5 = vadd.f32 %v1289_v0, %v929_v31  ;;  %v927_v34 = vadd.f32 %v912_v32, %v854_v29 }
 0x101   : >> { %v1206_v36 = vpop.f32.mrf.mxu0 }
 0x102   : >> { %v943_v38 = vmax.f32 %v939_v5, 0.0  ;;  %v937_v39 = vadd.f32 %v1289_v0, %v927_v34  ;;  %v930_v40 = vadd.f32 %v1206_v36, %v857_v33 }
 0x103   : >> { %v915_v41 = vpop.f32.mrf.mxu0 }
 0x104   : >> { %v1123_v42 = vpack.c.bf16 %v943_v38, %v943_v38  ;;  %v941_v43 = vmax.f32 %v937_v39, 0.0  ;;  %v940_v44 = vadd.f32 %v1289_v0, %v930_v40  ;;  %v928_v45 = vadd.f32 %v915_v41, %v855_v37 }
 0x106   : >> { %967 = vst.msk [vmem:[%s963_s21 + $0x8] sm:$0xf] %vm964_vm5, %v1123_v42  ;;  %v1121_v46 = vpack.c.bf16 %v941_v43, %v941_v43  ;;  %v944_v47 = vmax.f32 %v940_v44, 0.0  ;;  %v938_v48 = vadd.f32 %v1289_v0, %v928_v45 }
 0x108   : >> { %965 = vst.msk [vmem:[%s963_s21] sm:$0xf] %vm964_vm5, %v1121_v46  ;;  %v1124_v49 = vpack.c.bf16 %v944_v47, %v944_v47  ;;  %v942_v50 = vmax.f32 %v938_v48, 0.0  ;;  %177 = sbr.rel (!%p175_p4) target bundleno = 15 (0xf), region = 81 }
 0x10a   : >> { %968 = vst.msk [vmem:[%s963_s21 + $0xc] sm:$0xf] %vm964_vm5, %v1124_v49  ;;  %v1122_v51 = vpack.c.bf16 %v942_v50, %v942_v50 }
 0x10c   : >> { %966 = vst.msk [vmem:[%s963_s21 + $0x4] sm:$0xf] %vm964_vm5, %v1122_v51 }
 0x10d PF: > { %s13_s12 = sadd.s32 1, %s1251_s12  }
 0x10e   : > { %p10_p5 = scmp.ge.s32.totalorder %s13_s12, 4  }
 0x110   :  { %12 = sbr.rel (!%p10_p5) target bundleno = 1 (0x1), region = 92 }

// kernel: _lambda_.11
= control target key start
LH: loop header
LB: loop body
LE: loop exit
PB: predicated region body
PF: predicated region fallthrough
CT: control target
= control target key end

     0   :  { %s1282_s12 = smov 0   ;;  %s1435_s0 = inlined_call_operand.vmem [shape: bf16[2,34,34,8], index: 0, kind: input, shape index: {}]   ;;  %s1436_s1 = inlined_call_operand.vmem [shape: bf16[9,8,8], index: 1, kind: input, shape index: {}]   ;;  %s1437_s2 = inlined_call_operand.vmem [shape: f32[1,8], index: 2, kind: input, shape index: {}]   ;;  %s1438_s3 = inlined_call_operand.vmem [shape: bf16[2,32,32,8], index: 3, kind: output, shape index: {}]  }
   0x1 LB: > { %s1036_s13 = sadd.s32 4294967295, %s1256_s12   ;;  %p1040_p0 = scmp.ge.s32.totalorder %s1256_s12, 1  ;;  %s1256_s12 = sphi %s1282_s12, %s13_s12  }
   0x2   : > { %p137_p1 = scmp.lt.s32.totalorder %s1256_s12, 3 }
   0x4   : > { %p138_p2 = pnand %p1040_p0, %p137_p1 }
   0x5   : > { %p161_p3 = scmp.lt.s32.totalorder (!%p138_p2), %s1036_s13, 1  ;;  %s1305_s24 = smov (!%p138_p2), 0  }
   0x6   : > { %141 = sbr.rel (%p138_p2) target bundleno = 269 (0x10d), region = 32 }
   0xb   : > { %v1293_v0 = vld [vmem:[%s1437_s2] ss:$0 sm:$0xff]  ;;  %s1440_s13 = smov (!%p161_p3, %s1036_s13), 1 }
   0xc   : > { %s1213_s16 = smul.u32 680, %s1440_s13  ;;  %s1116_s17 = sshll.u32 %s1440_s13, 9 }
   0xd   : > { %s1298_s20 = scalar_lea.vmem %s1438_s3, %s1116_s17 }
   0xe   : > { %s1303_s23 = scalar_lea.vmem %s1435_s0, %s1213_s16 }
   0xf LB: >> { %v1045_v1 = vld [vmem:[%s1436_s1 + $0x4] sm:$0xf]  ;;  %vm231_vm0 = vcmask 1043456   ;;  %v186_v2 = vld [vmem:[%s1436_s1] sm:$0xf]  ;;  %s1117_s4 = smul.u32 20, %s1260_s24  ;;  %s1260_s24 = sphi %s1305_s24, %s178_s24  }
  0x10   : >> { %1204 = vmatprep.subr.msk.bf16.mxu0 %vm231_vm0, %v1045_v1  ;;  %v233_v3 = vsel %vm231_vm0, %v1045_v1, 0  ;;  %1205 = vmatprep.subr.msk.bf16.mxu1 %vm231_vm0, %v186_v2  ;;  %v289_v4 = vsel %vm231_vm0, %v186_v2, 0  ;;  %v1053_v5 = vld [vmem:[%s1436_s1 + $0x8] sm:$0xf]  ;;  %v1061_v6 = vld [vmem:[%s1436_s1 + $0xc] sm:$0xf] }
  0x11   : >> { %1151 = vmatpush3.bf16.msra.mxu0 %v233_v3  ;;  %1157 = vmatpush3.bf16.msra.mxu1 %v289_v4  ;;  %s1330_s7 = scalar_lea.vmem %s1303_s23, %s1117_s4  ;;  %vm203_vm1 = vsmask.f32 7424  ;;  %vm224_vm2 = vcmask 64512   ;;  %v441_v11 = vsel %vm231_vm0, %v1061_v6, 0  ;;  %v1078_v12 = vld [vmem:[%s1436_s1 + $0x14] sm:$0xf] }
  0x12   : >> { %1206 = vmatprep.subr.msk.bf16.mxu0 %vm231_vm0, %v1053_v5  ;;  %1207 = vmatprep.subr.msk.bf16.mxu1 %vm231_vm0, %v1061_v6  ;;  %v182_v7 = vld [vmem:[%s1330_s7] sm:$0xf]  ;;  %v183_v8 = vld [vmem:[%s1330_s7 + $0x4] sm:$0xf]  ;;  %v1335_v10 = vld [vmem:[%s1330_s7 + $0x8] sm:$0xff]   ;;  %vm346_vm3 = vcmask 1046528  }
  0x13   : >> { %v1046_v9 = vcombine.low %v182_v7, %v183_v8  ;;  %v1342_v13 = vld [vmem:[%s1330_s7 + $0x10] ss:$0 sps:$4 sm:$0x11]   ;;  %v340_v14 = vld [vmem:[%s1330_s7] sm:$0xe]  ;;  %v1234_v15 = vld [vmem:[%s1330_s7 + $0x14] sm:$0xff]  }
  0x14   : >> { %v212_v18 = vshll.u32 %v1335_v10, 16  ;;  %v216_v19 = vshrl.u32 %v1335_v10, 16  ;;  %v220_v20 = vshll.u32 %v1342_v13, 16  ;;  %v1054_v21 = vcombine.low %v340_v14, %v183_v8  ;;  %v1066_v27 = vld [vmem:[%s1330_s7 + $0x14] sm:$0xf]  ;;  %v1237_v33 = vld [vmem:[%s1330_s7 + $0x1c] sm:$0xff]  }
  0x15   : >> { %v205_v16 = vshrl.u32 %v1046_v9, 16  ;;  %v207_v17 = vshll.u32 %v1046_v9, 16  ;;  %1158 = vmatprep.mubr.msk.bf16.mxu1 %vm224_vm2, %v1046_v9  ;;  %v348_v22 = vrot.slane %v1335_v10, 1  ;;  %v1067_v28 = vld [vmem:[%s1330_s7 + $0x18] sm:$0xf]  ;;  %v359_v31 = vsel %vm231_vm0, %v1053_v5, 0 }
  0x16   : >> { %1159 = vmatmul.mubr.msk.bf16.vlgmr.msra.gmra.mxu1 %vm224_vm2, %v1335_v10  ;;  %v214_v24 = vrot.slane %v212_v18, 1  ;;  %v222_v25 = vrot.slane %v220_v20, 1  ;;  %v347_v26 = vrot.slane %v1054_v21, 1  ;;  %v1072_v32 = vcombine.low %v1066_v27, %v1067_v28  ;;  %v1077_v35 = vld [vmem:[%s1330_s7 + $0x14] sm:$0xe]  ;;  %v1235_v39 = vld [vmem:[%s1330_s7 + $0x1c] sm:$0xff]  }
  0x17   : >> { %v209_v23 = vrot.slane %v207_v17, 1  ;;  %1169 = vmatpush3.bf16.msra.mxu1 %v441_v11  ;;  %1170 = vmatprep.mubr.msk.bf16.mxu1 %vm224_vm2, %v1234_v15  ;;  %v1071_v38 = vld [vmem:[%s1436_s1 + $0x10] sm:$0xf]  ;;  %v616_v42 = vsel %vm231_vm0, %v1078_v12, 0  ;;  %v524_v43 = vshll.u32 %v1237_v33, 16  ;;  %v1079_v44 = vcombine.low %v1077_v35, %v1067_v28  ;;  %v1240_v20 = vld [vmem:[%s1330_s7 + $0x28] sm:$0xff]  }
  0x18   : >> { %1209 = vmatprep.subr.msk.bf16.mxu1 %vm231_vm0, %v1078_v12  ;;  %v218_v30 = vor.u32 %v216_v19, %v214_v24  ;;  %v349_v34 = vsel %vm346_vm3, %v347_v26, %v348_v22  ;;  %v517_v40 = vshrl.u32 %v1072_v32, 16  ;;  %v519_v41 = vshll.u32 %v1072_v32, 16  ;;  %v1096_v46 = vld [vmem:[%s1436_s1 + $0x1c] sm:$0xf]  ;;  %v1373_v47 = vld [vmem:[%s1330_s7 + $0x30] sm:$0xff]   ;;  %s1122_s19 = sshll.u32 %s1260_s24, 4 }
  0x19   : >> { %v210_v29 = vor.u32 %v209_v23, %v205_v16  ;;  %v605_v45 = vrot.slane %v1237_v33, 1  ;;  %v1239_v49 = vld [vmem:[%s1330_s7 + $0x24] ss:$0 sps:$4 sm:$0x11]   ;;  %v1091_v50 = vld [vmem:[%s1330_s7 + $0x28] sm:$0xf]  ;;  %s960_s21 = scalar_lea.vmem %s1298_s20, %s1122_s19 }
  0x1a   : >> { %v223_v37 = vsel %vm203_vm1, %v218_v30, %v222_v25  ;;  %v521_v48 = vrot.slane %v519_v41, 1  ;;  %v350_v51 = vrot.slane %v1342_v13, 1  ;;  %v604_v52 = vrot.slane %v1079_v44, 1  ;;  %v1092_v53 = vld [vmem:[%s1330_s7 + $0x2c] sm:$0xf]  ;;  %v1243_v27 = vld [vmem:[%s1330_s7 + $0x30] sm:$0xff]  }
  0x1b   : >> { %v215_v36 = vsel %vm203_vm1, %v210_v29, %v214_v24  ;;  %v526_v55 = vrot.slane %v524_v43, 1  ;;  %v1097_v56 = vcombine.low %v1091_v50, %v1092_v53  ;;  %v607_v58 = vrot.slane %v1239_v49, 1  ;;  %v1244_v2 = vld [vmem:[%s1330_s7 + $0x38] ss:$0 sps:$4 sm:$0x11]   ;;  %s178_s24 = sadd.s32 1, %s1260_s24  }
  0x1c   : >> { %1152 = vmatprep.mubr.msk.bf16.mxu0 %vm224_vm2, %v215_v36  ;;  %v522_v54 = vor.u32 %v521_v48, %v517_v40  ;;  %v606_v57 = vsel %vm346_vm3, %v604_v52, %v605_v45  ;;  %v781_v59 = vshll.u32 %v1373_v47, 16  ;;  %v351_v62 = vsel %vm346_vm3, %v348_v22, %v350_v51  ;;  %v1086_v7 = vld [vmem:[%s1436_s1 + $0x18] sm:$0xf]  ;;  %v1102_v18 = vld [vmem:[%s1330_s7 + $0x28] sm:$0xe]  ;;  %p175_p4 = scmp.ge.s32.totalorder %s178_s24, 32  }
  0x1d   : >> { %1153 = vmatmul.mubr.msk.bf16.vlgmr.msra.gmra.mxu0 %vm224_vm2, %v223_v37  ;;  %v774_v60 = vshrl.u32 %v1097_v56, 16  ;;  %v776_v61 = vshll.u32 %v1097_v56, 16  ;;  %v528_v63 = vshrl.u32 %v1237_v33, 16  ;;  %v532_v1 = vshll.u32 %v1239_v49, 16  ;;  %v1103_v23 = vld [vmem:[%s1436_s1 + $0x20] sm:$0xf] }
  0x1e   : >> { %1163 = vmatpush3.bf16.msra.mxu0 %v359_v31  ;;  %1164 = vmatprep.mubr.msk.bf16.mxu0 %vm224_vm2, %v349_v34  ;;  %v543_v3 = vsel %vm231_vm0, %v1071_v38, 0  ;;  %v527_v4 = vsel %vm203_vm1, %v522_v54, %v526_v55  ;;  %v783_v6 = vrot.slane %v781_v59, 1  ;;  %v608_v8 = vsel %vm346_vm3, %v605_v45, %v607_v58 }
  0x1f   : >> { %1208 = vmatprep.subr.msk.bf16.mxu0 %vm231_vm0, %v1071_v38  ;;  %1171 = vmatmul.mubr.msk.bf16.vlgmr.msra.gmra.mxu1 %vm224_vm2, %v1235_v39  ;;  %v778_v5 = vrot.slane %v776_v61, 1  ;;  %v785_v9 = vshrl.u32 %v1373_v47, 16  ;;  %v789_v10 = vshll.u32 %v1244_v2, 16  ;;  %v800_v11 = vsel %vm231_vm0, %v1096_v46, 0 }
  0x20   : >> { %1181 = vmatpush3.bf16.msra.mxu1 %v616_v42  ;;  %1182 = vmatprep.mubr.msk.bf16.mxu1 %vm224_vm2, %v606_v57  ;;  %v530_v13 = vor.u32 %v528_v63, %v526_v55  ;;  %v534_v14 = vrot.slane %v532_v1, 1  ;;  %v698_v21 = vsel %vm231_vm0, %v1086_v7, 0  ;;  %v1104_v22 = vcombine.low %v1102_v18, %v1092_v53 }
  0x21   : >> { %1211 = vmatprep.subr.msk.bf16.mxu1 %vm231_vm0, %v1096_v46  ;;  %v779_v12 = vor.u32 %v778_v5, %v774_v60  ;;  %v787_v16 = vor.u32 %v785_v9, %v783_v6  ;;  %v791_v17 = vrot.slane %v789_v10, 1  ;;  %v862_v26 = vrot.slane %v1373_v47, 1 }
  0x22   : >> { %v535_v19 = vsel %vm203_vm1, %v530_v13, %v534_v14  ;;  %v861_v25 = vrot.slane %v1104_v22, 1  ;;  %v873_v28 = vsel %vm231_vm0, %v1103_v23, 0  ;;  %v864_v30 = vrot.slane %v1244_v2, 1 }
  0x23   : >> { %v784_v15 = vsel %vm203_vm1, %v779_v12, %v783_v6  ;;  %v792_v24 = vsel %vm203_vm1, %v787_v16, %v791_v17  ;;  %vm961_vm4 = vcmask 60416  }
  0x24   : >> { %v863_v29 = vsel %vm346_vm3, %v861_v25, %v862_v26  ;;  %v865_v31 = vsel %vm346_vm3, %v862_v26, %v864_v30 }
  0x25   : >> { %1165 = vmatmul.mubr.msk.bf16.vlgmr.msra.gmra.mxu0 %vm224_vm2, %v351_v62 }
  0x26   : >> { %1175 = vmatpush3.bf16.msra.mxu0 %v543_v3  ;;  %1176 = vmatprep.mubr.msk.bf16.mxu0 %vm224_vm2, %v527_v4 }
  0x27   : >> { %1210 = vmatprep.subr.msk.bf16.mxu0 %vm231_vm0, %v1086_v7  ;;  %1183 = vmatmul.mubr.msk.bf16.vlgmr.msra.gmra.mxu1 %vm224_vm2, %v608_v8 }
  0x28   : >> { %1193 = vmatpush3.bf16.msra.mxu1 %v800_v11  ;;  %1194 = vmatprep.mubr.msk.bf16.mxu1 %vm224_vm2, %v784_v15 }
  0x2d   : >> { %1177 = vmatmul.mubr.msk.bf16.vlgmr.msra.gmra.mxu0 %vm224_vm2, %v535_v19 }
  0x2e   : >> { %1187 = vmatpush3.bf16.msra.mxu0 %v698_v21  ;;  %1188 = vmatprep.mubr.msk.bf16.mxu0 %vm224_vm2, %v1240_v20 }
  0x2f   : >> { %1212 = vmatprep.subr.msk.bf16.mxu0 %vm231_vm0, %v1103_v23  ;;  %1195 = vmatmul.mubr.msk.bf16.vlgmr.msra.gmra.mxu1 %vm224_vm2, %v792_v24 }
  0x35   : >> { %1189 = vmatmul.mubr.msk.bf16.vlgmr.msra.gmra.mxu0 %vm224_vm2, %v1243_v27 }
  0x36   : >> { %1199 = vmatpush3.bf16.msra.mxu0 %v873_v28  ;;  %1200 = vmatprep.mubr.msk.bf16.mxu0 %vm224_vm2, %v863_v29 }
  0x3d   : >> { %1201 = vmatmul.mubr.msk.bf16.vlgmr.msra.gmra.mxu0 %vm224_vm2, %v865_v31 }
  0xd6   : >> { %v1160_v32 = vpop.f32.mrf.mxu1 }
  0xd8   : >> { %v325_v33 = vpop.f32.mrf.mxu1 }
  0xda   : >> { %v1161_v34 = vpop.f32.mrf.mxu1 }
  0xdc   : >> { %v328_v35 = vpop.f32.mrf.mxu1 }
  0xdd   : >> { %v1154_v36 = vpop.f32.mrf.mxu0 }
  0xde   : >> { %v334_v49 = vadd.f32 %v1160_v32, %v1154_v36 }
  0xdf   : >> { %v269_v37 = vpop.f32.mrf.mxu0  ;;  %v1172_v38 = vpop.f32.mrf.mxu1 }
  0xe0   : >> { %v326_v51 = vadd.f32 %v325_v33, %v269_v37 }
  0xe1   : >> { %v1155_v39 = vpop.f32.mrf.mxu0  ;;  %v477_v40 = vpop.f32.mrf.mxu1 }
  0xe2   : >> { %v337_v55 = vadd.f32 %v1161_v34, %v1155_v39 }
  0xe3   : >> { %v272_v41 = vpop.f32.mrf.mxu0  ;;  %v1173_v42 = vpop.f32.mrf.mxu1 }
  0xe4   : >> { %v329_v58 = vadd.f32 %v328_v35, %v272_v41 }
  0xe5   : >> { %v1166_v43 = vpop.f32.mrf.mxu0  ;;  %v480_v44 = vpop.f32.mrf.mxu1 }
  0xe6   : >> { %v412_v52 = vadd.f32 %v1166_v43, %v334_v49 }
  0xe7   : >> { %v395_v45 = vpop.f32.mrf.mxu0  ;;  %v1184_v46 = vpop.f32.mrf.mxu1 }
  0xe8   : >> { %v410_v56 = vadd.f32 %v395_v45, %v326_v51  ;;  %v494_v59 = vadd.f32 %v1172_v38, %v412_v52 }
  0xe9   : >> { %v1167_v47 = vpop.f32.mrf.mxu0  ;;  %v652_v48 = vpop.f32.mrf.mxu1 }
  0xea   : >> { %v413_v60 = vadd.f32 %v1167_v47, %v337_v55  ;;  %v492_v63 = vadd.f32 %v477_v40, %v410_v56 }
  0xeb   : >> { %v398_v50 = vpop.f32.mrf.mxu0  ;;  %v1185_v54 = vpop.f32.mrf.mxu1 }
  0xec   : >> { %v411_v1 = vadd.f32 %v398_v50, %v329_v58  ;;  %v495_v4 = vadd.f32 %v1173_v42, %v413_v60 }
  0xed   : >> { %v1178_v53 = vpop.f32.mrf.mxu0  ;;  %v655_v62 = vpop.f32.mrf.mxu1 }
  0xee   : >> { %v596_v2 = vadd.f32 %v1178_v53, %v494_v59  ;;  %v493_v8 = vadd.f32 %v480_v44, %v411_v1 }
  0xef   : >> { %v579_v57 = vpop.f32.mrf.mxu0  ;;  %v1196_v7 = vpop.f32.mrf.mxu1 }
  0xf0   : >> { %v594_v5 = vadd.f32 %v579_v57, %v492_v63  ;;  %v669_v9 = vadd.f32 %v1184_v46, %v596_v2 }
  0xf1   : >> { %v1179_v61 = vpop.f32.mrf.mxu0  ;;  %v836_v15 = vpop.f32.mrf.mxu1 }
  0xf2   : >> { %v597_v10 = vadd.f32 %v1179_v61, %v495_v4  ;;  %v667_v12 = vadd.f32 %v652_v48, %v594_v5 }
  0xf3   : >> { %v582_v3 = vpop.f32.mrf.mxu0  ;;  %v1197_v23 = vpop.f32.mrf.mxu1 }
  0xf4   : >> { %v595_v13 = vadd.f32 %v582_v3, %v493_v8  ;;  %v670_v17 = vadd.f32 %v1185_v54, %v597_v10 }
  0xf5   : >> { %v1190_v6 = vpop.f32.mrf.mxu0  ;;  %v839_v32 = vpop.f32.mrf.mxu1 }
  0xf6   : >> { %v751_v14 = vadd.f32 %v1190_v6, %v669_v9  ;;  %v668_v20 = vadd.f32 %v655_v62, %v595_v13 }
  0xf7   : >> { %v734_v11 = vpop.f32.mrf.mxu0 }
  0xf8   : >> { %v749_v18 = vadd.f32 %v734_v11, %v667_v12  ;;  %v853_v21 = vadd.f32 %v1196_v7, %v751_v14 }
  0xf9   : >> { %v1191_v16 = vpop.f32.mrf.mxu0 }
  0xfa   : >> { %v752_v22 = vadd.f32 %v1191_v16, %v670_v17  ;;  %v851_v25 = vadd.f32 %v836_v15, %v749_v18 }
  0xfb   : >> { %v737_v19 = vpop.f32.mrf.mxu0 }
  0xfc   : >> { %v750_v26 = vadd.f32 %v737_v19, %v668_v20  ;;  %v854_v29 = vadd.f32 %v1197_v23, %v752_v22 }
  0xfd   : >> { %v1202_v24 = vpop.f32.mrf.mxu0 }
  0xfe   : >> { %v926_v27 = vadd.f32 %v1202_v24, %v853_v21  ;;  %v852_v34 = vadd.f32 %v839_v32, %v750_v26 }
  0xff   : >> { %v909_v28 = vpop.f32.mrf.mxu0 }
 0x100   : >> { %v936_v30 = vadd.f32 %v1293_v0, %v926_v27  ;;  %v924_v31 = vadd.f32 %v909_v28, %v851_v25 }
 0x101   : >> { %v1203_v33 = vpop.f32.mrf.mxu0 }
 0x102   : >> { %v940_v35 = vmax.f32 %v936_v30, 0.0  ;;  %v934_v36 = vadd.f32 %v1293_v0, %v924_v31  ;;  %v927_v37 = vadd.f32 %v1203_v33, %v854_v29 }
 0x103   : >> { %v912_v38 = vpop.f32.mrf.mxu0 }
 0x104   : >> { %v1120_v39 = vpack.c.bf16 %v940_v35, %v940_v35  ;;  %v938_v40 = vmax.f32 %v934_v36, 0.0  ;;  %v937_v41 = vadd.f32 %v1293_v0, %v927_v37  ;;  %v925_v42 = vadd.f32 %v912_v38, %v852_v34 }
 0x106   : >> { %964 = vst.msk [vmem:[%s960_s21 + $0x8] sm:$0xf] %vm961_vm4, %v1120_v39  ;;  %v1118_v43 = vpack.c.bf16 %v938_v40, %v938_v40  ;;  %v941_v44 = vmax.f32 %v937_v41, 0.0  ;;  %v935_v45 = vadd.f32 %v1293_v0, %v925_v42 }
 0x108   : >> { %962 = vst.msk [vmem:[%s960_s21] sm:$0xf] %vm961_vm4, %v1118_v43  ;;  %v1121_v46 = vpack.c.bf16 %v941_v44, %v941_v44  ;;  %v939_v47 = vmax.f32 %v935_v45, 0.0  ;;  %177 = sbr.rel (!%p175_p4) target bundleno = 15 (0xf), region = 81 }
 0x10a   : >> { %965 = vst.msk [vmem:[%s960_s21 + $0xc] sm:$0xf] %vm961_vm4, %v1121_v46  ;;  %v1119_v48 = vpack.c.bf16 %v939_v47, %v939_v47 }
 0x10c   : >> { %963 = vst.msk [vmem:[%s960_s21 + $0x4] sm:$0xf] %vm961_vm4, %v1119_v48 }
 0x10d PF: > { %s13_s12 = sadd.s32 1, %s1256_s12  }
 0x10e   : > { %p10_p5 = scmp.ge.s32.totalorder %s13_s12, 4  }
 0x110   :  { %12 = sbr.rel (!%p10_p5) target bundleno = 1 (0x1), region = 92 }

// kernel: _lambda_.12
= control target key start
LH: loop header
LB: loop body
LE: loop exit
PB: predicated region body
PF: predicated region fallthrough
CT: control target
= control target key end

     0   :  { %s1376_s15 = smov 0   ;;  %s1539_s0 = inlined_call_operand.vmem [shape: bf16[2,34,34,8], index: 0, kind: input, shape index: {}]   ;;  %s1540_s1 = inlined_call_operand.vmem [shape: bf16[9,8,8], index: 1, kind: input, shape index: {}]   ;;  %s1541_s2 = inlined_call_operand.vmem [shape: f32[1,8], index: 2, kind: input, shape index: {}]   ;;  %s1542_s3 = inlined_call_operand.vmem [shape: bf16[2,32,32,8], index: 3, kind: input, shape index: {}]   ;;  %s1543_s4 = inlined_call_operand.vmem [shape: bf16[2,32,32,8], index: 4, kind: output, shape index: {}]  }
   0x1 LB: > { %s1111_s16 = sadd.s32 4294967295, %s1345_s15   ;;  %p1115_p0 = scmp.ge.s32.totalorder %s1345_s15, 1  ;;  %s1345_s15 = sphi %s1376_s15, %s14_s15  }
   0x2   : > { %p172_p1 = scmp.lt.s32.totalorder %s1345_s15, 3 }
   0x4   : > { %p173_p2 = pnand %p1115_p0, %p172_p1 }
   0x5   : > { %p203_p3 = scmp.lt.s32.totalorder (!%p173_p2), %s1111_s16, 1  ;;  %s1404_s30 = smov (!%p173_p2), 0  }
   0x6   : > { %176 = sbr.rel (%p173_p2) target bundleno = 271 (0x10f), region = 36 }
   0xb   : > { %v1387_v0 = vld [vmem:[%s1541_s2] ss:$0 sm:$0xff]  ;;  %s1545_s16 = smov (!%p203_p3, %s1111_s16), 1 }
   0xc   : > { %s1302_s19 = smul.u32 680, %s1545_s16  ;;  %s1194_s20 = sshll.u32 %s1545_s16, 9 }
   0xd   : > { %s1392_s23 = scalar_lea.vmem %s1542_s3, %s1194_s20  ;;  %s1397_s26 = scalar_lea.vmem %s1543_s4, %s1194_s20 }
   0xe   : > { %s1402_s29 = scalar_lea.vmem %s1539_s0, %s1302_s19 }
   0xf LB: >> { %v1122_v1 = vld [vmem:[%s1540_s1 + $0x4] sm:$0xf]  ;;  %vm278_vm0 = vcmask 1043456   ;;  %v233_v2 = vld [vmem:[%s1540_s1] sm:$0xf]  ;;  %s1196_s11 = smul.u32 20, %s1349_s30  ;;  %s1349_s30 = sphi %s1404_s30, %s225_s30  }
  0x10   : >> { %1293 = vmatprep.subr.msk.bf16.mxu0 %vm278_vm0, %v1122_v1  ;;  %v280_v3 = vsel %vm278_vm0, %v1122_v1, 0  ;;  %1294 = vmatprep.subr.msk.bf16.mxu1 %vm278_vm0, %v233_v2  ;;  %v336_v4 = vsel %vm278_vm0, %v233_v2, 0  ;;  %v1130_v5 = vld [vmem:[%s1540_s1 + $0x8] sm:$0xf]  ;;  %v1138_v6 = vld [vmem:[%s1540_s1 + $0xc] sm:$0xf] }
  0x11   : >> { %1240 = vmatpush3.bf16.msra.mxu0 %v280_v3  ;;  %1246 = vmatpush3.bf16.msra.mxu1 %v336_v4  ;;  %s1429_s14 = scalar_lea.vmem %s1402_s29, %s1196_s11  ;;  %vm250_vm1 = vsmask.f32 7424  ;;  %vm271_vm2 = vcmask 64512   ;;  %v488_v11 = vsel %vm278_vm0, %v1138_v6, 0  ;;  %v1155_v12 = vld [vmem:[%s1540_s1 + $0x14] sm:$0xf] }
  0x12   : >> { %1295 = vmatprep.subr.msk.bf16.mxu0 %vm278_vm0, %v1130_v5  ;;  %1296 = vmatprep.subr.msk.bf16.mxu1 %vm278_vm0, %v1138_v6  ;;  %v229_v7 = vld [vmem:[%s1429_s14] sm:$0xf]  ;;  %v230_v8 = vld [vmem:[%s1429_s14 + $0x4] sm:$0xf]  ;;  %v1434_v10 = vld [vmem:[%s1429_s14 + $0x8] sm:$0xff]   ;;  %vm393_vm3 = vcmask 1046528  }
  0x13   : >> { %v1123_v9 = vcombine.low %v229_v7, %v230_v8  ;;  %v1441_v13 = vld [vmem:[%s1429_s14 + $0x10] ss:$0 sps:$4 sm:$0x11]   ;;  %v387_v14 = vld [vmem:[%s1429_s14] sm:$0xe]  ;;  %v1323_v15 = vld [vmem:[%s1429_s14 + $0x14] sm:$0xff]  }
  0x14   : >> { %v259_v18 = vshll.u32 %v1434_v10, 16  ;;  %v263_v19 = vshrl.u32 %v1434_v10, 16  ;;  %v267_v20 = vshll.u32 %v1441_v13, 16  ;;  %v1131_v21 = vcombine.low %v387_v14, %v230_v8  ;;  %v1143_v27 = vld [vmem:[%s1429_s14 + $0x14] sm:$0xf]  ;;  %v1326_v33 = vld [vmem:[%s1429_s14 + $0x1c] sm:$0xff]  }
  0x15   : >> { %v252_v16 = vshrl.u32 %v1123_v9, 16  ;;  %v254_v17 = vshll.u32 %v1123_v9, 16  ;;  %1247 = vmatprep.mubr.msk.bf16.mxu1 %vm271_vm2, %v1123_v9  ;;  %v395_v22 = vrot.slane %v1434_v10, 1  ;;  %v1144_v28 = vld [vmem:[%s1429_s14 + $0x18] sm:$0xf]  ;;  %v406_v31 = vsel %vm278_vm0, %v1130_v5, 0 }
  0x16   : >> { %1248 = vmatmul.mubr.msk.bf16.vlgmr.msra.gmra.mxu1 %vm271_vm2, %v1434_v10  ;;  %v261_v24 = vrot.slane %v259_v18, 1  ;;  %v269_v25 = vrot.slane %v267_v20, 1  ;;  %v394_v26 = vrot.slane %v1131_v21, 1  ;;  %v1149_v32 = vcombine.low %v1143_v27, %v1144_v28  ;;  %v1154_v35 = vld [vmem:[%s1429_s14 + $0x14] sm:$0xe]  ;;  %v1324_v39 = vld [vmem:[%s1429_s14 + $0x1c] sm:$0xff]  }
  0x17   : >> { %v256_v23 = vrot.slane %v254_v17, 1  ;;  %1258 = vmatpush3.bf16.msra.mxu1 %v488_v11  ;;  %1259 = vmatprep.mubr.msk.bf16.mxu1 %vm271_vm2, %v1323_v15  ;;  %v1148_v38 = vld [vmem:[%s1540_s1 + $0x10] sm:$0xf]  ;;  %v663_v42 = vsel %vm278_vm0, %v1155_v12, 0  ;;  %v571_v43 = vshll.u32 %v1326_v33, 16  ;;  %v1156_v44 = vcombine.low %v1154_v35, %v1144_v28  ;;  %v1329_v20 = vld [vmem:[%s1429_s14 + $0x28] sm:$0xff]  }
  0x18   : >> { %1298 = vmatprep.subr.msk.bf16.mxu1 %vm278_vm0, %v1155_v12  ;;  %v265_v30 = vor.u32 %v263_v19, %v261_v24  ;;  %v396_v34 = vsel %vm393_vm3, %v394_v26, %v395_v22  ;;  %v564_v40 = vshrl.u32 %v1149_v32, 16  ;;  %v566_v41 = vshll.u32 %v1149_v32, 16  ;;  %v1173_v46 = vld [vmem:[%s1540_s1 + $0x1c] sm:$0xf]  ;;  %v1472_v47 = vld [vmem:[%s1429_s14 + $0x30] sm:$0xff]   ;;  %s1197_s28 = sshll.u32 %s1349_s30, 4 }
  0x19   : >> { %v257_v29 = vor.u32 %v256_v23, %v252_v16  ;;  %v652_v45 = vrot.slane %v1326_v33, 1  ;;  %v1328_v49 = vld [vmem:[%s1429_s14 + $0x24] ss:$0 sps:$4 sm:$0x11]   ;;  %v1168_v50 = vld [vmem:[%s1429_s14 + $0x28] sm:$0xf]  ;;  %s987_s5 = scalar_lea.vmem %s1392_s23, %s1197_s28  ;;  %s1021_s6 = scalar_lea.vmem %s1397_s26, %s1197_s28 }
  0x1a   : >> { %v270_v37 = vsel %vm250_vm1, %v265_v30, %v269_v25  ;;  %v568_v48 = vrot.slane %v566_v41, 1  ;;  %v397_v51 = vrot.slane %v1441_v13, 1  ;;  %v651_v52 = vrot.slane %v1156_v44, 1  ;;  %v1169_v53 = vld [vmem:[%s1429_s14 + $0x2c] sm:$0xf]  ;;  %v1332_v27 = vld [vmem:[%s1429_s14 + $0x30] sm:$0xff]  }
  0x1b   : >> { %v262_v36 = vsel %vm250_vm1, %v257_v29, %v261_v24  ;;  %v573_v55 = vrot.slane %v571_v43, 1  ;;  %v1174_v56 = vcombine.low %v1168_v50, %v1169_v53  ;;  %v654_v58 = vrot.slane %v1328_v49, 1  ;;  %v1333_v2 = vld [vmem:[%s1429_s14 + $0x38] ss:$0 sps:$4 sm:$0x11]   ;;  %s225_s30 = sadd.s32 1, %s1349_s30  }
  0x1c   : >> { %1241 = vmatprep.mubr.msk.bf16.mxu0 %vm271_vm2, %v262_v36  ;;  %v569_v54 = vor.u32 %v568_v48, %v564_v40  ;;  %v653_v57 = vsel %vm393_vm3, %v651_v52, %v652_v45  ;;  %v828_v59 = vshll.u32 %v1472_v47, 16  ;;  %v398_v62 = vsel %vm393_vm3, %v395_v22, %v397_v51  ;;  %v1163_v7 = vld [vmem:[%s1540_s1 + $0x18] sm:$0xf]  ;;  %v1179_v18 = vld [vmem:[%s1429_s14 + $0x28] sm:$0xe]  ;;  %p222_p4 = scmp.ge.s32.totalorder %s225_s30, 32  }
  0x1d   : >> { %1242 = vmatmul.mubr.msk.bf16.vlgmr.msra.gmra.mxu0 %vm271_vm2, %v270_v37  ;;  %v821_v60 = vshrl.u32 %v1174_v56, 16  ;;  %v823_v61 = vshll.u32 %v1174_v56, 16  ;;  %v575_v63 = vshrl.u32 %v1326_v33, 16  ;;  %v579_v1 = vshll.u32 %v1328_v49, 16  ;;  %v1180_v23 = vld [vmem:[%s1540_s1 + $0x20] sm:$0xf] }
  0x1e   : >> { %1252 = vmatpush3.bf16.msra.mxu0 %v406_v31  ;;  %1253 = vmatprep.mubr.msk.bf16.mxu0 %vm271_vm2, %v396_v34  ;;  %v590_v3 = vsel %vm278_vm0, %v1148_v38, 0  ;;  %v574_v4 = vsel %vm250_vm1, %v569_v54, %v573_v55  ;;  %v830_v6 = vrot.slane %v828_v59, 1  ;;  %v655_v8 = vsel %vm393_vm3, %v652_v45, %v654_v58 }
  0x1f   : >> { %1297 = vmatprep.subr.msk.bf16.mxu0 %vm278_vm0, %v1148_v38  ;;  %1260 = vmatmul.mubr.msk.bf16.vlgmr.msra.gmra.mxu1 %vm271_vm2, %v1324_v39  ;;  %v825_v5 = vrot.slane %v823_v61, 1  ;;  %v832_v9 = vshrl.u32 %v1472_v47, 16  ;;  %v836_v10 = vshll.u32 %v1333_v2, 16  ;;  %v847_v11 = vsel %vm278_vm0, %v1173_v46, 0 }
  0x20   : >> { %1270 = vmatpush3.bf16.msra.mxu1 %v663_v42  ;;  %1271 = vmatprep.mubr.msk.bf16.mxu1 %vm271_vm2, %v653_v57  ;;  %v577_v13 = vor.u32 %v575_v63, %v573_v55  ;;  %v581_v14 = vrot.slane %v579_v1, 1  ;;  %v745_v21 = vsel %vm278_vm0, %v1163_v7, 0  ;;  %v1181_v22 = vcombine.low %v1179_v18, %v1169_v53 }
  0x21   : >> { %1300 = vmatprep.subr.msk.bf16.mxu1 %vm278_vm0, %v1173_v46  ;;  %v826_v12 = vor.u32 %v825_v5, %v821_v60  ;;  %v834_v16 = vor.u32 %v832_v9, %v830_v6  ;;  %v838_v17 = vrot.slane %v836_v10, 1  ;;  %v909_v26 = vrot.slane %v1472_v47, 1 }
  0x22   : >> { %v582_v19 = vsel %vm250_vm1, %v577_v13, %v581_v14  ;;  %v908_v25 = vrot.slane %v1181_v22, 1  ;;  %v920_v28 = vsel %vm278_vm0, %v1180_v23, 0  ;;  %v911_v30 = vrot.slane %v1333_v2, 1 }
  0x23   : >> { %v831_v15 = vsel %vm250_vm1, %v826_v12, %v830_v6  ;;  %v839_v24 = vsel %vm250_vm1, %v834_v16, %v838_v17  ;;  %vm1022_vm4 = vcmask 60416  }
  0x24   : >> { %v910_v29 = vsel %vm393_vm3, %v908_v25, %v909_v26  ;;  %v912_v31 = vsel %vm393_vm3, %v909_v26, %v911_v30  ;;  %v1204_v26 = vld [vmem:[%s987_s5] sm:$0xff]  }
  0x25   : >> { %1254 = vmatmul.mubr.msk.bf16.vlgmr.msra.gmra.mxu0 %vm271_vm2, %v398_v62 }
  0x26   : >> { %1264 = vmatpush3.bf16.msra.mxu0 %v590_v3  ;;  %1265 = vmatprep.mubr.msk.bf16.mxu0 %vm271_vm2, %v574_v4 }
  0x27   : >> { %1299 = vmatprep.subr.msk.bf16.mxu0 %vm278_vm0, %v1163_v7  ;;  %1272 = vmatmul.mubr.msk.bf16.vlgmr.msra.gmra.mxu1 %vm271_vm2, %v655_v8 }
  0x28   : >> { %1282 = vmatpush3.bf16.msra.mxu1 %v847_v11  ;;  %1283 = vmatprep.mubr.msk.bf16.mxu1 %vm271_vm2, %v831_v15 }
  0x2d   : >> { %1266 = vmatmul.mubr.msk.bf16.vlgmr.msra.gmra.mxu0 %vm271_vm2, %v582_v19 }
  0x2e   : >> { %1276 = vmatpush3.bf16.msra.mxu0 %v745_v21  ;;  %1277 = vmatprep.mubr.msk.bf16.mxu0 %vm271_vm2, %v1329_v20  ;;  %v1211_v20 = vld [vmem:[%s987_s5 + $0x8] sm:$0xff]  }
  0x2f   : >> { %1301 = vmatprep.subr.msk.bf16.mxu0 %vm278_vm0, %v1180_v23  ;;  %1284 = vmatmul.mubr.msk.bf16.vlgmr.msra.gmra.mxu1 %vm271_vm2, %v839_v24  ;;  %v1209_v30 = vunpack.c.l.bf16 %v1211_v20 }
  0x35   : >> { %1278 = vmatmul.mubr.msk.bf16.vlgmr.msra.gmra.mxu0 %vm271_vm2, %v1332_v27 }
  0x36   : >> { %1288 = vmatpush3.bf16.msra.mxu0 %v920_v28  ;;  %1289 = vmatprep.mubr.msk.bf16.mxu0 %vm271_vm2, %v910_v29 }
  0x3d   : >> { %1290 = vmatmul.mubr.msk.bf16.vlgmr.msra.gmra.mxu0 %vm271_vm2, %v912_v31 }
  0xd6   : >> { %v1249_v32 = vpop.f32.mrf.mxu1 }
  0xd8   : >> { %v372_v33 = vpop.f32.mrf.mxu1 }
  0xda   : >> { %v1250_v34 = vpop.f32.mrf.mxu1 }
  0xdc   : >> { %v375_v35 = vpop.f32.mrf.mxu1 }
  0xdd   : >> { %v1243_v36 = vpop.f32.mrf.mxu0 }
  0xde   : >> { %v381_v49 = vadd.f32 %v1249_v32, %v1243_v36 }
  0xdf   : >> { %v316_v37 = vpop.f32.mrf.mxu0  ;;  %v1261_v38 = vpop.f32.mrf.mxu1 }
  0xe0   : >> { %v373_v51 = vadd.f32 %v372_v33, %v316_v37 }
  0xe1   : >> { %v1244_v39 = vpop.f32.mrf.mxu0  ;;  %v524_v40 = vpop.f32.mrf.mxu1 }
  0xe2   : >> { %v384_v55 = vadd.f32 %v1250_v34, %v1244_v39 }
  0xe3   : >> { %v319_v41 = vpop.f32.mrf.mxu0  ;;  %v1262_v42 = vpop.f32.mrf.mxu1 }
  0xe4   : >> { %v376_v58 = vadd.f32 %v375_v35, %v319_v41  ;;  %v1205_v35 = vunpack.c.l.bf16 %v1204_v26 }
  0xe5   : >> { %v1255_v43 = vpop.f32.mrf.mxu0  ;;  %v527_v44 = vpop.f32.mrf.mxu1 }
  0xe6   : >> { %v459_v52 = vadd.f32 %v1255_v43, %v381_v49 }
  0xe7   : >> { %v442_v45 = vpop.f32.mrf.mxu0  ;;  %v1273_v46 = vpop.f32.mrf.mxu1 }
  0xe8   : >> { %v457_v56 = vadd.f32 %v442_v45, %v373_v51  ;;  %v541_v59 = vadd.f32 %v1261_v38, %v459_v52  ;;  %v1210_v38 = vunpack.c.h.bf16 %v1211_v20 }
  0xe9   : >> { %v1256_v47 = vpop.f32.mrf.mxu0  ;;  %v699_v48 = vpop.f32.mrf.mxu1 }
  0xea   : >> { %v460_v60 = vadd.f32 %v1256_v47, %v384_v55  ;;  %v539_v63 = vadd.f32 %v524_v40, %v457_v56 }
  0xeb   : >> { %v445_v50 = vpop.f32.mrf.mxu0  ;;  %v1274_v54 = vpop.f32.mrf.mxu1 }
  0xec   : >> { %v458_v1 = vadd.f32 %v445_v50, %v376_v58  ;;  %v542_v4 = vadd.f32 %v1262_v42, %v460_v60 }
  0xed   : >> { %v1267_v53 = vpop.f32.mrf.mxu0  ;;  %v702_v62 = vpop.f32.mrf.mxu1 }
  0xee   : >> { %v643_v2 = vadd.f32 %v1267_v53, %v541_v59  ;;  %v540_v8 = vadd.f32 %v527_v44, %v458_v1  ;;  %v1206_v44 = vunpack.c.h.bf16 %v1204_v26 }
  0xef   : >> { %v626_v57 = vpop.f32.mrf.mxu0  ;;  %v1285_v7 = vpop.f32.mrf.mxu1 }
  0xf0   : >> { %v641_v5 = vadd.f32 %v626_v57, %v539_v63  ;;  %v716_v9 = vadd.f32 %v1273_v46, %v643_v2 }
  0xf1   : >> { %v1268_v61 = vpop.f32.mrf.mxu0  ;;  %v883_v15 = vpop.f32.mrf.mxu1 }
  0xf2   : >> { %v644_v10 = vadd.f32 %v1268_v61, %v542_v4  ;;  %v714_v12 = vadd.f32 %v699_v48, %v641_v5 }
  0xf3   : >> { %v629_v3 = vpop.f32.mrf.mxu0  ;;  %v1286_v24 = vpop.f32.mrf.mxu1 }
  0xf4   : >> { %v642_v13 = vadd.f32 %v629_v3, %v540_v8  ;;  %v717_v17 = vadd.f32 %v1274_v54, %v644_v10 }
  0xf5   : >> { %v1279_v6 = vpop.f32.mrf.mxu0  ;;  %v886_v36 = vpop.f32.mrf.mxu1 }
  0xf6   : >> { %v798_v14 = vadd.f32 %v1279_v6, %v716_v9  ;;  %v715_v21 = vadd.f32 %v702_v62, %v642_v13 }
  0xf7   : >> { %v781_v11 = vpop.f32.mrf.mxu0 }
  0xf8   : >> { %v796_v18 = vadd.f32 %v781_v11, %v714_v12  ;;  %v900_v22 = vadd.f32 %v1285_v7, %v798_v14 }
  0xf9   : >> { %v1280_v16 = vpop.f32.mrf.mxu0 }
  0xfa   : >> { %v799_v23 = vadd.f32 %v1280_v16, %v717_v17  ;;  %v898_v27 = vadd.f32 %v883_v15, %v796_v18 }
  0xfb   : >> { %v784_v19 = vpop.f32.mrf.mxu0 }
  0xfc   : >> { %v797_v28 = vadd.f32 %v784_v19, %v715_v21  ;;  %v901_v32 = vadd.f32 %v1286_v24, %v799_v23 }
  0xfd   : >> { %v1291_v25 = vpop.f32.mrf.mxu0 }
  0xfe   : >> { %v973_v29 = vadd.f32 %v1291_v25, %v900_v22  ;;  %v899_v39 = vadd.f32 %v886_v36, %v797_v28 }
  0xff   : >> { %v956_v31 = vpop.f32.mrf.mxu0 }
 0x100   : >> { %v983_v33 = vadd.f32 %v1387_v0, %v973_v29  ;;  %v971_v34 = vadd.f32 %v956_v31, %v898_v27 }
 0x101   : >> { %v1292_v37 = vpop.f32.mrf.mxu0 }
 0x102   : >> { %v998_v40 = vadd.f32 %v1209_v30, %v983_v33  ;;  %v981_v41 = vadd.f32 %v1387_v0, %v971_v34  ;;  %v974_v42 = vadd.f32 %v1292_v37, %v901_v32 }
 0x103   : >> { %v959_v43 = vpop.f32.mrf.mxu0 }
 0x104   : >> { %v1002_v45 = vmax.f32 %v998_v40, 0.0  ;;  %v996_v46 = vadd.f32 %v1205_v35, %v981_v41  ;;  %v984_v47 = vadd.f32 %v1387_v0, %v974_v42  ;;  %v972_v48 = vadd.f32 %v959_v43, %v899_v39 }
 0x106   : >> { %v1200_v49 = vpack.c.bf16 %v1002_v45, %v1002_v45  ;;  %v1000_v50 = vmax.f32 %v996_v46, 0.0  ;;  %v999_v51 = vadd.f32 %v1210_v38, %v984_v47  ;;  %v982_v52 = vadd.f32 %v1387_v0, %v972_v48 }
 0x108   : >> { %1025 = vst.msk [vmem:[%s1021_s6 + $0x8] sm:$0xf] %vm1022_vm4, %v1200_v49  ;;  %v1198_v53 = vpack.c.bf16 %v1000_v50, %v1000_v50  ;;  %v1003_v54 = vmax.f32 %v999_v51, 0.0  ;;  %v997_v55 = vadd.f32 %v1206_v44, %v982_v52 }
 0x10a   : >> { %1023 = vst.msk [vmem:[%s1021_s6] sm:$0xf] %vm1022_vm4, %v1198_v53  ;;  %v1201_v56 = vpack.c.bf16 %v1003_v54, %v1003_v54  ;;  %v1001_v57 = vmax.f32 %v997_v55, 0.0  ;;  %224 = sbr.rel (!%p222_p4) target bundleno = 15 (0xf), region = 89 }
 0x10c   : >> { %1026 = vst.msk [vmem:[%s1021_s6 + $0xc] sm:$0xf] %vm1022_vm4, %v1201_v56  ;;  %v1199_v58 = vpack.c.bf16 %v1001_v57, %v1001_v57 }
 0x10e   : >> { %1024 = vst.msk [vmem:[%s1021_s6 + $0x4] sm:$0xf] %vm1022_vm4, %v1199_v58 }
 0x10f PF: > { %s14_s15 = sadd.s32 1, %s1345_s15  }
 0x110   : > { %p11_p5 = scmp.ge.s32.totalorder %s14_s15, 4  }
 0x112   :  { %13 = sbr.rel (!%p11_p5) target bundleno = 1 (0x1), region = 100 }

// kernel: _lambda_.13
= control target key start
LH: loop header
LB: loop body
LE: loop exit
PB: predicated region body
PF: predicated region fallthrough
CT: control target
= control target key end

     0   :  { %s1321_s21 = smov 0   ;;  %s1472_s0 = inlined_call_operand.vmem [shape: bf16[2,68,17,8], index: 0, kind: input, shape index: {}]   ;;  %s1473_s1 = inlined_call_operand.vmem [shape: bf16[9,8,16], index: 1, kind: input, shape index: {}]   ;;  %s1474_s2 = inlined_call_operand.vmem [shape: f32[1,16], index: 2, kind: input, shape index: {}, may-alias: {2,4}]   ;;  %s1475_s3 = inlined_call_operand.vmem [shape: bf16[8,16], index: 3, kind: input, shape index: {}]   ;;  %s1476_s4 = inlined_call_operand.vmem [shape: f32[1,16], index: 4, kind: input, shape index: {}, may-alias: {2,4}]   ;;  %s1477_s5 = inlined_call_operand.vmem [shape: bf16[2,16,16,16], index: 5, kind: output, shape index: {0}]   ;;  %s1478_s6 = inlined_call_operand.vmem [shape: bf16[2,16,16,16], index: 6, kind: output, shape index: {1}]  }
   0x1 LB: > { %s1076_s22 = sadd.s32 4294967295, %s1278_s21   ;;  %p1080_p0 = scmp.ge.s32.totalorder %s1278_s21, 1  ;;  %s1278_s21 = sphi %s1321_s21, %s17_s21  }
   0x2   : > { %p215_p1 = scmp.lt.s32.totalorder %s1278_s21, 3 }
   0x4   : > { %p216_p2 = pnand %p1080_p0, %p215_p1 }
   0x5   : > { %p250_p3 = scmp.lt.s32.totalorder (!%p216_p2), %s1076_s22, 1  ;;  %s1349_s12 = smov (!%p216_p2), 0  }
   0x6   : > { %219 = sbr.rel (%p216_p2) target bundleno = 258 (0x102), region = 40 }
   0xb   : > { %v1332_v0 = vld [vmem:[%s1474_s2] ss:$0 sm:$0xff]  ;;  %s1480_s22 = smov (!%p250_p3, %s1076_s22), 1 }
   0xc   : > { %s1236_s25 = smul.u32 816, %s1480_s22  ;;  %s1147_s26 = sshll.u32 %s1480_s22, 7 }
   0xd   : > { %s1337_s29 = scalar_lea.vmem %s1477_s5, %s1147_s26  ;;  %s1342_s8 = scalar_lea.vmem %s1478_s6, %s1147_s26 }
   0xe   : > { %s1347_s11 = scalar_lea.vmem %s1472_s0, %s1236_s25 }
   0xf LB: >> { %v1089_v1 = vld [vmem:[%s1473_s1 + $0x4] sm:$0xf]  ;;  %vm296_vm0 = vcmask 1043456   ;;  %v278_v2 = vld [vmem:[%s1473_s1] sm:$0xf]  ;;  %v1284_v3 = vmov 0.0   ;;  %s1282_s12 = sphi %s1349_s12, %s272_s12  }
  0x10   : >> { %1176 = vmatprep.subr.bf16.mxu0 %v1284_v3  ;;  %v298_v4 = vsel %vm296_vm0, %v1089_v1, 0  ;;  %1182 = vmatprep.subr.bf16.mxu1 %v1284_v3  ;;  %v350_v5 = vsel %vm296_vm0, %v278_v2, 0  ;;  %s1149_s17 = smul.u32 12, %s1282_s12  ;;  %v1094_v6 = vld [vmem:[%s1473_s1 + $0x8] sm:$0xf]  ;;  %vm1285_vm1 = vmmov 0  }
  0x11   : >> { %1177 = vmatpush3.bf16.msra.mxu0 %v298_v4  ;;  %1183 = vmatpush3.bf16.msra.mxu1 %v350_v5  ;;  %v1100_v7 = vld [vmem:[%s1473_s1 + $0xc] sm:$0xf]  ;;  %vm292_vm2 = vcmask 64512   ;;  %v423_v9 = vsel %vm296_vm0, %v1094_v6, 0  ;;  %vm406_vm3 = vsmask.f32 7424 }
  0x12   : >> { %1178 = vmatprep.mubr.msk.bf16.mxu0 %vm1285_vm1, %v1284_v3  ;;  %1184 = vmatprep.mubr.msk.bf16.mxu1 %vm1285_vm1, %v1284_v3  ;;  %s1377_s23 = scalar_lea.vmem %s1347_s11, %s1149_s17  ;;  %v485_v11 = vsel %vm296_vm0, %v1100_v7, 0  ;;  %v1111_v14 = vld [vmem:[%s1473_s1 + $0x14] sm:$0xf]  ;;  %v1105_v19 = vld [vmem:[%s1473_s1 + $0x10] sm:$0xf]  ;;  %s1152_s18 = sshll.u32 %s1282_s12, 3 }
  0x13   : >> { %1188 = vmatprep.subr.bf16.mxu0 %v1284_v3  ;;  %1194 = vmatprep.subr.bf16.mxu1 %v1284_v3  ;;  %v1255_v8 = vld [vmem:[%s1377_s23 + $0xcc] sm:$0xff]   ;;  %v1256_v10 = vld [vmem:[%s1377_s23] sm:$0xff]   ;;  %v1258_v13 = vld [vmem:[%s1377_s23 + $0x8] ss:$0 sps:$4 sm:$0x11]   ;;  %v621_v24 = vsel %vm296_vm0, %v1111_v14, 0  ;;  %s959_s19 = scalar_lea.vmem %s1342_s8, %s1152_s18  ;;  %s884_s20 = scalar_lea.vmem %s1337_s29, %s1152_s18 }
  0x14   : >> { %1179 = vmatmul.mubr.msk.bf16.vlgmr.msra.gmra.mxu0 %vm292_vm2, %v1255_v8  ;;  %1185 = vmatmul.mubr.msk.bf16.vlgmr.msra.gmra.mxu1 %vm292_vm2, %v1256_v10  ;;  %v1257_v12 = vld [vmem:[%s1377_s23] sm:$0xff]   ;;  %v415_v17 = vshll.u32 %v1258_v13, 16  ;;  %v1259_v18 = vld [vmem:[%s1377_s23 + $0x198] sm:$0xff]   ;;  %v547_v29 = vsel %vm296_vm0, %v1105_v19, 0  ;;  %v1265_v39 = vld [vmem:[%s1377_s23 + $0xc] sm:$0xff]   ;;  %vm885_vm4 = vcmask 125952  }
  0x15   : >> { %1189 = vmatpush3.bf16.msra.mxu0 %v423_v9  ;;  %1195 = vmatpush3.bf16.msra.mxu1 %v485_v11  ;;  %v408_v15 = vshrl.u32 %v1257_v12, 16  ;;  %v410_v16 = vshll.u32 %v1257_v12, 16  ;;  %v1261_v22 = vld [vmem:[%s1377_s23 + $0x198] sm:$0xff]   ;;  %v1262_v23 = vld [vmem:[%s1377_s23 + $0x1a0] ss:$0 sps:$4 sm:$0x11]  }
  0x16   : >> { %1190 = vmatprep.mubr.msk.bf16.mxu0 %vm1285_vm1, %v1284_v3  ;;  %1196 = vmatprep.mubr.msk.bf16.mxu1 %vm1285_vm1, %v1284_v3  ;;  %v417_v21 = vrot.slane %v415_v17, 1  ;;  %v606_v26 = vshrl.u32 %v1261_v22, 16  ;;  %v608_v27 = vshll.u32 %v1261_v22, 16  ;;  %v613_v28 = vshll.u32 %v1262_v23, 16  ;;  %v1122_v34 = vld [vmem:[%s1473_s1 + $0x1c] sm:$0xf] }
  0x17   : >> { %1200 = vmatprep.subr.bf16.mxu0 %v1284_v3  ;;  %1206 = vmatprep.subr.bf16.mxu1 %v1284_v3  ;;  %v412_v20 = vrot.slane %v410_v16, 1  ;;  %v1117_v35 = vld [vmem:[%s1473_s1 + $0x18] sm:$0xf]  ;;  %v1260_v36 = vld [vmem:[%s1377_s23 + $0x264] sm:$0xff]   ;;  %v745_v38 = vsel %vm296_vm0, %v1122_v34, 0  ;;  %v806_v42 = vshll.u32 %v1265_v39, 16 }
  0x18   : >> { %v610_v31 = vrot.slane %v608_v27, 1  ;;  %v615_v32 = vrot.slane %v613_v28, 1  ;;  %v683_v40 = vsel %vm296_vm0, %v1117_v35, 0  ;;  %v1266_v41 = vld [vmem:[%s1377_s23 + $0x14] ss:$0 sps:$4 sm:$0x11]  }
  0x19   : >> { %v413_v25 = vor.u32 %v412_v20, %v408_v15  ;;  %v890_v43 = vld [vmem:[%s1475_s3] sm:$0xf]  ;;  %v1264_v44 = vld [vmem:[%s1377_s23 + $0xd8] sm:$0xff]   ;;  %v1263_v46 = vld [vmem:[%s1377_s23 + $0xc] sm:$0xff]   ;;  %v804_v48 = vshrl.u32 %v1265_v39, 16  ;;  %v808_v49 = vrot.slane %v806_v42, 1 }
  0x1a   : >> { %v611_v33 = vor.u32 %v610_v31, %v606_v26  ;;  %v1128_v45 = vld [vmem:[%s1473_s1 + $0x20] sm:$0xf]  ;;  %v907_v47 = vsel %vm296_vm0, %v890_v43, 0  ;;  %v811_v50 = vshll.u32 %v1266_v41, 16  ;;  %v1267_v54 = vld [vmem:[%s1377_s23 + $0x264] sm:$0xff]   ;;  %s272_s12 = sadd.s32 1, %s1282_s12  }
  0x1b   : >> { %v418_v30 = vsel %vm406_vm3, %v413_v25, %v417_v21  ;;  %v819_v51 = vsel %vm296_vm0, %v1128_v45, 0  ;;  %v809_v52 = vor.u32 %v808_v49, %v804_v48  ;;  %v1139_v35 = vld [vmem:[%s1476_s4] ss:$0 sm:$0xff]  ;;  %p269_p4 = scmp.ge.s32.totalorder %s272_s12, 16  }
  0x1c   : >> { %1197 = vmatmul.mubr.msk.bf16.vlgmr.msra.gmra.mxu1 %vm292_vm2, %v1259_v18  ;;  %1191 = vmatmul.mubr.msk.bf16.vlgmr.msra.gmra.mxu0 %vm292_vm2, %v418_v30  ;;  %v616_v37 = vsel %vm406_vm3, %v611_v33, %v615_v32  ;;  %v813_v53 = vrot.slane %v811_v50, 1 }
  0x1d   : >> { %1207 = vmatpush3.bf16.msra.mxu1 %v621_v24  ;;  %1201 = vmatpush3.bf16.msra.mxu0 %v547_v29 }
  0x1e   : >> { %1202 = vmatprep.mubr.msk.bf16.mxu0 %vm1285_vm1, %v1284_v3  ;;  %1208 = vmatprep.mubr.msk.bf16.mxu1 %vm1285_vm1, %v1284_v3  ;;  %v814_v55 = vsel %vm406_vm3, %v809_v52, %v813_v53 }
  0x1f   : >> { %1212 = vmatprep.subr.bf16.mxu0 %v1284_v3  ;;  %1218 = vmatprep.subr.bf16.mxu1 %v1284_v3 }
  0x24   : >> { %1209 = vmatmul.mubr.msk.bf16.vlgmr.msra.gmra.mxu1 %vm292_vm2, %v616_v37  ;;  %1203 = vmatmul.mubr.msk.bf16.vlgmr.msra.gmra.mxu0 %vm292_vm2, %v1260_v36 }
  0x25   : >> { %1219 = vmatpush3.bf16.msra.mxu1 %v745_v38  ;;  %1213 = vmatpush3.bf16.msra.mxu0 %v683_v40 }
  0x26   : >> { %1214 = vmatprep.mubr.msk.bf16.mxu0 %vm1285_vm1, %v1284_v3  ;;  %1220 = vmatprep.mubr.msk.bf16.mxu1 %vm1285_vm1, %v1284_v3 }
  0x27   : >> { %1224 = vmatprep.subr.bf16.mxu0 %v1284_v3  ;;  %1230 = vmatprep.subr.bf16.mxu1 %v1284_v3 }
  0x2c   : >> { %1221 = vmatmul.mubr.msk.bf16.vlgmr.msra.gmra.mxu1 %vm292_vm2, %v1264_v44  ;;  %1215 = vmatmul.mubr.msk.bf16.vlgmr.msra.gmra.mxu0 %vm292_vm2, %v1263_v46 }
  0x2d   : >> { %1231 = vmatpush3.bf16.msra.mxu1 %v907_v47  ;;  %1225 = vmatpush3.bf16.msra.mxu0 %v819_v51 }
  0x2e   : >> { %1226 = vmatprep.mubr.msk.bf16.mxu0 %vm1285_vm1, %v1284_v3  ;;  %1232 = vmatprep.mubr.msk.bf16.mxu1 %vm1285_vm1, %v1284_v3 }
  0x34   : >> { %1233 = vmatmul.mubr.msk.bf16.vlgmr.msra.gmra.mxu1 %vm292_vm2, %v1267_v54  ;;  %1227 = vmatmul.mubr.msk.bf16.vlgmr.msra.gmra.mxu0 %vm292_vm2, %v814_v55 }
  0xd4   : >> { %v334_v56 = vpop.f32.mrf.mxu0  ;;  %v386_v57 = vpop.f32.mrf.mxu1 }
  0xd5   : >> { %v387_v7 = vadd.f32 %v386_v57, %v334_v56 }
  0xd6   : >> { %v1180_v58 = vpop.f32.mrf.mxu0  ;;  %v1186_v59 = vpop.f32.mrf.mxu1 }
  0xd8   : >> { %v337_v60 = vpop.f32.mrf.mxu0  ;;  %v389_v61 = vpop.f32.mrf.mxu1 }
  0xd9   : >> { %v390_v13 = vadd.f32 %v389_v61, %v337_v60 }
  0xda   : >> { %v1181_v62 = vpop.f32.mrf.mxu0  ;;  %v1187_v63 = vpop.f32.mrf.mxu1 }
  0xdc   : >> { %v521_v1 = vpop.f32.mrf.mxu1  ;;  %v459_v2 = vpop.f32.mrf.mxu0 }
  0xdd   : >> { %v466_v10 = vadd.f32 %v459_v2, %v387_v7 }
  0xde   : >> { %v1198_v4 = vpop.f32.mrf.mxu1  ;;  %v1192_v5 = vpop.f32.mrf.mxu0 }
  0xdf   : >> { %v528_v16 = vadd.f32 %v521_v1, %v466_v10 }
  0xe0   : >> { %v524_v3 = vpop.f32.mrf.mxu1  ;;  %v462_v6 = vpop.f32.mrf.mxu0 }
  0xe1   : >> { %v467_v17 = vadd.f32 %v462_v6, %v390_v13 }
  0xe2   : >> { %v1199_v8 = vpop.f32.mrf.mxu1  ;;  %v1193_v9 = vpop.f32.mrf.mxu0 }
  0xe3   : >> { %v529_v23 = vadd.f32 %v524_v3, %v467_v17 }
  0xe4   : >> { %v657_v11 = vpop.f32.mrf.mxu1  ;;  %v583_v12 = vpop.f32.mrf.mxu0 }
  0xe5   : >> { %v590_v20 = vadd.f32 %v583_v12, %v528_v16 }
  0xe6   : >> { %v1210_v14 = vpop.f32.mrf.mxu1  ;;  %v1204_v15 = vpop.f32.mrf.mxu0 }
  0xe7   : >> { %v664_v26 = vadd.f32 %v657_v11, %v590_v20 }
  0xe8   : >> { %v660_v18 = vpop.f32.mrf.mxu1  ;;  %v586_v19 = vpop.f32.mrf.mxu0 }
  0xe9   : >> { %v591_v27 = vadd.f32 %v586_v19, %v529_v23 }
  0xea   : >> { %v1211_v21 = vpop.f32.mrf.mxu1  ;;  %v1205_v22 = vpop.f32.mrf.mxu0 }
  0xeb   : >> { %v665_v33 = vadd.f32 %v660_v18, %v591_v27 }
  0xec   : >> { %v781_v24 = vpop.f32.mrf.mxu1  ;;  %v719_v25 = vpop.f32.mrf.mxu0 }
  0xed   : >> { %v726_v30 = vadd.f32 %v719_v25, %v664_v26 }
  0xee   : >> { %v1222_v28 = vpop.f32.mrf.mxu1  ;;  %v1216_v29 = vpop.f32.mrf.mxu0 }
  0xef   : >> { %v788_v37 = vadd.f32 %v781_v24, %v726_v30 }
  0xf0   : >> { %v784_v31 = vpop.f32.mrf.mxu1  ;;  %v722_v32 = vpop.f32.mrf.mxu0 }
  0xf1   : >> { %v727_v38 = vadd.f32 %v722_v32, %v665_v33 }
  0xf2   : >> { %v1223_v34 = vpop.f32.mrf.mxu1  ;;  %v1217_v36 = vpop.f32.mrf.mxu0 }
  0xf3   : >> { %v789_v46 = vadd.f32 %v784_v31, %v727_v38 }
  0xf4   : >> { %v943_v39 = vpop.f32.mrf.mxu1  ;;  %v855_v40 = vpop.f32.mrf.mxu0 }
  0xf5   : >> { %v944_v41 = vadd.f32 %v1139_v35, %v943_v39  ;;  %v862_v42 = vadd.f32 %v855_v40, %v788_v37 }
  0xf6   : >> { %v1234_v43 = vpop.f32.mrf.mxu1  ;;  %v1228_v45 = vpop.f32.mrf.mxu0 }
  0xf7   : >> { %v1153_v44 = vpack.c.bf16 %v944_v41, %v944_v41  ;;  %v870_v47 = vadd.f32 %v1332_v0, %v862_v42 }
  0xf8   : >> { %v946_v48 = vpop.f32.mrf.mxu1  ;;  %v858_v49 = vpop.f32.mrf.mxu0 }
  0xf9   : >> { %960 = vst.msk [vmem:[%s959_s19] sm:$0xf] %vm885_vm4, %v1153_v44  ;;  %v947_v50 = vadd.f32 %v1139_v35, %v946_v48  ;;  %v872_v51 = vmax.f32 %v870_v47, 0.0  ;;  %v863_v52 = vadd.f32 %v858_v49, %v789_v46 }
  0xfa   : >> { %v1235_v53 = vpop.f32.mrf.mxu1  ;;  %v1229_v55 = vpop.f32.mrf.mxu0 }
  0xfb   : >> { %v1154_v54 = vpack.c.bf16 %v947_v50, %v947_v50  ;;  %v1150_v56 = vpack.c.bf16 %v872_v51, %v872_v51  ;;  %v871_v57 = vadd.f32 %v1332_v0, %v863_v52 }
  0xfd   : >> { %961 = vst.msk [vmem:[%s959_s19 + $0x4] sm:$0xf] %vm885_vm4, %v1154_v54  ;;  %886 = vst.msk [vmem:[%s884_s20] sm:$0xf] %vm885_vm4, %v1150_v56  ;;  %v873_v58 = vmax.f32 %v871_v57, 0.0  ;;  %271 = sbr.rel (!%p269_p4) target bundleno = 15 (0xf), region = 105 }
  0xff   : >> { %v1151_v59 = vpack.c.bf16 %v873_v58, %v873_v58 }
 0x101   : >> { %887 = vst.msk [vmem:[%s884_s20 + $0x4] sm:$0xf] %vm885_vm4, %v1151_v59 }
 0x102 PF: > { %s17_s21 = sadd.s32 1, %s1278_s21  }
 0x103   : > { %p14_p5 = scmp.ge.s32.totalorder %s17_s21, 4  }
 0x105   :  { %16 = sbr.rel (!%p14_p5) target bundleno = 1 (0x1), region = 116 }

// kernel: _lambda_.14
= control target key start
LH: loop header
LB: loop body
LE: loop exit
PB: predicated region body
PF: predicated region fallthrough
CT: control target
= control target key end

     0   :  { %s1190_s15 = smov 0   ;;  %s1321_s0 = inlined_call_operand.vmem [shape: bf16[2,18,18,16], index: 0, kind: input, shape index: {}]   ;;  %s1322_s1 = inlined_call_operand.vmem [shape: bf16[9,16,16], index: 1, kind: input, shape index: {}]   ;;  %s1323_s2 = inlined_call_operand.vmem [shape: f32[1,16], index: 2, kind: input, shape index: {}]   ;;  %s1324_s3 = inlined_call_operand.vmem [shape: bf16[2,16,16,16], index: 3, kind: input, shape index: {}]   ;;  %s1325_s4 = inlined_call_operand.vmem [shape: bf16[2,16,16,16], index: 4, kind: output, shape index: {}]  }
   0x1 LB: > { %s949_s16 = sadd.s32 4294967295, %s1157_s15   ;;  %p953_p0 = scmp.ge.s32.totalorder %s1157_s15, 1  ;;  %s1157_s15 = sphi %s1190_s15, %s14_s15  }
   0x2   : > { %p172_p1 = scmp.lt.s32.totalorder %s1157_s15, 3 }
   0x4   : > { %p173_p2 = pnand %p953_p0, %p172_p1 }
   0x5   : > { %p203_p3 = scmp.lt.s32.totalorder (!%p173_p2), %s949_s16, 1  ;;  %s1218_s30 = smov (!%p173_p2), 0  }
   0x6   : > { %176 = sbr.rel (%p173_p2) target bundleno = 268 (0x10c), region = 36 }
   0xb   : > { %v1201_v0 = vld [vmem:[%s1323_s2] ss:$0 sm:$0xff]  ;;  %s1327_s16 = smov (!%p203_p3, %s949_s16), 1 }
   0xc   : > { %s1108_s19 = smul.u32 216, %s1327_s16  ;;  %s1025_s20 = sshll.u32 %s1327_s16, 7 }
   0xd   : > { %s1206_s23 = scalar_lea.vmem %s1324_s3, %s1025_s20  ;;  %s1211_s26 = scalar_lea.vmem %s1325_s4, %s1025_s20 }
   0xe   : > { %s1216_s29 = scalar_lea.vmem %s1321_s0, %s1108_s19 }
   0xf LB: >> { %v1127_v1 = vld [vmem:[%s1322_s1 + $0x8] sm:$0xff]   ;;  %v1163_v2 = vmov 0.0   ;;  %v1128_v3 = vld [vmem:[%s1322_s1] sm:$0xff]   ;;  %vm1164_vm0 = vmmov 0   ;;  %s1027_s9 = smul.u32 12, %s1161_s30  ;;  %vm264_vm1 = vcmask 130048   ;;  %s1161_s30 = sphi %s1218_s30, %s225_s30  }
  0x10   : >> { %1054 = vmatprep.subr.bf16.mxu0 %v1163_v2  ;;  %1060 = vmatprep.subr.bf16.mxu1 %v1163_v2  ;;  %v1132_v4 = vld [vmem:[%s1322_s1 + $0x18] sm:$0xff]   ;;  %vm245_vm2 = vsmask.f32 7424  ;;  %v1131_v18 = vld [vmem:[%s1322_s1 + $0x10] sm:$0xff]   ;;  %v1136_v26 = vld [vmem:[%s1322_s1 + $0x28] sm:$0xff]   ;;  %vm365_vm3 = vcmask 1046528  }
  0x11   : >> { %1055 = vmatpush3.bf16.msra.mxu0 %v1127_v1  ;;  %1056 = vmatprep.mubr.msk.bf16.mxu0 %vm1164_vm0, %v1163_v2  ;;  %s1238_s10 = scalar_lea.vmem %s1216_s29, %s1027_s9  ;;  %v1135_v38 = vld [vmem:[%s1322_s1 + $0x20] sm:$0xff]   ;;  %v1141_v43 = vld [vmem:[%s1322_s1 + $0x38] sm:$0xff]   ;;  %v1140_v52 = vld [vmem:[%s1322_s1 + $0x30] sm:$0xff]   ;;  %s1028_s28 = sshll.u32 %s1161_s30, 3  ;;  %vm862_vm4 = vcmask 125952  }
  0x12   : >> { %1061 = vmatpush3.bf16.msra.mxu1 %v1128_v3  ;;  %1062 = vmatprep.mubr.msk.bf16.mxu1 %vm1164_vm0, %v1163_v2  ;;  %v229_v5 = vld [vmem:[%s1238_s10] sm:$0xf]  ;;  %v230_v6 = vld [vmem:[%s1238_s10 + $0x4] sm:$0xf]  ;;  %v980_v16 = vld [vmem:[%s1238_s10 + $0xc] sm:$0xf]  ;;  %s843_s5 = scalar_lea.vmem %s1206_s23, %s1028_s28  ;;  %s861_s6 = scalar_lea.vmem %s1211_s26, %s1028_s28 }
  0x13   : >> { %1066 = vmatprep.subr.bf16.mxu0 %v1163_v2  ;;  %1072 = vmatprep.subr.bf16.mxu1 %v1163_v2  ;;  %v962_v7 = vcombine.low %v229_v5, %v230_v6  ;;  %v1130_v8 = vld [vmem:[%s1238_s10 + $0x8] ss:$0 sps:$4 sm:$0x11]   ;;  %v358_v9 = vld [vmem:[%s1238_s10] sm:$0xe]  ;;  %v1134_v23 = vld [vmem:[%s1238_s10 + $0xc] sm:$0xff]  }
  0x14   : >> { %v254_v12 = vshll.u32 %v1130_v8, 16  ;;  %v970_v15 = vcombine.low %v358_v9, %v230_v6  ;;  %v981_v17 = vld [vmem:[%s1238_s10 + $0x10] sm:$0xf]  ;;  %v989_v21 = vld [vmem:[%s1238_s10 + $0xc] sm:$0xe]  ;;  %v367_v22 = vrot.slane %v1130_v8, 1 }
  0x15   : >> { %v247_v10 = vshrl.u32 %v962_v7, 16  ;;  %v249_v11 = vshll.u32 %v962_v7, 16  ;;  %1063 = vmatmul.mubr.msk.bf16.vlgmr.msra.gmra.mxu1 %vm264_vm1, %v962_v7  ;;  %v985_v19 = vcombine.low %v980_v16, %v981_v17  ;;  %v992_v27 = vcombine.low %v989_v21, %v981_v17  ;;  %v1138_v28 = vld [vmem:[%s1238_s10 + $0x14] ss:$0 sps:$4 sm:$0x11]   ;;  %v1142_v55 = vld [vmem:[%s1238_s10 + $0x18] sm:$0xff]  }
  0x16   : >> { %1073 = vmatpush3.bf16.msra.mxu1 %v1132_v4  ;;  %1074 = vmatprep.mubr.msk.bf16.mxu1 %vm1164_vm0, %v1163_v2  ;;  %v256_v14 = vrot.slane %v254_v12, 1  ;;  %v366_v25 = vrot.slane %v970_v15, 1  ;;  %v1002_v30 = vld [vmem:[%s1238_s10 + $0x18] sm:$0xf]  ;;  %v1003_v31 = vld [vmem:[%s1238_s10 + $0x1c] sm:$0xf] }
  0x17   : >> { %v251_v13 = vrot.slane %v249_v11, 1  ;;  %1084 = vmatprep.subr.bf16.mxu1 %v1163_v2  ;;  %v504_v29 = vshll.u32 %v985_v19, 16  ;;  %v573_v32 = vrot.slane %v1138_v28, 1  ;;  %v1007_v33 = vcombine.low %v1002_v30, %v1003_v31  ;;  %v1144_v35 = vld [vmem:[%s1238_s10 + $0x20] ss:$0 sps:$4 sm:$0x11]  }
  0x18   : >> { %v572_v34 = vrot.slane %v992_v27, 1  ;;  %v368_v37 = vsel %vm365_vm3, %v366_v25, %v367_v22  ;;  %v502_v39 = vshrl.u32 %v985_v19, 16  ;;  %v509_v41 = vshll.u32 %v1138_v28, 16  ;;  %v1011_v54 = vld [vmem:[%s1238_s10 + $0x18] sm:$0xe]  ;;  %v1145_v56 = vld [vmem:[%s1322_s1 + $0x40] sm:$0xff]  }
  0x19   : >> { %v252_v20 = vor.u32 %v251_v13, %v247_v10  ;;  %v710_v36 = vshll.u32 %v1007_v33, 16  ;;  %v506_v40 = vrot.slane %v504_v29, 1  ;;  %v708_v44 = vshrl.u32 %v1007_v33, 16  ;;  %s225_s30 = sadd.s32 1, %s1161_s30  }
  0x1a   : >> { %v574_v42 = vsel %vm365_vm3, %v572_v34, %v573_v32  ;;  %v715_v46 = vshll.u32 %v1144_v35, 16  ;;  %v511_v48 = vrot.slane %v509_v41, 1  ;;  %v1014_v57 = vcombine.low %v1011_v54, %v1003_v31  ;;  %v1033_v41 = vld [vmem:[%s843_s5] sm:$0xff]   ;;  %p222_p4 = scmp.ge.s32.totalorder %s225_s30, 16  }
  0x1b   : >> { %v257_v24 = vsel %vm245_vm2, %v252_v20, %v256_v14  ;;  %v712_v45 = vrot.slane %v710_v36, 1  ;;  %v507_v47 = vor.u32 %v506_v40, %v502_v39  ;;  %v779_v59 = vrot.slane %v1144_v35, 1 }
  0x1c   : >> { %1057 = vmatmul.mubr.msk.bf16.vlgmr.msra.gmra.mxu0 %vm264_vm1, %v257_v24  ;;  %v717_v50 = vrot.slane %v715_v46, 1  ;;  %v778_v58 = vrot.slane %v1014_v57, 1  ;;  %v1034_v46 = vunpack.c.l.bf16 %v1033_v41 }
  0x1d   : >> { %1067 = vmatpush3.bf16.msra.mxu0 %v1131_v18  ;;  %1068 = vmatprep.mubr.msk.bf16.mxu0 %vm1164_vm0, %v1163_v2  ;;  %v713_v49 = vor.u32 %v712_v45, %v708_v44  ;;  %v512_v51 = vsel %vm245_vm2, %v507_v47, %v511_v48 }
  0x1e   : >> { %1078 = vmatprep.subr.bf16.mxu0 %v1163_v2  ;;  %1075 = vmatmul.mubr.msk.bf16.vlgmr.msra.gmra.mxu1 %vm264_vm1, %v1134_v23  ;;  %v780_v60 = vsel %vm365_vm3, %v778_v58, %v779_v59 }
  0x1f   : >> { %1085 = vmatpush3.bf16.msra.mxu1 %v1136_v26  ;;  %1086 = vmatprep.mubr.msk.bf16.mxu1 %vm1164_vm0, %v1163_v2  ;;  %v718_v53 = vsel %vm245_vm2, %v713_v49, %v717_v50 }
  0x20   : >> { %1096 = vmatprep.subr.bf16.mxu1 %v1163_v2 }
  0x24   : >> { %1069 = vmatmul.mubr.msk.bf16.vlgmr.msra.gmra.mxu0 %vm264_vm1, %v368_v37 }
  0x25   : >> { %1079 = vmatpush3.bf16.msra.mxu0 %v1135_v38  ;;  %1080 = vmatprep.mubr.msk.bf16.mxu0 %vm1164_vm0, %v1163_v2 }
  0x26   : >> { %1090 = vmatprep.subr.bf16.mxu0 %v1163_v2  ;;  %1087 = vmatmul.mubr.msk.bf16.vlgmr.msra.gmra.mxu1 %vm264_vm1, %v574_v42 }
  0x27   : >> { %1097 = vmatpush3.bf16.msra.mxu1 %v1141_v43  ;;  %1098 = vmatprep.mubr.msk.bf16.mxu1 %vm1164_vm0, %v1163_v2 }
  0x2c   : >> { %1081 = vmatmul.mubr.msk.bf16.vlgmr.msra.gmra.mxu0 %vm264_vm1, %v512_v51 }
  0x2d   : >> { %1091 = vmatpush3.bf16.msra.mxu0 %v1140_v52  ;;  %1092 = vmatprep.mubr.msk.bf16.mxu0 %vm1164_vm0, %v1163_v2 }
  0x2e   : >> { %1102 = vmatprep.subr.bf16.mxu0 %v1163_v2  ;;  %1099 = vmatmul.mubr.msk.bf16.vlgmr.msra.gmra.mxu1 %vm264_vm1, %v718_v53  ;;  %v1035_v53 = vunpack.c.h.bf16 %v1033_v41 }
  0x34   : >> { %1093 = vmatmul.mubr.msk.bf16.vlgmr.msra.gmra.mxu0 %vm264_vm1, %v1142_v55 }
  0x35   : >> { %1103 = vmatpush3.bf16.msra.mxu0 %v1145_v56  ;;  %1104 = vmatprep.mubr.msk.bf16.mxu0 %vm1164_vm0, %v1163_v2 }
  0x3c   : >> { %1105 = vmatmul.mubr.msk.bf16.vlgmr.msra.gmra.mxu0 %vm264_vm1, %v780_v60 }
  0xd5   : >> { %v351_v61 = vpop.f32.mrf.mxu1 }
  0xd7   : >> { %v1064_v62 = vpop.f32.mrf.mxu1 }
  0xd9   : >> { %v354_v63 = vpop.f32.mrf.mxu1 }
  0xdb   : >> { %v1065_v1 = vpop.f32.mrf.mxu1 }
  0xdc   : >> { %v302_v3 = vpop.f32.mrf.mxu0 }
  0xdd   : >> { %v352_v15 = vadd.f32 %v351_v61, %v302_v3 }
  0xde   : >> { %v1058_v4 = vpop.f32.mrf.mxu0  ;;  %v478_v5 = vpop.f32.mrf.mxu1 }
  0xe0   : >> { %v305_v6 = vpop.f32.mrf.mxu0  ;;  %v1076_v7 = vpop.f32.mrf.mxu1 }
  0xe1   : >> { %v355_v21 = vadd.f32 %v354_v63, %v305_v6 }
  0xe2   : >> { %v1059_v8 = vpop.f32.mrf.mxu0  ;;  %v481_v9 = vpop.f32.mrf.mxu1 }
  0xe4   : >> { %v412_v10 = vpop.f32.mrf.mxu0  ;;  %v1077_v11 = vpop.f32.mrf.mxu1 }
  0xe5   : >> { %v419_v18 = vadd.f32 %v412_v10, %v352_v15 }
  0xe6   : >> { %v1070_v2 = vpop.f32.mrf.mxu0  ;;  %v618_v12 = vpop.f32.mrf.mxu1 }
  0xe7   : >> { %v485_v24 = vadd.f32 %v478_v5, %v419_v18 }
  0xe8   : >> { %v415_v13 = vpop.f32.mrf.mxu0  ;;  %v1088_v14 = vpop.f32.mrf.mxu1 }
  0xe9   : >> { %v420_v25 = vadd.f32 %v415_v13, %v355_v21 }
  0xea   : >> { %v1071_v16 = vpop.f32.mrf.mxu0  ;;  %v621_v17 = vpop.f32.mrf.mxu1 }
  0xeb   : >> { %v486_v31 = vadd.f32 %v481_v9, %v420_v25 }
  0xec   : >> { %v556_v19 = vpop.f32.mrf.mxu0  ;;  %v1089_v20 = vpop.f32.mrf.mxu1 }
  0xed   : >> { %v563_v28 = vadd.f32 %v556_v19, %v485_v24 }
  0xee   : >> { %v1082_v22 = vpop.f32.mrf.mxu0  ;;  %v762_v23 = vpop.f32.mrf.mxu1 }
  0xef   : >> { %v625_v34 = vadd.f32 %v618_v12, %v563_v28 }
  0xf0   : >> { %v559_v26 = vpop.f32.mrf.mxu0  ;;  %v1100_v27 = vpop.f32.mrf.mxu1 }
  0xf1   : >> { %v564_v35 = vadd.f32 %v559_v26, %v486_v31 }
  0xf2   : >> { %v1083_v29 = vpop.f32.mrf.mxu0  ;;  %v765_v30 = vpop.f32.mrf.mxu1 }
  0xf3   : >> { %v626_v39 = vadd.f32 %v621_v17, %v564_v35 }
  0xf4   : >> { %v684_v32 = vpop.f32.mrf.mxu0  ;;  %v1101_v33 = vpop.f32.mrf.mxu1 }
  0xf5   : >> { %v691_v37 = vadd.f32 %v684_v32, %v625_v34 }
  0xf6   : >> { %v1094_v36 = vpop.f32.mrf.mxu0 }
  0xf7   : >> { %v769_v42 = vadd.f32 %v762_v23, %v691_v37 }
  0xf8   : >> { %v687_v38 = vpop.f32.mrf.mxu0 }
  0xf9   : >> { %v692_v43 = vadd.f32 %v687_v38, %v626_v39 }
  0xfa   : >> { %v1095_v40 = vpop.f32.mrf.mxu0 }
  0xfb   : >> { %v770_v48 = vadd.f32 %v765_v30, %v692_v43 }
  0xfc   : >> { %v824_v44 = vpop.f32.mrf.mxu0 }
  0xfd   : >> { %v831_v45 = vadd.f32 %v824_v44, %v769_v42 }
  0xfe   : >> { %v1106_v47 = vpop.f32.mrf.mxu0 }
  0xff   : >> { %v839_v49 = vadd.f32 %v1201_v0, %v831_v45 }
 0x100   : >> { %v827_v50 = vpop.f32.mrf.mxu0 }
 0x101   : >> { %v848_v51 = vadd.f32 %v1034_v46, %v839_v49  ;;  %v832_v52 = vadd.f32 %v827_v50, %v770_v48 }
 0x102   : >> { %v1107_v54 = vpop.f32.mrf.mxu0 }
 0x103   : >> { %v850_v55 = vmax.f32 %v848_v51, 0.0  ;;  %v840_v56 = vadd.f32 %v1201_v0, %v832_v52 }
 0x105   : >> { %v1029_v57 = vpack.c.bf16 %v850_v55, %v850_v55  ;;  %v849_v58 = vadd.f32 %v1035_v53, %v840_v56 }
 0x107   : >> { %863 = vst.msk [vmem:[%s861_s6] sm:$0xf] %vm862_vm4, %v1029_v57  ;;  %v851_v59 = vmax.f32 %v849_v58, 0.0  ;;  %224 = sbr.rel (!%p222_p4) target bundleno = 15 (0xf), region = 89 }
 0x109   : >> { %v1030_v60 = vpack.c.bf16 %v851_v59, %v851_v59 }
 0x10b   : >> { %864 = vst.msk [vmem:[%s861_s6 + $0x4] sm:$0xf] %vm862_vm4, %v1030_v60 }
 0x10c PF: > { %s14_s15 = sadd.s32 1, %s1157_s15  }
 0x10d   : > { %p11_p5 = scmp.ge.s32.totalorder %s14_s15, 4  }
 0x10f   :  { %13 = sbr.rel (!%p11_p5) target bundleno = 1 (0x1), region = 100 }

// kernel: _lambda_.15
= control target key start
LH: loop header
LB: loop body
LE: loop exit
PB: predicated region body
PF: predicated region fallthrough
CT: control target
= control target key end

     0   :  { %s1249_s21 = smov 0   ;;  %s1379_s0 = inlined_call_operand.vmem [shape: bf16[2,36,9,16], index: 0, kind: input, shape index: {}]   ;;  %s1380_s1 = inlined_call_operand.vmem [shape: bf16[9,16,32], index: 1, kind: input, shape index: {}]   ;;  %s1381_s2 = inlined_call_operand.vmem [shape: f32[1,32], index: 2, kind: input, shape index: {}, may-alias: {2,4}]   ;;  %s1382_s3 = inlined_call_operand.vmem [shape: bf16[16,32], index: 3, kind: input, shape index: {}]   ;;  %s1383_s4 = inlined_call_operand.vmem [shape: f32[1,32], index: 4, kind: input, shape index: {}, may-alias: {2,4}]   ;;  %s1384_s5 = inlined_call_operand.vmem [shape: bf16[2,8,8,32], index: 5, kind: output, shape index: {0}]   ;;  %s1385_s6 = inlined_call_operand.vmem [shape: bf16[2,8,8,32], index: 6, kind: output, shape index: {1}]  }
   0x1 LB: > { %s1009_s22 = sadd.s32 4294967295, %s1206_s21   ;;  %p1013_p0 = scmp.ge.s32.totalorder %s1206_s21, 1  ;;  %s1206_s21 = sphi %s1249_s21, %s17_s21  }
   0x2   : > { %p215_p1 = scmp.lt.s32.totalorder %s1206_s21, 3 }
   0x4   : > { %p216_p2 = pnand %p1013_p0, %p215_p1 }
   0x5   : > { %p250_p3 = scmp.lt.s32.totalorder (!%p216_p2), %s1009_s22, 1  ;;  %s1277_s12 = smov (!%p216_p2), 0  }
   0x6   : > { %219 = sbr.rel (%p216_p2) target bundleno = 254 (0xfe), region = 40 }
   0xb   : > { %v1260_v0 = vld [vmem:[%s1381_s2] ss:$0 sm:$0xff]  ;;  %s1387_s22 = smov (!%p250_p3, %s1009_s22), 1 }
   0xc   : > { %s1164_s25 = smul.u32 288, %s1387_s22  ;;  %s1081_s26 = sshll.u32 %s1387_s22, 5 }
   0xd   : > { %s1265_s29 = scalar_lea.vmem %s1384_s5, %s1081_s26  ;;  %s1270_s8 = scalar_lea.vmem %s1385_s6, %s1081_s26 }
   0xe   : > { %s1275_s11 = scalar_lea.vmem %s1379_s0, %s1164_s25 }
   0xf LB: >> { %v1183_v1 = vld [vmem:[%s1380_s1 + $0x8] sm:$0xff]   ;;  %v1212_v2 = vmov 0.0   ;;  %v1184_v3 = vld [vmem:[%s1380_s1] sm:$0xff]   ;;  %vm1213_vm0 = vmmov 0   ;;  %s1083_s17 = sshll.u32 %s1210_s12, 3  ;;  %vm293_vm1 = vcmask 130048   ;;  %s1210_s12 = sphi %s1277_s12, %s272_s12  }
  0x10   : >> { %1104 = vmatprep.subr.bf16.mxu0 %v1212_v2  ;;  %1110 = vmatprep.subr.bf16.mxu1 %v1212_v2  ;;  %s1296_s18 = scalar_lea.vmem %s1275_s11, %s1083_s17  ;;  %v1185_v4 = vld [vmem:[%s1380_s1 + $0x10] sm:$0xff]   ;;  %v1186_v7 = vld [vmem:[%s1380_s1 + $0x18] sm:$0xff]   ;;  %v1188_v12 = vld [vmem:[%s1380_s1 + $0x20] sm:$0xff]   ;;  %vm830_vm2 = vcmask 257024  }
  0x11   : >> { %1105 = vmatpush3.bf16.msra.mxu0 %v1183_v1  ;;  %1106 = vmatprep.mubr.msk.bf16.mxu0 %vm1213_vm0, %v1212_v2  ;;  %v1022_v5 = vld [vmem:[%s1296_s18 + $0x48] sm:$0xf]  ;;  %v276_v6 = vld [vmem:[%s1296_s18] sm:$0xf]  ;;  %v1190_v13 = vld [vmem:[%s1296_s18 + $0x90] sm:$0x1f]  }
  0x12   : >> { %1111 = vmatpush3.bf16.msra.mxu1 %v1184_v3  ;;  %1112 = vmatprep.mubr.msk.bf16.mxu1 %vm1213_vm0, %v1212_v2  ;;  %v1187_v8 = vld [vmem:[%s1296_s18] sm:$0x1f]   ;;  %v1035_v15 = vld [vmem:[%s1296_s18 + $0x90] sm:$0xf]  ;;  %v1189_v16 = vld [vmem:[%s1380_s1 + $0x28] sm:$0xff]   ;;  %v582_v17 = vshll.u32 %v1190_v13, 16 }
  0x13   : >> { %1116 = vmatprep.subr.bf16.mxu0 %v1212_v2  ;;  %1122 = vmatprep.subr.bf16.mxu1 %v1212_v2  ;;  %v397_v9 = vshrl.u32 %v1187_v8, 16  ;;  %v399_v10 = vshll.u32 %v1187_v8, 16  ;;  %v580_v18 = vshrl.u32 %v1190_v13, 16  ;;  %v1041_v20 = vld [vmem:[%s1296_s18 + $0xd8] sm:$0xf]  ;;  %v1191_v22 = vld [vmem:[%s1380_s1 + $0x30] sm:$0xff]  }
  0x14   : >> { %1107 = vmatmul.mubr.msk.bf16.vlgmr.msra.gmra.mxu0 %vm293_vm1, %v1022_v5  ;;  %v584_v19 = vrot.slane %v582_v17, 1  ;;  %v1192_v23 = vld [vmem:[%s1380_s1 + $0x38] sm:$0xff]   ;;  %v1195_v24 = vld [vmem:[%s1296_s18 + $0x8] sm:$0x1f]   ;;  %v1193_v27 = vld [vmem:[%s1380_s1 + $0x40] sm:$0xff]  }
  0x15   : >> { %1113 = vmatmul.mubr.msk.bf16.vlgmr.msra.gmra.mxu1 %vm293_vm1, %v276_v6  ;;  %1117 = vmatpush3.bf16.msra.mxu0 %v1185_v4  ;;  %v401_v11 = vrot.slane %v399_v10, 1  ;;  %v765_v25 = vshll.u32 %v1195_v24, 16  ;;  %v1054_v26 = vld [vmem:[%s1296_s18 + $0x8] sm:$0xf]  ;;  %v1060_v28 = vld [vmem:[%s1296_s18 + $0x50] sm:$0xf] }
  0x16   : >> { %1123 = vmatpush3.bf16.msra.mxu1 %v1186_v7  ;;  %1118 = vmatprep.mubr.msk.bf16.mxu0 %vm1213_vm0, %v1212_v2  ;;  %v585_v21 = vor.u32 %v584_v19, %v580_v18  ;;  %v1194_v29 = vld [vmem:[%s1382_s3] sm:$0xff]   ;;  %v763_v30 = vshrl.u32 %v1195_v24, 16  ;;  %v1074_v33 = vld [vmem:[%s1296_s18 + $0xd8] sm:$0xf]  ;;  %s1073_s18 = sshll.u32 %s1210_s12, 2  ;;  %s272_s12 = sadd.s32 1, %s1210_s12  }
  0x17   : >> { %1124 = vmatprep.mubr.msk.bf16.mxu1 %vm1213_vm0, %v1212_v2  ;;  %1128 = vmatprep.subr.bf16.mxu0 %v1212_v2  ;;  %v402_v14 = vor.u32 %v401_v11, %v397_v9  ;;  %v767_v31 = vrot.slane %v765_v25, 1  ;;  %v1075_v10 = vld [vmem:[%s1383_s4] ss:$0 sm:$0xff]  ;;  %s893_s19 = scalar_lea.vmem %s1270_s8, %s1073_s18  ;;  %s829_s20 = scalar_lea.vmem %s1265_s29, %s1073_s18 }
  0x18   : >> { %1134 = vmatprep.subr.bf16.mxu1 %v1212_v2  ;;  %p269_p4 = scmp.ge.s32.totalorder %s272_s12, 8  }
  0x19   : >> { %v768_v32 = vor.u32 %v767_v31, %v763_v30 }
  0x1c   : >> { %1119 = vmatmul.mubr.msk.bf16.vlgmr.msra.gmra.mxu0 %vm293_vm1, %v402_v14 }
  0x1d   : >> { %1125 = vmatmul.mubr.msk.bf16.vlgmr.msra.gmra.mxu1 %vm293_vm1, %v1035_v15  ;;  %1129 = vmatpush3.bf16.msra.mxu0 %v1188_v12 }
  0x1e   : >> { %1135 = vmatpush3.bf16.msra.mxu1 %v1189_v16  ;;  %1130 = vmatprep.mubr.msk.bf16.mxu0 %vm1213_vm0, %v1212_v2 }
  0x1f   : >> { %1136 = vmatprep.mubr.msk.bf16.mxu1 %vm1213_vm0, %v1212_v2  ;;  %1140 = vmatprep.subr.bf16.mxu0 %v1212_v2 }
  0x20   : >> { %1146 = vmatprep.subr.bf16.mxu1 %v1212_v2 }
  0x24   : >> { %1131 = vmatmul.mubr.msk.bf16.vlgmr.msra.gmra.mxu0 %vm293_vm1, %v1041_v20 }
  0x25   : >> { %1137 = vmatmul.mubr.msk.bf16.vlgmr.msra.gmra.mxu1 %vm293_vm1, %v585_v21  ;;  %1141 = vmatpush3.bf16.msra.mxu0 %v1191_v22 }
  0x26   : >> { %1147 = vmatpush3.bf16.msra.mxu1 %v1192_v23  ;;  %1142 = vmatprep.mubr.msk.bf16.mxu0 %vm1213_vm0, %v1212_v2 }
  0x27   : >> { %1148 = vmatprep.mubr.msk.bf16.mxu1 %vm1213_vm0, %v1212_v2  ;;  %1152 = vmatprep.subr.bf16.mxu0 %v1212_v2 }
  0x28   : >> { %1158 = vmatprep.subr.bf16.mxu1 %v1212_v2 }
  0x2c   : >> { %1143 = vmatmul.mubr.msk.bf16.vlgmr.msra.gmra.mxu0 %vm293_vm1, %v1054_v26 }
  0x2d   : >> { %1149 = vmatmul.mubr.msk.bf16.vlgmr.msra.gmra.mxu1 %vm293_vm1, %v1060_v28  ;;  %1153 = vmatpush3.bf16.msra.mxu0 %v1193_v27 }
  0x2e   : >> { %1159 = vmatpush3.bf16.msra.mxu1 %v1194_v29  ;;  %1154 = vmatprep.mubr.msk.bf16.mxu0 %vm1213_vm0, %v1212_v2 }
  0x2f   : >> { %1160 = vmatprep.mubr.msk.bf16.mxu1 %vm1213_vm0, %v1212_v2 }
  0x34   : >> { %1155 = vmatmul.mubr.msk.bf16.vlgmr.msra.gmra.mxu0 %vm293_vm1, %v768_v32 }
  0x35   : >> { %1161 = vmatmul.mubr.msk.bf16.vlgmr.msra.gmra.mxu1 %vm293_vm1, %v1074_v33 }
  0xd4   : >> { %v331_v34 = vpop.f32.mrf.mxu0 }
  0xd5   : >> { %v380_v35 = vpop.f32.mrf.mxu1 }
  0xd6   : >> { %v1108_v36 = vpop.f32.mrf.mxu0  ;;  %v381_v47 = vadd.f32 %v380_v35, %v331_v34 }
  0xd7   : >> { %v1114_v37 = vpop.f32.mrf.mxu1 }
  0xd8   : >> { %v334_v38 = vpop.f32.mrf.mxu0 }
  0xd9   : >> { %v383_v39 = vpop.f32.mrf.mxu1 }
  0xda   : >> { %v1109_v40 = vpop.f32.mrf.mxu0 }
  0xdb   : >> { %v1115_v41 = vpop.f32.mrf.mxu1 }
  0xdc   : >> { %v446_v42 = vpop.f32.mrf.mxu0 }
  0xdd   : >> { %v504_v43 = vpop.f32.mrf.mxu1  ;;  %v452_v50 = vadd.f32 %v446_v42, %v381_v47 }
  0xde   : >> { %v1120_v44 = vpop.f32.mrf.mxu0 }
  0xdf   : >> { %v1126_v45 = vpop.f32.mrf.mxu1  ;;  %v510_v55 = vadd.f32 %v504_v43, %v452_v50 }
  0xe0   : >> { %v449_v46 = vpop.f32.mrf.mxu0 }
  0xe1   : >> { %v507_v48 = vpop.f32.mrf.mxu1 }
  0xe2   : >> { %v1121_v49 = vpop.f32.mrf.mxu0 }
  0xe3   : >> { %v1127_v51 = vpop.f32.mrf.mxu1 }
  0xe4   : >> { %v562_v52 = vpop.f32.mrf.mxu0 }
  0xe5   : >> { %v629_v53 = vpop.f32.mrf.mxu1  ;;  %v568_v58 = vadd.f32 %v562_v52, %v510_v55 }
  0xe6   : >> { %v1132_v54 = vpop.f32.mrf.mxu0 }
  0xe7   : >> { %v1138_v56 = vpop.f32.mrf.mxu1  ;;  %v635_v63 = vadd.f32 %v629_v53, %v568_v58 }
  0xe8   : >> { %v565_v57 = vpop.f32.mrf.mxu0 }
  0xe9   : >> { %v632_v59 = vpop.f32.mrf.mxu1 }
  0xea   : >> { %v1133_v60 = vpop.f32.mrf.mxu0 }
  0xeb   : >> { %v1139_v61 = vpop.f32.mrf.mxu1 }
  0xec   : >> { %v687_v62 = vpop.f32.mrf.mxu0 }
  0xed   : >> { %v745_v1 = vpop.f32.mrf.mxu1  ;;  %v693_v3 = vadd.f32 %v687_v62, %v635_v63 }
  0xee   : >> { %v1144_v2 = vpop.f32.mrf.mxu0 }
  0xef   : >> { %v1150_v4 = vpop.f32.mrf.mxu1  ;;  %v751_v8 = vadd.f32 %v745_v1, %v693_v3 }
  0xf0   : >> { %v690_v5 = vpop.f32.mrf.mxu0 }
  0xf1   : >> { %v748_v6 = vpop.f32.mrf.mxu1 }
  0xf2   : >> { %v1145_v7 = vpop.f32.mrf.mxu0 }
  0xf3   : >> { %v1151_v9 = vpop.f32.mrf.mxu1 }
  0xf4   : >> { %v812_v11 = vpop.f32.mrf.mxu0 }
  0xf5   : >> { %v818_v12 = vadd.f32 %v812_v11, %v751_v8  ;;  %v885_v13 = vpop.f32.mrf.mxu1 }
  0xf6   : >> { %v886_v14 = vadd.f32 %v1075_v10, %v885_v13  ;;  %v1156_v15 = vpop.f32.mrf.mxu0 }
  0xf7   : >> { %v825_v16 = vadd.f32 %v1260_v0, %v818_v12  ;;  %v1162_v17 = vpop.f32.mrf.mxu1 }
  0xf8   : >> { %v891_v18 = vpack.c.bf16 %v886_v14, %v886_v14  ;;  %v815_v19 = vpop.f32.mrf.mxu0 }
  0xf9   : >> { %v826_v20 = vmax.f32 %v825_v16, 0.0  ;;  %v888_v21 = vpop.f32.mrf.mxu1  ;;  %271 = sbr.rel (!%p269_p4) target bundleno = 15 (0xf), region = 105 }
  0xfa   : >> { %894 = vst.msk [vmem:[%s893_s19] sm:$0xf] %vm830_vm2, %v891_v18  ;;  %v1157_v22 = vpop.f32.mrf.mxu0 }
  0xfb   : >> { %v827_v23 = vpack.c.bf16 %v826_v20, %v826_v20  ;;  %v1163_v24 = vpop.f32.mrf.mxu1 }
  0xfd   : >> { %831 = vst.msk [vmem:[%s829_s20] sm:$0xf] %vm830_vm2, %v827_v23 }
  0xfe PF: > { %s17_s21 = sadd.s32 1, %s1206_s21  }
  0xff   : > { %p14_p5 = scmp.ge.s32.totalorder %s17_s21, 4  }
 0x101   :  { %16 = sbr.rel (!%p14_p5) target bundleno = 1 (0x1), region = 116 }

// kernel: _lambda_.16
= control target key start
LH: loop header
LB: loop body
LE: loop exit
PB: predicated region body
PF: predicated region fallthrough
CT: control target
= control target key end

     0   :  { %s1225_s15 = smov 0   ;;  %s1382_s0 = inlined_call_operand.vmem [shape: bf16[2,10,10,32], index: 0, kind: input, shape index: {}]   ;;  %s1383_s1 = inlined_call_operand.vmem [shape: bf16[9,32,32], index: 1, kind: input, shape index: {}]   ;;  %s1384_s2 = inlined_call_operand.vmem [shape: f32[1,32], index: 2, kind: input, shape index: {}]   ;;  %s1385_s3 = inlined_call_operand.vmem [shape: bf16[2,8,8,32], index: 3, kind: input, shape index: {}]   ;;  %s1386_s4 = inlined_call_operand.vmem [shape: bf16[2,8,8,32], index: 4, kind: output, shape index: {}]  }
   0x1 LB: > { %s945_s16 = sadd.s32 4294967295, %s1192_s15   ;;  %p949_p0 = scmp.ge.s32.totalorder %s1192_s15, 1  ;;  %s1192_s15 = sphi %s1225_s15, %s14_s15  }
   0x2   : > { %p172_p1 = scmp.lt.s32.totalorder %s1192_s15, 3 }
   0x4   : > { %p173_p2 = pnand %p949_p0, %p172_p1 }
   0x5   : > { %p203_p3 = scmp.lt.s32.totalorder (!%p173_p2), %s945_s16, 1  ;;  %s1253_s30 = smov (!%p173_p2), 0  }
   0x6   : > { %176 = sbr.rel (%p173_p2) target bundleno = 263 (0x107), region = 36 }
   0xb   : > { %v1236_v0 = vld [vmem:[%s1384_s2] ss:$0 sm:$0xff]  ;;  %s1388_s16 = smov (!%p203_p3, %s945_s16), 1 }
   0xc   : > { %s1139_s19 = smul.u32 80, %s1388_s16  ;;  %s1037_s20 = sshll.u32 %s1388_s16, 5 }
   0xd   : > { %s1241_s23 = scalar_lea.vmem %s1385_s3, %s1037_s20  ;;  %s1246_s26 = scalar_lea.vmem %s1386_s4, %s1037_s20 }
   0xe   : > { %s1251_s29 = scalar_lea.vmem %s1382_s0, %s1139_s19 }
   0xf LB: >> { %v1158_v1 = vld [vmem:[%s1383_s1 + $0x18] sm:$0xff]   ;;  %v1198_v2 = vmov 0.0   ;;  %v1159_v3 = vld [vmem:[%s1383_s1 + $0x8] sm:$0xff]   ;;  %v1160_v4 = vld [vmem:[%s1383_s1 + $0x10] sm:$0xff]   ;;  %vm1199_vm0 = vmmov 0   ;;  %s1039_s11 = sshll.u32 %s1196_s30, 3  ;;  %s1196_s30 = sphi %s1253_s30, %s225_s30  }
  0x10   : >> { %1067 = vmatprep.subr.bf16.mxu0 %v1198_v2  ;;  %1075 = vmatprep.subr.bf16.mxu1 %v1198_v2  ;;  %v1161_v5 = vld [vmem:[%s1383_s1] sm:$0xff]   ;;  %s1277_s14 = scalar_lea.vmem %s1251_s29, %s1039_s11  ;;  %vm264_vm1 = vcmask 261120   ;;  %v1164_v11 = vld [vmem:[%s1383_s1 + $0x38] sm:$0xff]   ;;  %v1163_v13 = vld [vmem:[%s1383_s1 + $0x28] sm:$0xff]   ;;  %vm859_vm2 = vcmask 257024  }
  0x11   : >> { %1068 = vmatpush3.bf16.msra.mxu0 %v1158_v1  ;;  %1071 = vmatprep.mubr.msk.bf16.mxu0 %vm1199_vm0, %v1198_v2  ;;  %v229_v6 = vld [vmem:[%s1277_s14] sm:$0xf]  ;;  %v234_v7 = vld [vmem:[%s1277_s14 + $0x4] sm:$0x1]  ;;  %v1166_v16 = vld [vmem:[%s1383_s1 + $0x30] sm:$0xff]  }
  0x12   : >> { %1076 = vmatpush3.bf16.msra.mxu1 %v1159_v3  ;;  %1069 = vmatprep.subr.bf16.mxu0 %v1198_v2  ;;  %v961_v8 = vcombine.low %v229_v6, %v234_v7  ;;  %v363_v14 = vld [vmem:[%s1277_s14] sm:$0xe]  ;;  %v977_v19 = vld [vmem:[%s1277_s14 + $0x8] sm:$0xf]  ;;  %v986_v21 = vld [vmem:[%s1277_s14 + $0xc] sm:$0x1] }
  0x13   : >> { %1077 = vmatprep.subr.bf16.mxu1 %v1198_v2  ;;  %1079 = vmatprep.mubr.msk.bf16.mxu1 %vm1199_vm0, %v1198_v2  ;;  %v1165_v17 = vld [vmem:[%s1383_s1 + $0x20] sm:$0xff]   ;;  %v972_v18 = vcombine.low %v363_v14, %v234_v7  ;;  %v985_v20 = vld [vmem:[%s1277_s14 + $0x8] sm:$0xf]  ;;  %v1169_v22 = vld [vmem:[%s1383_s1 + $0x58] sm:$0xff]  }
  0x14   : >> { %v246_v9 = vshrl.u32 %v961_v8, 16  ;;  %v248_v10 = vshll.u32 %v961_v8, 16  ;;  %v991_v23 = vcombine.low %v985_v20, %v986_v21  ;;  %v995_v24 = vld [vmem:[%s1277_s14 + $0x8] sm:$0xe]  ;;  %v1171_v28 = vld [vmem:[%s1383_s1 + $0x50] sm:$0xff]   ;;  %v1170_v35 = vld [vmem:[%s1383_s1 + $0x40] sm:$0xff]  }
  0x15   : >> { %1070 = vmatpush3.bf16.msra.mxu0 %v1160_v4  ;;  %v372_v25 = vrot.slane %v972_v18, 1  ;;  %v1168_v27 = vld [vmem:[%s1383_s1 + $0x48] sm:$0xff]   ;;  %v1000_v29 = vcombine.low %v995_v24, %v986_v21  ;;  %v1013_v30 = vld [vmem:[%s1277_s14 + $0x10] sm:$0xf]  ;;  %v1014_v31 = vld [vmem:[%s1277_s14 + $0x14] sm:$0x1] }
  0x16   : >> { %1078 = vmatpush3.bf16.msra.mxu1 %v1161_v5  ;;  %1083 = vmatprep.subr.bf16.mxu0 %v1198_v2  ;;  %v250_v12 = vrot.slane %v248_v10, 1  ;;  %v510_v26 = vshll.u32 %v991_v23, 16  ;;  %v1019_v32 = vcombine.low %v1013_v30, %v1014_v31  ;;  %v508_v33 = vshrl.u32 %v991_v23, 16  ;;  %v1175_v38 = vld [vmem:[%s1383_s1 + $0x78] sm:$0xff]   ;;  %v1174_v40 = vld [vmem:[%s1383_s1 + $0x68] sm:$0xff]   ;;  %v1177_v43 = vld [vmem:[%s1383_s1 + $0x70] sm:$0xff]  }
  0x17   : >> { %1091 = vmatprep.subr.bf16.mxu1 %v1198_v2  ;;  %v579_v36 = vrot.slane %v1000_v29, 1  ;;  %v1176_v44 = vld [vmem:[%s1383_s1 + $0x60] sm:$0xff]   ;;  %v1005_v46 = vld [vmem:[%s1277_s14 + $0x10] sm:$0xf]  ;;  %v1179_v47 = vld [vmem:[%s1383_s1 + $0x88] sm:$0xff]  }
  0x18   : >> { %v251_v15 = vor.u32 %v250_v12, %v246_v9  ;;  %v512_v34 = vrot.slane %v510_v26, 1  ;;  %v717_v37 = vshll.u32 %v1019_v32, 16  ;;  %v715_v41 = vshrl.u32 %v1019_v32, 16  ;;  %v1023_v48 = vld [vmem:[%s1277_s14 + $0x10] sm:$0xe]  ;;  %v1180_v50 = vld [vmem:[%s1383_s1 + $0x80] sm:$0xff]  }
  0x19   : >> { %1080 = vmatmul.mubr.msk.bf16.vlgmr.msra.gmra.mxu1 %vm264_vm1, %v229_v6  ;;  %v1028_v49 = vcombine.low %v1023_v48, %v1014_v31  ;;  %s1033_s14 = sshll.u32 %s1196_s30, 2  ;;  %s225_s30 = sadd.s32 1, %s1196_s30  }
  0x1a   : >> { %1092 = vmatpush3.bf16.msra.mxu1 %v1164_v11  ;;  %1095 = vmatprep.mubr.msk.bf16.mxu1 %vm1199_vm0, %v1198_v2  ;;  %v513_v39 = vor.u32 %v512_v34, %v508_v33  ;;  %v719_v42 = vrot.slane %v717_v37, 1  ;;  %s851_s25 = scalar_lea.vmem %s1241_s23, %s1033_s14  ;;  %s858_s27 = scalar_lea.vmem %s1246_s26, %s1033_s14 }
  0x1b   : >> { %1093 = vmatprep.subr.bf16.mxu1 %v1198_v2  ;;  %1072 = vmatmul.mubr.msk.bf16.vlgmr.msra.gmra.mxu0 %vm264_vm1, %v251_v15  ;;  %v786_v51 = vrot.slane %v1028_v49, 1  ;;  %p222_p4 = scmp.ge.s32.totalorder %s225_s30, 8  }
  0x1c   : >> { %1084 = vmatpush3.bf16.msra.mxu0 %v1163_v13  ;;  %1087 = vmatprep.mubr.msk.bf16.mxu0 %vm1199_vm0, %v1198_v2  ;;  %v720_v45 = vor.u32 %v719_v42, %v715_v41 }
  0x1d   : >> { %1085 = vmatprep.subr.bf16.mxu0 %v1198_v2 }
  0x1e   : >> { %1094 = vmatpush3.bf16.msra.mxu1 %v1166_v16 }
  0x1f   : >> { %1107 = vmatprep.subr.bf16.mxu1 %v1198_v2 }
  0x20   : >> { %1086 = vmatpush3.bf16.msra.mxu0 %v1165_v17 }
  0x21   : >> { %1096 = vmatmul.mubr.msk.bf16.vlgmr.msra.gmra.mxu1 %vm264_vm1, %v977_v19  ;;  %1099 = vmatprep.subr.bf16.mxu0 %v1198_v2 }
  0x22   : >> { %1108 = vmatpush3.bf16.msra.mxu1 %v1169_v22  ;;  %1111 = vmatprep.mubr.msk.bf16.mxu1 %vm1199_vm0, %v1198_v2 }
  0x23   : >> { %1109 = vmatprep.subr.bf16.mxu1 %v1198_v2  ;;  %1088 = vmatmul.mubr.msk.bf16.vlgmr.msra.gmra.mxu0 %vm264_vm1, %v372_v25 }
  0x24   : >> { %1100 = vmatpush3.bf16.msra.mxu0 %v1168_v27  ;;  %1103 = vmatprep.mubr.msk.bf16.mxu0 %vm1199_vm0, %v1198_v2  ;;  %v852_v27 = vld [vmem:[%s851_s25] sm:$0xf] }
  0x25   : >> { %1101 = vmatprep.subr.bf16.mxu0 %v1198_v2  ;;  %v853_v31 = vunpack.c.l.bf16 %v852_v27 }
  0x26   : >> { %1110 = vmatpush3.bf16.msra.mxu1 %v1171_v28 }
  0x27   : >> { %1123 = vmatprep.subr.bf16.mxu1 %v1198_v2 }
  0x28   : >> { %1102 = vmatpush3.bf16.msra.mxu0 %v1170_v35 }
  0x29   : >> { %1112 = vmatmul.mubr.msk.bf16.vlgmr.msra.gmra.mxu1 %vm264_vm1, %v579_v36  ;;  %1115 = vmatprep.subr.bf16.mxu0 %v1198_v2 }
  0x2a   : >> { %1124 = vmatpush3.bf16.msra.mxu1 %v1175_v38  ;;  %1127 = vmatprep.mubr.msk.bf16.mxu1 %vm1199_vm0, %v1198_v2 }
  0x2b   : >> { %1125 = vmatprep.subr.bf16.mxu1 %v1198_v2  ;;  %1104 = vmatmul.mubr.msk.bf16.vlgmr.msra.gmra.mxu0 %vm264_vm1, %v513_v39 }
  0x2c   : >> { %1116 = vmatpush3.bf16.msra.mxu0 %v1174_v40  ;;  %1119 = vmatprep.mubr.msk.bf16.mxu0 %vm1199_vm0, %v1198_v2 }
  0x2d   : >> { %1117 = vmatprep.subr.bf16.mxu0 %v1198_v2 }
  0x2e   : >> { %1126 = vmatpush3.bf16.msra.mxu1 %v1177_v43 }
  0x30   : >> { %1118 = vmatpush3.bf16.msra.mxu0 %v1176_v44 }
  0x31   : >> { %1128 = vmatmul.mubr.msk.bf16.vlgmr.msra.gmra.mxu1 %vm264_vm1, %v720_v45  ;;  %1131 = vmatprep.subr.bf16.mxu0 %v1198_v2 }
  0x33   : >> { %1120 = vmatmul.mubr.msk.bf16.vlgmr.msra.gmra.mxu0 %vm264_vm1, %v1005_v46 }
  0x34   : >> { %1132 = vmatpush3.bf16.msra.mxu0 %v1179_v47  ;;  %1135 = vmatprep.mubr.msk.bf16.mxu0 %vm1199_vm0, %v1198_v2 }
  0x35   : >> { %1133 = vmatprep.subr.bf16.mxu0 %v1198_v2 }
  0x38   : >> { %1134 = vmatpush3.bf16.msra.mxu0 %v1180_v50 }
  0x3b   : >> { %1136 = vmatmul.mubr.msk.bf16.vlgmr.msra.gmra.mxu0 %vm264_vm1, %v786_v51 }
  0xd9   : >> { %v357_v52 = vpop.f32.mrf.mxu1 }
  0xdb   : >> { %v1081_v53 = vpop.f32.mrf.mxu1  ;;  %v302_v54 = vpop.f32.mrf.mxu0 }
  0xdc   : >> { %v358_v2 = vadd.f32 %v357_v52, %v302_v54 }
  0xdd   : >> { %v360_v55 = vpop.f32.mrf.mxu1  ;;  %v1073_v56 = vpop.f32.mrf.mxu0 }
  0xdf   : >> { %v1082_v57 = vpop.f32.mrf.mxu1  ;;  %v305_v58 = vpop.f32.mrf.mxu0 }
  0xe1   : >> { %v488_v59 = vpop.f32.mrf.mxu1  ;;  %v1074_v60 = vpop.f32.mrf.mxu0 }
  0xe3   : >> { %v1097_v61 = vpop.f32.mrf.mxu1  ;;  %v422_v62 = vpop.f32.mrf.mxu0 }
  0xe4   : >> { %v428_v7 = vadd.f32 %v422_v62, %v358_v2 }
  0xe5   : >> { %v491_v63 = vpop.f32.mrf.mxu1  ;;  %v1089_v1 = vpop.f32.mrf.mxu0 }
  0xe6   : >> { %v494_v12 = vadd.f32 %v488_v59, %v428_v7 }
  0xe7   : >> { %v1098_v3 = vpop.f32.mrf.mxu1  ;;  %v425_v4 = vpop.f32.mrf.mxu0 }
  0xe9   : >> { %v629_v5 = vpop.f32.mrf.mxu1  ;;  %v1090_v6 = vpop.f32.mrf.mxu0 }
  0xeb   : >> { %v1113_v8 = vpop.f32.mrf.mxu1  ;;  %v563_v9 = vpop.f32.mrf.mxu0 }
  0xec   : >> { %v569_v15 = vadd.f32 %v563_v9, %v494_v12 }
  0xed   : >> { %v632_v10 = vpop.f32.mrf.mxu1  ;;  %v1105_v11 = vpop.f32.mrf.mxu0 }
  0xee   : >> { %v635_v20 = vadd.f32 %v629_v5, %v569_v15 }
  0xef   : >> { %v1114_v13 = vpop.f32.mrf.mxu1  ;;  %v566_v14 = vpop.f32.mrf.mxu0 }
  0xf1   : >> { %v770_v16 = vpop.f32.mrf.mxu1  ;;  %v1106_v17 = vpop.f32.mrf.mxu0 }
  0xf3   : >> { %v1129_v18 = vpop.f32.mrf.mxu1  ;;  %v695_v19 = vpop.f32.mrf.mxu0 }
  0xf4   : >> { %v701_v23 = vadd.f32 %v695_v19, %v635_v20 }
  0xf5   : >> { %v773_v21 = vpop.f32.mrf.mxu1  ;;  %v1121_v22 = vpop.f32.mrf.mxu0 }
  0xf6   : >> { %v776_v28 = vadd.f32 %v770_v16, %v701_v23 }
  0xf7   : >> { %v1130_v24 = vpop.f32.mrf.mxu1  ;;  %v698_v25 = vpop.f32.mrf.mxu0 }
  0xf9   : >> { %v1122_v26 = vpop.f32.mrf.mxu0 }
  0xfb   : >> { %v836_v29 = vpop.f32.mrf.mxu0 }
  0xfc   : >> { %v842_v30 = vadd.f32 %v836_v29, %v776_v28 }
  0xfd   : >> { %v1137_v32 = vpop.f32.mrf.mxu0 }
  0xfe   : >> { %v849_v33 = vadd.f32 %v1236_v0, %v842_v30 }
  0xff   : >> { %v839_v34 = vpop.f32.mrf.mxu0 }
 0x100   : >> { %v854_v35 = vadd.f32 %v853_v31, %v849_v33 }
 0x101   : >> { %v1138_v36 = vpop.f32.mrf.mxu0 }
 0x102   : >> { %v855_v37 = vmax.f32 %v854_v35, 0.0  ;;  %224 = sbr.rel (!%p222_p4) target bundleno = 15 (0xf), region = 89 }
 0x104   : >> { %v856_v38 = vpack.c.bf16 %v855_v37, %v855_v37 }
 0x106   : >> { %860 = vst.msk [vmem:[%s858_s27] sm:$0xf] %vm859_vm2, %v856_v38 }
 0x107 PF: > { %s14_s15 = sadd.s32 1, %s1192_s15  }
 0x108   : > { %p11_p5 = scmp.ge.s32.totalorder %s14_s15, 4  }
 0x10a   :  { %13 = sbr.rel (!%p11_p5) target bundleno = 1 (0x1), region = 100 }

// kernel: _lambda_.19
= control target key start
LH: loop header
LB: loop body
LE: loop exit
PB: predicated region body
PF: predicated region fallthrough
CT: control target
= control target key end

     0   :  { %8 = vsyncpa [#allocation3], 0  ;;  %s635_s0 = inlined_call_operand.vmem [shape: bf16[2,4,4,64], index: 0, kind: input, shape index: {}]   ;;  %s636_s1 = inlined_call_operand.vmem [shape: f32[64,10], index: 1, kind: input, shape index: {}]   ;;  %s637_s2 = inlined_call_operand.vmem [shape: f32[1,10], index: 2, kind: input, shape index: {}]   ;;  %s638_s3 = inlined_call_operand.hbm [shape: f32[2,1,10], index: 3, kind: output, shape index: {}]  }
   0x1   :  { %10 = vsyncpa [#allocation3 + $0x1], 0  ;;  %s511_s12 = smov 0   ;;  %s513_s13 = smov 0  }
   0x2   :  { %s515_s14 = smov 0   ;;  %s517_s15 = smov 0  }
   0x3 LB: > { %s532_s16 = sadd.s32 4294967295, %s486_s15   ;;  %s346_s17 = sadd.s32 4294967294, %s486_s15   ;;  %s486_s15 = sphi %s517_s15, %s644_s15   ;;  %s482_s14 = sphi %s515_s14, %s643_s14   ;;  %s478_s13 = sphi %s513_s13, %s642_s13   ;;  %s474_s12 = sphi %s511_s12, %s641_s12  }
   0x4   : > { %s536_s18 = sadd.s32 1, %s486_s15   ;;  %s91_s19 = sadd.s32 1, %s482_s14 }
   0x5   : > { %s88_s20 = ssub.s32 %s486_s15, %s536_s18  ;;  %p101_p0 = scmp.ne.s32.totalorder %s482_s14, %s478_s13 }
   0x6   : > { %p89_p1 = scmp.eq.s32.totalorder %s88_s20, 0  ;;  %p102_p2 = scmp.eq.s32.totalorder %s532_s16, 1 }
   0x7   : > { %p107_p3 = scmp.ne.s32.totalorder %s478_s13, %s474_s12  ;;  %p108_p4 = scmp.eq.s32.totalorder %s346_s17, 1 }
   0x8   : > { %s547_s21 = scalar_select %p89_p1, %s482_s14, %s91_s19  }
   0x9   : > { %p549_p5 = por %p102_p2, %p101_p0  ;;  %p553_p6 = por %p108_p4, %p107_p3 }
   0xa   : > { %p349_p7 = scmp.ge.s32.totalorder %s486_s15, 1  ;;  %p140_p8 = scmp.lt.s32.totalorder %s486_s15, 3 }
   0xc   : > { %p141_p9 = pnand %p349_p7, %p140_p8 }
   0xd   : > { %p163_p10 = scmp.lt.s32.totalorder (!%p141_p9), %s532_s16, 1  ;;  %s161_s27 = sand.u32 (!%p141_p9), 1, %s478_s13  }
   0xe   : > { %144 = sbr.rel (%p141_p9) target bundleno = 255 (0xff), region = 32  ;;  %s353_s30 = sshll.u32 (!%p141_p9), %s532_s16, 4 }
   0xf   : > { %s600_s8 = scalar_lea.hbm (!%p141_p9), %s638_s3, %s353_s30 }
  0x13   : > { %v200_v0 = vld [vmem:[%s636_s1 + $0x38] sm:$0xff]  ;;  %v488_v1 = vmov 0.0   ;;  %v199_v2 = vld [vmem:[%s636_s1 + $0x30] sm:$0xff]  ;;  %vm489_vm0 = vmmov 0   ;;  %s164_s28 = scalar_select %p163_p10, %s532_s16, 1  ;;  %v198_v3 = vld [vmem:[%s636_s1 + $0x28] sm:$0xff] }
  0x14   : > { %366 = vmatprep.subr.mxu0 %v488_v1  ;;  %382 = vmatprep.mubr.msk.f32.mxu0 %vm489_vm0, %v488_v1  ;;  %v197_v4 = vld [vmem:[%s636_s1 + $0x20] sm:$0xff]  ;;  %vm177_vm1 = vcmask 519168   ;;  %v196_v8 = vld [vmem:[%s636_s1 + $0x18] sm:$0xff]  ;;  %v195_v14 = vld [vmem:[%s636_s1 + $0x10] sm:$0xff]  ;;  %vm201_vm2 = vcmask 523264   ;;  %vm276_vm3 = vcmask 73728  }
  0x15   : > { %367 = vmatpush3.msra.mxu0 %v200_v0  ;;  %s356_s4 = sshll.u32 %s164_s28, 3  ;;  %v194_v19 = vld [vmem:[%s636_s1 + $0x8] sm:$0xff]  ;;  %v193_v22 = vld [vmem:[%s636_s1] sm:$0xff]  ;;  %s490_s16 = smov [#allocation2]  }
  0x16   : > { %368 = vmatprep.subr.mxu0 %v488_v1  ;;  %s167_s9 = scalar_lea.vmem %s635_s0, %s356_s4  ;;  %v168_v31 = vld [vmem:[%s637_s2] sm:$0x1]  ;;  %s162_s4 = scalar_lea.vmem [#allocation2], %s161_s27 }
  0x17   : > { %369 = vmatpush3.msra.mxu0 %v199_v2  ;;  %v169_v5 = vld [vmem:[%s167_s9] sm:$0x3]  ;;  %v170_v6 = vld [vmem:[%s167_s9 + $0x2] sm:$0x3]  ;;  %v171_v7 = vld [vmem:[%s167_s9 + $0x4] sm:$0x3] }
  0x18   : > { %370 = vmatprep.subr.mxu0 %v488_v1  ;;  %v172_v9 = vld [vmem:[%s167_s9 + $0x6] sm:$0x3]  ;;  %v173_v10 = vunpack.c.l.bf16 %v169_v5  ;;  %v174_v11 = vunpack.c.l.bf16 %v170_v6  ;;  %v175_v12 = vunpack.c.l.bf16 %v171_v7  ;;  %s291_s5 = sshll.u32 %s162_s4, 4  ;;  %s279_s9 = scalar_lea.sflag [#allocation3], %s161_s27  ;;  %s292_s5 = int_to_ptr.vmem [resolvable:$true] %s291_s5 }
  0x19   : > { %371 = vmatpush3.msra.mxu0 %v198_v3  ;;  %v176_v13 = vunpack.c.l.bf16 %v172_v9  ;;  %s426_s10 = scalar_lea.vmem %s292_s5, 16  ;;  %s430_s11 = sshll.u32 %s490_s16, 4  ;;  %s431_s11 = int_to_ptr.vmem [resolvable:$false] %s430_s11 }
  0x1a   : > { %372 = vmatprep.subr.mxu0 %v488_v1  ;;  %v178_v15 = vsel %vm177_vm1, %v173_v10, 0.0  ;;  %v179_v16 = vsel %vm177_vm1, %v174_v11, 0.0  ;;  %v181_v17 = vsel %vm177_vm1, %v175_v12, 0.0  ;;  %p427_p11 = scmp.ne.s32.totalorder %s292_s5, %s426_s10  ;;  %s432_s17 = scalar_lea.vmem %s431_s11, 32 }
  0x1b   : > { %373 = vmatpush3.msra.mxu0 %v197_v4  ;;  %v180_v18 = vadd.f32 %v179_v16, %v178_v15  ;;  %v183_v20 = vsel %vm177_vm1, %v176_v13, 0.0  ;;  %p433_p0 = scmp.lt.s32.totalorder %s292_s5, %s431_s11  ;;  %p434_p1 = scmp.lt.s32.totalorder %s432_s17, %s426_s10 }
  0x1c   : > { %374 = vmatprep.subr.mxu0 %v488_v1  ;;  %p428_p12 = pnand %p427_p11, %p549_p5 }
  0x1d   : > { %375 = vmatpush3.msra.mxu0 %v196_v8  ;;  %v182_v21 = vadd.f32 %v181_v17, %v180_v18  ;;  %p435_p2 = por %p434_p1, %p433_p0 }
  0x1e   : > { %376 = vmatprep.subr.mxu0 %v488_v1  ;;  %p429_p13 = pneg %p428_p12 }
  0x1f   : > { %377 = vmatpush3.msra.mxu0 %v195_v14  ;;  %v184_v23 = vadd.f32 %v183_v20, %v182_v21 }
  0x20   : > { %378 = vmatprep.subr.mxu0 %v488_v1  ;;  %p436_p3 = pnand %p435_p2, %p429_p13 }
  0x21   : > { %379 = vmatpush3.msra.mxu0 %v194_v19  ;;  %v185_v24 = vrot.slane %v184_v23, 4 }
  0x22   : > { %380 = vmatprep.subr.mxu0 %v488_v1 }
  0x23   : > { %381 = vmatpush3.msra.mxu0 %v193_v22  ;;  %v186_v25 = vadd.f32 %v185_v24, %v184_v23 }
  0x25   : > { %v187_v26 = vrot.slane %v186_v25, 2 }
  0x27   : > { %v188_v27 = vadd.f32 %v187_v26, %v186_v25 }
  0x29   : > { %v189_v28 = vrot.slane %v188_v27, 1 }
  0x2b   : > { %v190_v29 = vadd.f32 %v189_v28, %v188_v27 }
  0x2d   : > { %v192_v30 = vmul.f32 0.0625, %v190_v29 }
  0x2f   : > { %383 = vmatmul.mubr.msk.f32.vlgmr.msra.gmra.mxu0 %vm201_vm2, %v192_v30 }
  0xef   : > { %v271_v32 = vpop.f32.mrf.mxu0 }
  0xf0   : > { %v275_v33 = vadd.f32 %v271_v32, %v168_v31 }
  0xf1   : > { %v384_v34 = vpop.f32.mrf.mxu0 }
  0xf2   : > { %277 = vst.msk [vmem:[%s162_s4] sm:$0x1] %vm276_vm3, %v275_v33 }
  0xf3   : > { %439 = shalt.err (!%p436_p3)
}
  0xf4   : > { %s440_s19 = scalar_lea.hbm %s600_s8, 16  ;;  %s444_s25 = scalar_lea.hbm %s638_s3, 32 }
  0xf5   : > { %p441_p4 = scmp.ne.s32.totalorder %s600_s8, %s440_s19  ;;  %p445_p9 = scmp.lt.s32.totalorder %s600_s8, %s638_s3 }
  0xf6   : > { %p446_p10 = scmp.lt.s32.totalorder %s444_s25, %s440_s19 }
  0xf7   : > { %p442_p7 = pnand %p441_p4, %p549_p5 }
  0xf8   : > { %p447_p11 = por %p446_p10, %p445_p9 }
  0xf9   : > { %p443_p8 = pneg %p442_p7 }
  0xfb   : > { %p448_p12 = pnand %p447_p11, %p443_p8 }
  0xfd   : > { %451 = shalt.err (!%p448_p12)
}
  0xfe   : > { %385 = dma.vmem_to_hbm [thread:$0]  (%p549_p5), %s292_s5, 16, %s600_s8, %s279_s9  }
  0xff PF: > { %p391_p13 = scmp.ge.s32.totalorder %s486_s15, 2  ;;  %s303_s28 = sand.u32 1, %s474_s12  }
 0x100   : > { %s304_s29 = scalar_lea.sflag [#allocation3], %s303_s28 }
 0x101   : > { %p388_p0 = pnand %p391_p13, %p553_p6 }
 0x103   : > { %p389_p1 = pneg %p388_p0 }
 0x105   : > { %469 = dma.done.wait (%p389_p1), %s304_s29, 16  }
 0x106   : > { %471 = vsyncadd (%p389_p1), %s304_s29, 4294967280  ;;  %p13_p2 = scmp.ge.s32.totalorder %s536_s18, 4   ;;  %s641_s12 = smov %s478_s13 }
 0x107   : > { %s642_s13 = smov %s482_s14  ;;  %s643_s14 = smov %s547_s21 }
 0x108   : > { %s644_s15 = smov %s536_s18  ;;  %15 = sbr.rel (!%p13_p2) target bundleno = 3 (0x3), region = 67 }
 0x10d   :  { %308 = vsyncpa [#allocation3], 1 }
 0x10e   :  { %310 = vsyncpa [#allocation3 + $0x1], 1 }

// kernel: _lambda_.17
= control target key start
LH: loop header
LB: loop body
LE: loop exit
PB: predicated region body
PF: predicated region fallthrough
CT: control target
= control target key end

     0   :  { %s1376_s21 = smov 0   ;;  %s1546_s0 = inlined_call_operand.vmem [shape: bf16[2,20,5,32], index: 0, kind: input, shape index: {}]   ;;  %s1547_s1 = inlined_call_operand.vmem [shape: bf16[9,32,64], index: 1, kind: input, shape index: {}]   ;;  %s1548_s2 = inlined_call_operand.vmem [shape: f32[1,64], index: 2, kind: input, shape index: {}, may-alias: {2,4}]   ;;  %s1549_s3 = inlined_call_operand.vmem [shape: bf16[32,64], index: 3, kind: input, shape index: {}]   ;;  %s1550_s4 = inlined_call_operand.vmem [shape: f32[1,64], index: 4, kind: input, shape index: {}, may-alias: {2,4}]   ;;  %s1551_s5 = inlined_call_operand.vmem [shape: bf16[2,4,4,64], index: 5, kind: output, shape index: {0}]   ;;  %s1552_s6 = inlined_call_operand.vmem [shape: bf16[2,4,4,64], index: 6, kind: output, shape index: {1}]  }
   0x1 LB: > { %s1074_s22 = sadd.s32 4294967295, %s1333_s21   ;;  %p1078_p0 = scmp.ge.s32.totalorder %s1333_s21, 1  ;;  %s1333_s21 = sphi %s1376_s21, %s17_s21  }
   0x2   : > { %p215_p1 = scmp.lt.s32.totalorder %s1333_s21, 3 }
   0x4   : > { %p216_p2 = pnand %p1078_p0, %p215_p1 }
   0x5   : > { %p250_p3 = scmp.lt.s32.totalorder (!%p216_p2), %s1074_s22, 1  ;;  %s1404_s12 = smov (!%p216_p2), 0  }
   0x6   : > { %219 = sbr.rel (%p216_p2) target bundleno = 258 (0x102), region = 40 }
   0xb   : > { %v1387_v0 = vld [vmem:[%s1548_s2] ss:$0 sm:$0xff]  ;;  %s1554_s22 = smov (!%p250_p3, %s1074_s22), 1 }
   0xc   : > { %s1281_s25 = smul.u32 80, %s1554_s22  ;;  %s1169_s26 = sshll.u32 %s1554_s22, 3 }
   0xd   : > { %s1392_s29 = scalar_lea.vmem %s1551_s5, %s1169_s26  ;;  %s1397_s8 = scalar_lea.vmem %s1552_s6, %s1169_s26 }
   0xe   : > { %s1402_s11 = scalar_lea.vmem %s1546_s0, %s1281_s25 }
   0xf LB: >> { %v1300_v1 = vld [vmem:[%s1547_s1 + $0x18] sm:$0xff]   ;;  %v1339_v2 = vmov 0.0   ;;  %v1301_v3 = vld [vmem:[%s1547_s1 + $0x8] sm:$0xff]   ;;  %v1302_v4 = vld [vmem:[%s1547_s1 + $0x10] sm:$0xff]   ;;  %vm1340_vm0 = vmmov 0   ;;  %s1084_s19 = sshll.u32 %s1337_s12, 2  ;;  %s1337_s12 = sphi %s1404_s12, %s272_s12  }
  0x10   : >> { %1201 = vmatprep.subr.bf16.mxu0 %v1339_v2  ;;  %1209 = vmatprep.subr.bf16.mxu1 %v1339_v2  ;;  %v1303_v5 = vld [vmem:[%s1547_s1] sm:$0xff]   ;;  %s1428_s23 = scalar_lea.vmem %s1402_s11, %s1084_s19  ;;  %vm301_vm1 = vcmask 261120   ;;  %v1304_v8 = vld [vmem:[%s1547_s1 + $0x28] sm:$0xff]   ;;  %v1305_v9 = vld [vmem:[%s1547_s1 + $0x38] sm:$0xff]   ;;  %s1160_s19 = sshll.u32 %s1337_s12, 1  ;;  %vm887_vm2 = vcmask 517120  }
  0x11   : >> { %1202 = vmatpush3.bf16.msra.mxu0 %v1300_v1  ;;  %1205 = vmatprep.mubr.msk.bf16.mxu0 %vm1340_vm0, %v1339_v2  ;;  %v1086_v6 = vld [vmem:[%s1428_s23 + $0x14] sm:$0x3]  ;;  %v275_v7 = vld [vmem:[%s1428_s23] sm:$0x3]  ;;  %v1106_v16 = vld [vmem:[%s1428_s23 + $0x28] sm:$0x3]  ;;  %s958_s20 = scalar_lea.vmem %s1397_s8, %s1160_s19  ;;  %s886_s22 = scalar_lea.vmem %s1392_s29, %s1160_s19 }
  0x12   : >> { %1210 = vmatpush3.bf16.msra.mxu1 %v1301_v3  ;;  %1203 = vmatprep.subr.bf16.mxu0 %v1339_v2  ;;  %v1306_v10 = vld [vmem:[%s1547_s1 + $0x20] sm:$0xff]   ;;  %v1307_v12 = vld [vmem:[%s1547_s1 + $0x30] sm:$0xff]   ;;  %v1309_v17 = vld [vmem:[%s1547_s1 + $0x48] sm:$0xff]   ;;  %s272_s12 = sadd.s32 1, %s1337_s12  }
  0x13   : >> { %1211 = vmatprep.subr.bf16.mxu1 %v1339_v2  ;;  %1213 = vmatprep.mubr.msk.bf16.mxu1 %vm1340_vm0, %v1339_v2  ;;  %v1308_v11 = vld [vmem:[%s1428_s23] ss:$0 sps:$4 sm:$0x77]   ;;  %v1310_v18 = vld [vmem:[%s1547_s1 + $0x58] sm:$0xff]   ;;  %v1312_v25 = vld [vmem:[%s1547_s1 + $0x50] sm:$0xff]   ;;  %p269_p4 = scmp.ge.s32.totalorder %s272_s12, 4  }
  0x14   : >> { %v410_v13 = vshrl.u32 %v1308_v11, 16  ;;  %v412_v14 = vshll.u32 %v1308_v11, 16  ;;  %v1313_v19 = vld [vmem:[%s1428_s23 + $0x28] ss:$0 sps:$4 sm:$0x77]   ;;  %v1311_v22 = vld [vmem:[%s1547_s1 + $0x40] sm:$0xff]  }
  0x15   : >> { %1204 = vmatpush3.bf16.msra.mxu0 %v1302_v4  ;;  %v614_v21 = vshll.u32 %v1313_v19, 16  ;;  %v612_v23 = vshrl.u32 %v1313_v19, 16  ;;  %v1115_v26 = vld [vmem:[%s1428_s23 + $0x3c] sm:$0x3]  ;;  %v1314_v28 = vld [vmem:[%s1547_s1 + $0x68] sm:$0xff]   ;;  %v1316_v31 = vld [vmem:[%s1547_s1 + $0x60] sm:$0xff]  }
  0x16   : >> { %1212 = vmatpush3.bf16.msra.mxu1 %v1303_v5  ;;  %1217 = vmatprep.subr.bf16.mxu0 %v1339_v2  ;;  %v414_v15 = vrot.slane %v412_v14, 1  ;;  %v1315_v29 = vld [vmem:[%s1547_s1 + $0x78] sm:$0xff]   ;;  %v1322_v30 = vld [vmem:[%s1428_s23 + $0x4] ss:$0 sps:$4 sm:$0x77]   ;;  %v1317_v32 = vld [vmem:[%s1547_s1 + $0x70] sm:$0xff]  }
  0x17   : >> { %1225 = vmatprep.subr.bf16.mxu1 %v1339_v2  ;;  %v616_v24 = vrot.slane %v614_v21, 1  ;;  %v816_v33 = vshll.u32 %v1322_v30, 16  ;;  %v1133_v34 = vld [vmem:[%s1428_s23 + $0x4] sm:$0x3]  ;;  %v1318_v35 = vld [vmem:[%s1547_s1 + $0x88] sm:$0xff]   ;;  %v814_v38 = vshrl.u32 %v1322_v30, 16 }
  0x18   : >> { %1206 = vmatmul.mubr.msk.bf16.vlgmr.msra.gmra.mxu0 %vm301_vm1, %v1086_v6  ;;  %v415_v20 = vor.u32 %v414_v15, %v410_v13  ;;  %v1142_v36 = vld [vmem:[%s1428_s23 + $0x18] sm:$0x3]  ;;  %v1319_v37 = vld [vmem:[%s1549_s3 + $0x8] sm:$0xff]   ;;  %v1320_v40 = vld [vmem:[%s1547_s1 + $0x80] sm:$0xff]  }
  0x19   : >> { %1214 = vmatmul.mubr.msk.bf16.vlgmr.msra.gmra.mxu1 %vm301_vm1, %v275_v7  ;;  %1218 = vmatpush3.bf16.msra.mxu0 %v1304_v8  ;;  %v617_v27 = vor.u32 %v616_v24, %v612_v23  ;;  %v818_v39 = vrot.slane %v816_v33, 1  ;;  %v1321_v41 = vld [vmem:[%s1549_s3] sm:$0xff]   ;;  %v1161_v43 = vld [vmem:[%s1428_s23 + $0x3c] sm:$0x3] }
  0x1a   : >> { %1226 = vmatpush3.bf16.msra.mxu1 %v1305_v9  ;;  %1219 = vmatprep.subr.bf16.mxu0 %v1339_v2 }
  0x1b   : >> { %1227 = vmatprep.subr.bf16.mxu1 %v1339_v2  ;;  %1221 = vmatprep.mubr.msk.bf16.mxu0 %vm1340_vm0, %v1339_v2  ;;  %v819_v42 = vor.u32 %v818_v39, %v814_v38 }
  0x1c   : >> { %1229 = vmatprep.mubr.msk.bf16.mxu1 %vm1340_vm0, %v1339_v2 }
  0x1d   : >> { %1220 = vmatpush3.bf16.msra.mxu0 %v1306_v10 }
  0x1e   : >> { %1228 = vmatpush3.bf16.msra.mxu1 %v1307_v12  ;;  %1233 = vmatprep.subr.bf16.mxu0 %v1339_v2 }
  0x1f   : >> { %1241 = vmatprep.subr.bf16.mxu1 %v1339_v2 }
  0x20   : >> { %1222 = vmatmul.mubr.msk.bf16.vlgmr.msra.gmra.mxu0 %vm301_vm1, %v415_v20  ;;  %v1162_v20 = vld [vmem:[%s1550_s4] ss:$0 sm:$0xff] }
  0x21   : >> { %1230 = vmatmul.mubr.msk.bf16.vlgmr.msra.gmra.mxu1 %vm301_vm1, %v1106_v16  ;;  %1234 = vmatpush3.bf16.msra.mxu0 %v1309_v17 }
  0x22   : >> { %1242 = vmatpush3.bf16.msra.mxu1 %v1310_v18  ;;  %1235 = vmatprep.subr.bf16.mxu0 %v1339_v2 }
  0x23   : >> { %1243 = vmatprep.subr.bf16.mxu1 %v1339_v2  ;;  %1237 = vmatprep.mubr.msk.bf16.mxu0 %vm1340_vm0, %v1339_v2 }
  0x24   : >> { %1245 = vmatprep.mubr.msk.bf16.mxu1 %vm1340_vm0, %v1339_v2 }
  0x25   : >> { %1236 = vmatpush3.bf16.msra.mxu0 %v1311_v22 }
  0x26   : >> { %1244 = vmatpush3.bf16.msra.mxu1 %v1312_v25  ;;  %1249 = vmatprep.subr.bf16.mxu0 %v1339_v2 }
  0x27   : >> { %1257 = vmatprep.subr.bf16.mxu1 %v1339_v2 }
  0x28   : >> { %1238 = vmatmul.mubr.msk.bf16.vlgmr.msra.gmra.mxu0 %vm301_vm1, %v1115_v26 }
  0x29   : >> { %1246 = vmatmul.mubr.msk.bf16.vlgmr.msra.gmra.mxu1 %vm301_vm1, %v617_v27  ;;  %1250 = vmatpush3.bf16.msra.mxu0 %v1314_v28 }
  0x2a   : >> { %1258 = vmatpush3.bf16.msra.mxu1 %v1315_v29  ;;  %1251 = vmatprep.subr.bf16.mxu0 %v1339_v2 }
  0x2b   : >> { %1259 = vmatprep.subr.bf16.mxu1 %v1339_v2  ;;  %1253 = vmatprep.mubr.msk.bf16.mxu0 %vm1340_vm0, %v1339_v2 }
  0x2c   : >> { %1261 = vmatprep.mubr.msk.bf16.mxu1 %vm1340_vm0, %v1339_v2 }
  0x2d   : >> { %1252 = vmatpush3.bf16.msra.mxu0 %v1316_v31 }
  0x2e   : >> { %1260 = vmatpush3.bf16.msra.mxu1 %v1317_v32  ;;  %1265 = vmatprep.subr.bf16.mxu0 %v1339_v2 }
  0x2f   : >> { %1273 = vmatprep.subr.bf16.mxu1 %v1339_v2 }
  0x30   : >> { %1254 = vmatmul.mubr.msk.bf16.vlgmr.msra.gmra.mxu0 %vm301_vm1, %v1133_v34 }
  0x31   : >> { %1262 = vmatmul.mubr.msk.bf16.vlgmr.msra.gmra.mxu1 %vm301_vm1, %v1142_v36  ;;  %1266 = vmatpush3.bf16.msra.mxu0 %v1318_v35 }
  0x32   : >> { %1274 = vmatpush3.bf16.msra.mxu1 %v1319_v37  ;;  %1267 = vmatprep.subr.bf16.mxu0 %v1339_v2 }
  0x33   : >> { %1275 = vmatprep.subr.bf16.mxu1 %v1339_v2  ;;  %1269 = vmatprep.mubr.msk.bf16.mxu0 %vm1340_vm0, %v1339_v2 }
  0x34   : >> { %1277 = vmatprep.mubr.msk.bf16.mxu1 %vm1340_vm0, %v1339_v2 }
  0x35   : >> { %1268 = vmatpush3.bf16.msra.mxu0 %v1320_v40 }
  0x36   : >> { %1276 = vmatpush3.bf16.msra.mxu1 %v1321_v41 }
  0x38   : >> { %1270 = vmatmul.mubr.msk.bf16.vlgmr.msra.gmra.mxu0 %vm301_vm1, %v819_v42 }
  0x39   : >> { %1278 = vmatmul.mubr.msk.bf16.vlgmr.msra.gmra.mxu1 %vm301_vm1, %v1161_v43 }
  0xd8   : >> { %v339_v44 = vpop.f32.mrf.mxu0 }
  0xd9   : >> { %v394_v45 = vpop.f32.mrf.mxu1 }
  0xda   : >> { %v1207_v46 = vpop.f32.mrf.mxu0  ;;  %v395_v57 = vadd.f32 %v394_v45, %v339_v44 }
  0xdb   : >> { %v1215_v47 = vpop.f32.mrf.mxu1 }
  0xdc   : >> { %v342_v48 = vpop.f32.mrf.mxu0 }
  0xdd   : >> { %v397_v49 = vpop.f32.mrf.mxu1 }
  0xde   : >> { %v1208_v50 = vpop.f32.mrf.mxu0 }
  0xdf   : >> { %v1216_v51 = vpop.f32.mrf.mxu1 }
  0xe0   : >> { %v465_v52 = vpop.f32.mrf.mxu0 }
  0xe1   : >> { %v530_v53 = vpop.f32.mrf.mxu1  ;;  %v471_v60 = vadd.f32 %v465_v52, %v395_v57 }
  0xe2   : >> { %v1223_v54 = vpop.f32.mrf.mxu0 }
  0xe3   : >> { %v1231_v55 = vpop.f32.mrf.mxu1  ;;  %v536_v2 = vadd.f32 %v530_v53, %v471_v60 }
  0xe4   : >> { %v468_v56 = vpop.f32.mrf.mxu0 }
  0xe5   : >> { %v533_v58 = vpop.f32.mrf.mxu1 }
  0xe6   : >> { %v1224_v59 = vpop.f32.mrf.mxu0 }
  0xe7   : >> { %v1232_v61 = vpop.f32.mrf.mxu1 }
  0xe8   : >> { %v595_v62 = vpop.f32.mrf.mxu0 }
  0xe9   : >> { %v667_v63 = vpop.f32.mrf.mxu1  ;;  %v601_v5 = vadd.f32 %v595_v62, %v536_v2 }
  0xea   : >> { %v1239_v1 = vpop.f32.mrf.mxu0 }
  0xeb   : >> { %v1247_v3 = vpop.f32.mrf.mxu1  ;;  %v673_v10 = vadd.f32 %v667_v63, %v601_v5 }
  0xec   : >> { %v598_v4 = vpop.f32.mrf.mxu0 }
  0xed   : >> { %v670_v6 = vpop.f32.mrf.mxu1 }
  0xee   : >> { %v1240_v7 = vpop.f32.mrf.mxu0 }
  0xef   : >> { %v1248_v8 = vpop.f32.mrf.mxu1 }
  0xf0   : >> { %v732_v9 = vpop.f32.mrf.mxu0 }
  0xf1   : >> { %v797_v11 = vpop.f32.mrf.mxu1  ;;  %v738_v13 = vadd.f32 %v732_v9, %v673_v10 }
  0xf2   : >> { %v1255_v12 = vpop.f32.mrf.mxu0 }
  0xf3   : >> { %v1263_v14 = vpop.f32.mrf.mxu1  ;;  %v803_v18 = vadd.f32 %v797_v11, %v738_v13 }
  0xf4   : >> { %v735_v15 = vpop.f32.mrf.mxu0 }
  0xf5   : >> { %v800_v16 = vpop.f32.mrf.mxu1 }
  0xf6   : >> { %v1256_v17 = vpop.f32.mrf.mxu0 }
  0xf7   : >> { %v1264_v19 = vpop.f32.mrf.mxu1 }
  0xf8   : >> { %v869_v21 = vpop.f32.mrf.mxu0 }
  0xf9   : >> { %v875_v22 = vadd.f32 %v869_v21, %v803_v18  ;;  %v950_v23 = vpop.f32.mrf.mxu1 }
  0xfa   : >> { %v951_v24 = vadd.f32 %v1162_v20, %v950_v23  ;;  %v1271_v25 = vpop.f32.mrf.mxu0 }
  0xfb   : >> { %v882_v26 = vadd.f32 %v1387_v0, %v875_v22  ;;  %v1279_v27 = vpop.f32.mrf.mxu1 }
  0xfc   : >> { %v956_v28 = vpack.c.bf16 %v951_v24, %v951_v24  ;;  %v872_v29 = vpop.f32.mrf.mxu0 }
  0xfd   : >> { %v883_v30 = vmax.f32 %v882_v26, 0.0  ;;  %v953_v31 = vpop.f32.mrf.mxu1  ;;  %271 = sbr.rel (!%p269_p4) target bundleno = 15 (0xf), region = 105 }
  0xfe   : >> { %959 = vst.msk [vmem:[%s958_s20] sm:$0x3] %vm887_vm2, %v956_v28  ;;  %v1272_v32 = vpop.f32.mrf.mxu0 }
  0xff   : >> { %v884_v33 = vpack.c.bf16 %v883_v30, %v883_v30  ;;  %v1280_v34 = vpop.f32.mrf.mxu1 }
 0x101   : >> { %888 = vst.msk [vmem:[%s886_s22] sm:$0x3] %vm887_vm2, %v884_v33 }
 0x102 PF: > { %s17_s21 = sadd.s32 1, %s1333_s21  }
 0x103   : > { %p14_p5 = scmp.ge.s32.totalorder %s17_s21, 4  }
 0x105   :  { %16 = sbr.rel (!%p14_p5) target bundleno = 1 (0x1), region = 116 }

// kernel: _lambda_.18
= control target key start
LH: loop header
LB: loop body
LE: loop exit
PB: predicated region body
PF: predicated region fallthrough
CT: control target
= control target key end

     0   :  { %s1476_s15 = smov 0   ;;  %s1703_s0 = inlined_call_operand.vmem [shape: bf16[2,6,6,64], index: 0, kind: input, shape index: {}]   ;;  %s1704_s1 = inlined_call_operand.vmem [shape: bf16[9,64,64], index: 1, kind: input, shape index: {}]   ;;  %s1705_s2 = inlined_call_operand.vmem [shape: f32[1,64], index: 2, kind: input, shape index: {}]   ;;  %s1706_s3 = inlined_call_operand.vmem [shape: bf16[2,4,4,64], index: 3, kind: input, shape index: {}]   ;;  %s1707_s4 = inlined_call_operand.vmem [shape: bf16[2,4,4,64], index: 4, kind: output, shape index: {}]  }
   0x1 LB: > { %s1078_s16 = sadd.s32 4294967295, %s1443_s15   ;;  %p1082_p0 = scmp.ge.s32.totalorder %s1443_s15, 1  ;;  %s1443_s15 = sphi %s1476_s15, %s14_s15  }
   0x2   : > { %p172_p1 = scmp.lt.s32.totalorder %s1443_s15, 3 }
   0x4   : > { %p173_p2 = pnand %p1082_p0, %p172_p1 }
   0x5   : > { %p203_p3 = scmp.lt.s32.totalorder (!%p173_p2), %s1078_s16, 1  ;;  %s1504_s30 = smov (!%p173_p2), 0  }
   0x6   : > { %176 = sbr.rel (%p173_p2) target bundleno = 300 (0x12c), region = 36 }
   0xb   : > { %v1487_v0 = vld [vmem:[%s1705_s2] ss:$0 sm:$0xff]  ;;  %s1709_s16 = smov (!%p203_p3, %s1078_s16), 1 }
   0xc   : > { %s1372_s19 = smul.u32 24, %s1709_s16  ;;  %s1217_s20 = sshll.u32 %s1709_s16, 3 }
   0xd   : > { %s1492_s23 = scalar_lea.vmem %s1706_s3, %s1217_s20  ;;  %s1497_s26 = scalar_lea.vmem %s1707_s4, %s1217_s20 }
   0xe   : > { %s1502_s29 = scalar_lea.vmem %s1703_s0, %s1372_s19 }
   0xf LB: >> { %v1391_v1 = vld [vmem:[%s1704_s1 + $0x38] sm:$0xff]   ;;  %v1449_v2 = vmov 0.0   ;;  %v1393_v4 = vld [vmem:[%s1704_s1 + $0x30] sm:$0xff]   ;;  %vm1450_vm0 = vmmov 0   ;;  %s1088_s11 = sshll.u32 %s1447_s30, 2  ;;  %v1395_v6 = vld [vmem:[%s1704_s1 + $0x28] sm:$0xff]   ;;  %s1447_s30 = sphi %s1504_s30, %s225_s30  }
  0x10   : >> { %1264 = vmatprep.subr.bf16.mxu0 %v1449_v2  ;;  %1276 = vmatprep.subr.bf16.mxu1 %v1449_v2  ;;  %v1392_v3 = vld [vmem:[%s1704_s1 + $0x18] sm:$0xff]   ;;  %v1394_v5 = vld [vmem:[%s1704_s1 + $0x10] sm:$0xff]   ;;  %s1531_s14 = scalar_lea.vmem %s1502_s29, %s1088_s11  ;;  %v1396_v7 = vld [vmem:[%s1704_s1 + $0x8] sm:$0xff]   ;;  %vm281_vm1 = vcmask 523264   ;;  %vm992_vm2 = vcmask 517120  }
  0x11   : >> { %1265 = vmatpush3.bf16.msra.mxu0 %v1391_v1  ;;  %1272 = vmatprep.mubr.msk.bf16.mxu0 %vm1450_vm0, %v1449_v2  ;;  %v1399_v8 = vld [vmem:[%s1531_s14] ss:$0 sps:$4 sm:$0x77]   ;;  %v1400_v14 = vld [vmem:[%s1704_s1 + $0x58] sm:$0xff]   ;;  %v1402_v18 = vld [vmem:[%s1704_s1 + $0x50] sm:$0xff]  }
  0x12   : >> { %1277 = vmatpush3.bf16.msra.mxu1 %v1392_v3  ;;  %1266 = vmatprep.subr.bf16.mxu0 %v1449_v2  ;;  %v1397_v9 = vld [vmem:[%s1704_s1 + $0x20] sm:$0xff]   ;;  %v251_v10 = vshrl.u32 %v1399_v8, 16  ;;  %v253_v11 = vshll.u32 %v1399_v8, 16  ;;  %v1401_v17 = vld [vmem:[%s1704_s1 + $0x78] sm:$0xff]   ;;  %v1403_v19 = vld [vmem:[%s1704_s1 + $0x70] sm:$0xff]  }
  0x13   : >> { %1278 = vmatprep.subr.bf16.mxu1 %v1449_v2  ;;  %1284 = vmatprep.mubr.msk.bf16.mxu1 %vm1450_vm0, %v1449_v2  ;;  %v1398_v12 = vld [vmem:[%s1704_s1] sm:$0xff]   ;;  %v1404_v20 = vld [vmem:[%s1704_s1 + $0x48] sm:$0xff]   ;;  %v1409_v26 = vld [vmem:[%s1704_s1 + $0x98] sm:$0xff]  }
  0x14   : >> { %v255_v13 = vrot.slane %v253_v11, 1  ;;  %v228_v16 = vld [vmem:[%s1531_s14] sm:$0x3]  ;;  %v1405_v21 = vld [vmem:[%s1704_s1 + $0x68] sm:$0xff]   ;;  %v1123_v27 = vld [vmem:[%s1531_s14 + $0x4] sm:$0x3] }
  0x15   : >> { %1267 = vmatpush3.bf16.msra.mxu0 %v1393_v4  ;;  %v1408_v22 = vld [vmem:[%s1531_s14] ss:$0 sps:$4 sm:$0x66]   ;;  %v1410_v28 = vld [vmem:[%s1704_s1 + $0xb8] sm:$0xff]   ;;  %v1411_v30 = vld [vmem:[%s1704_s1 + $0x90] sm:$0xff]  }
  0x16   : >> { %1279 = vmatpush3.bf16.msra.mxu1 %v1394_v5  ;;  %1268 = vmatprep.subr.bf16.mxu0 %v1449_v2  ;;  %v256_v15 = vor.u32 %v255_v13, %v251_v10  ;;  %v1406_v23 = vld [vmem:[%s1704_s1 + $0x40] sm:$0xff]   ;;  %v405_v25 = vrot.slane %v1408_v22, 1  ;;  %v1412_v31 = vld [vmem:[%s1704_s1 + $0xb0] sm:$0xff]   ;;  %v1413_v33 = vld [vmem:[%s1704_s1 + $0x88] sm:$0xff]  }
  0x17   : >> { %1280 = vmatprep.subr.bf16.mxu1 %v1449_v2  ;;  %v1407_v24 = vld [vmem:[%s1704_s1 + $0x60] sm:$0xff]   ;;  %v1414_v34 = vld [vmem:[%s1704_s1 + $0xa8] sm:$0xff]   ;;  %v1418_v41 = vld [vmem:[%s1704_s1 + $0xd8] sm:$0xff]  }
  0x18   : >> { %v1417_v29 = vld [vmem:[%s1531_s14 + $0x4] ss:$0 sps:$4 sm:$0x77]   ;;  %v1420_v43 = vld [vmem:[%s1704_s1 + $0xf8] sm:$0xff]   ;;  %v1421_v44 = vld [vmem:[%s1704_s1 + $0xd0] sm:$0xff]  }
  0x19   : >> { %1269 = vmatpush3.bf16.msra.mxu0 %v1395_v6  ;;  %v571_v32 = vshll.u32 %v1417_v29, 16  ;;  %v569_v35 = vshrl.u32 %v1417_v29, 16  ;;  %v1415_v37 = vld [vmem:[%s1704_s1 + $0x80] sm:$0xff]   ;;  %v1428_v45 = vld [vmem:[%s1531_s14 + $0x8] ss:$0 sps:$4 sm:$0x77]  }
  0x1a   : >> { %1281 = vmatpush3.bf16.msra.mxu1 %v1396_v7  ;;  %1270 = vmatprep.subr.bf16.mxu0 %v1449_v2  ;;  %v1419_v38 = vld [vmem:[%s1531_s14 + $0x4] ss:$0 sps:$4 sm:$0x66]   ;;  %v1422_v46 = vld [vmem:[%s1704_s1 + $0xf0] sm:$0xff]   ;;  %v1423_v47 = vld [vmem:[%s1704_s1 + $0xc8] sm:$0xff]   ;;  %v822_v48 = vshll.u32 %v1428_v45, 16 }
  0x1b   : >> { %1282 = vmatprep.subr.bf16.mxu1 %v1449_v2  ;;  %v573_v36 = vrot.slane %v571_v32, 1  ;;  %v1416_v39 = vld [vmem:[%s1704_s1 + $0xa0] sm:$0xff]   ;;  %v656_v42 = vrot.slane %v1419_v38, 1  ;;  %v1424_v49 = vld [vmem:[%s1704_s1 + $0xe8] sm:$0xff]   ;;  %v820_v51 = vshrl.u32 %v1428_v45, 16  ;;  %v1427_v55 = vld [vmem:[%s1704_s1 + $0x118] sm:$0xff]  }
  0x1c   : >> { %v1425_v50 = vld [vmem:[%s1704_s1 + $0xc0] sm:$0xff]   ;;  %v824_v52 = vrot.slane %v822_v48, 1  ;;  %v1168_v54 = vld [vmem:[%s1531_s14 + $0x8] sm:$0x3]  ;;  %v1429_v57 = vld [vmem:[%s1704_s1 + $0x110] sm:$0xff]  }
  0x1d   : >> { %1271 = vmatpush3.bf16.msra.mxu0 %v1397_v9  ;;  %v574_v40 = vor.u32 %v573_v36, %v569_v35  ;;  %v1426_v53 = vld [vmem:[%s1704_s1 + $0xe0] sm:$0xff]   ;;  %v1430_v58 = vld [vmem:[%s1704_s1 + $0x108] sm:$0xff]  }
  0x1e   : >> { %1283 = vmatpush3.bf16.msra.mxu1 %v1398_v12  ;;  %1288 = vmatprep.subr.bf16.mxu0 %v1449_v2  ;;  %v825_v56 = vor.u32 %v824_v52, %v820_v51  ;;  %v1432_v59 = vld [vmem:[%s1531_s14 + $0x8] ss:$0 sps:$4 sm:$0x66]   ;;  %v1431_v60 = vld [vmem:[%s1704_s1 + $0x100] sm:$0xff]   ;;  %s1213_s14 = sshll.u32 %s1447_s30, 1  ;;  %s225_s30 = sadd.s32 1, %s1447_s30  }
  0x1f   : >> { %1300 = vmatprep.subr.bf16.mxu1 %v1449_v2  ;;  %v907_v61 = vrot.slane %v1432_v59, 1  ;;  %s984_s20 = scalar_lea.vmem %s1492_s23, %s1213_s14  ;;  %s991_s21 = scalar_lea.vmem %s1497_s26, %s1213_s14 }
  0x20   : >> { %1273 = vmatmul.mubr.msk.bf16.vlgmr.msra.gmra.mxu0 %vm281_vm1, %v256_v15  ;;  %p222_p4 = scmp.ge.s32.totalorder %s225_s30, 4  }
  0x21   : >> { %1285 = vmatmul.mubr.msk.bf16.vlgmr.msra.gmra.mxu1 %vm281_vm1, %v228_v16  ;;  %1289 = vmatpush3.bf16.msra.mxu0 %v1400_v14 }
  0x22   : >> { %1301 = vmatpush3.bf16.msra.mxu1 %v1401_v17  ;;  %1290 = vmatprep.subr.bf16.mxu0 %v1449_v2 }
  0x23   : >> { %1302 = vmatprep.subr.bf16.mxu1 %v1449_v2  ;;  %1296 = vmatprep.mubr.msk.bf16.mxu0 %vm1450_vm0, %v1449_v2 }
  0x24   : >> { %1308 = vmatprep.mubr.msk.bf16.mxu1 %vm1450_vm0, %v1449_v2 }
  0x25   : >> { %1291 = vmatpush3.bf16.msra.mxu0 %v1402_v18 }
  0x26   : >> { %1303 = vmatpush3.bf16.msra.mxu1 %v1403_v19  ;;  %1292 = vmatprep.subr.bf16.mxu0 %v1449_v2 }
  0x27   : >> { %1304 = vmatprep.subr.bf16.mxu1 %v1449_v2 }
  0x29   : >> { %1293 = vmatpush3.bf16.msra.mxu0 %v1404_v20 }
  0x2a   : >> { %1305 = vmatpush3.bf16.msra.mxu1 %v1405_v21  ;;  %1294 = vmatprep.subr.bf16.mxu0 %v1449_v2 }
  0x2b   : >> { %1306 = vmatprep.subr.bf16.mxu1 %v1449_v2 }
  0x2d   : >> { %1295 = vmatpush3.bf16.msra.mxu0 %v1406_v23 }
  0x2e   : >> { %1307 = vmatpush3.bf16.msra.mxu1 %v1407_v24  ;;  %1312 = vmatprep.subr.bf16.mxu0 %v1449_v2 }
  0x2f   : >> { %1324 = vmatprep.subr.bf16.mxu1 %v1449_v2 }
  0x30   : >> { %1297 = vmatmul.mubr.msk.bf16.vlgmr.msra.gmra.mxu0 %vm281_vm1, %v405_v25 }
  0x31   : >> { %1313 = vmatpush3.bf16.msra.mxu0 %v1409_v26  ;;  %1309 = vmatmul.mubr.msk.bf16.vlgmr.msra.gmra.mxu1 %vm281_vm1, %v1123_v27 }
  0x32   : >> { %1325 = vmatpush3.bf16.msra.mxu1 %v1410_v28  ;;  %1314 = vmatprep.subr.bf16.mxu0 %v1449_v2 }
  0x33   : >> { %1326 = vmatprep.subr.bf16.mxu1 %v1449_v2  ;;  %1320 = vmatprep.mubr.msk.bf16.mxu0 %vm1450_vm0, %v1449_v2 }
  0x34   : >> { %1332 = vmatprep.mubr.msk.bf16.mxu1 %vm1450_vm0, %v1449_v2 }
  0x35   : >> { %1315 = vmatpush3.bf16.msra.mxu0 %v1411_v30 }
  0x36   : >> { %1327 = vmatpush3.bf16.msra.mxu1 %v1412_v31  ;;  %1316 = vmatprep.subr.bf16.mxu0 %v1449_v2 }
  0x37   : >> { %1328 = vmatprep.subr.bf16.mxu1 %v1449_v2 }
  0x39   : >> { %1317 = vmatpush3.bf16.msra.mxu0 %v1413_v33 }
  0x3a   : >> { %1329 = vmatpush3.bf16.msra.mxu1 %v1414_v34  ;;  %1318 = vmatprep.subr.bf16.mxu0 %v1449_v2 }
  0x3b   : >> { %1330 = vmatprep.subr.bf16.mxu1 %v1449_v2 }
  0x3d   : >> { %1319 = vmatpush3.bf16.msra.mxu0 %v1415_v37  ;;  %v985_v37 = vld [vmem:[%s984_s20] sm:$0x3] }
  0x3e   : >> { %1331 = vmatpush3.bf16.msra.mxu1 %v1416_v39  ;;  %1336 = vmatprep.subr.bf16.mxu0 %v1449_v2 }
  0x3f   : >> { %1348 = vmatprep.subr.bf16.mxu1 %v1449_v2 }
  0x40   : >> { %1321 = vmatmul.mubr.msk.bf16.vlgmr.msra.gmra.mxu0 %vm281_vm1, %v574_v40 }
  0x41   : >> { %1337 = vmatpush3.bf16.msra.mxu0 %v1418_v41  ;;  %1333 = vmatmul.mubr.msk.bf16.vlgmr.msra.gmra.mxu1 %vm281_vm1, %v656_v42  ;;  %v986_v41 = vunpack.c.l.bf16 %v985_v37 }
  0x42   : >> { %1349 = vmatpush3.bf16.msra.mxu1 %v1420_v43  ;;  %1338 = vmatprep.subr.bf16.mxu0 %v1449_v2 }
  0x43   : >> { %1350 = vmatprep.subr.bf16.mxu1 %v1449_v2  ;;  %1344 = vmatprep.mubr.msk.bf16.mxu0 %vm1450_vm0, %v1449_v2 }
  0x44   : >> { %1356 = vmatprep.mubr.msk.bf16.mxu1 %vm1450_vm0, %v1449_v2 }
  0x45   : >> { %1339 = vmatpush3.bf16.msra.mxu0 %v1421_v44 }
  0x46   : >> { %1351 = vmatpush3.bf16.msra.mxu1 %v1422_v46  ;;  %1340 = vmatprep.subr.bf16.mxu0 %v1449_v2 }
  0x47   : >> { %1352 = vmatprep.subr.bf16.mxu1 %v1449_v2 }
  0x49   : >> { %1341 = vmatpush3.bf16.msra.mxu0 %v1423_v47 }
  0x4a   : >> { %1353 = vmatpush3.bf16.msra.mxu1 %v1424_v49  ;;  %1342 = vmatprep.subr.bf16.mxu0 %v1449_v2 }
  0x4b   : >> { %1354 = vmatprep.subr.bf16.mxu1 %v1449_v2 }
  0x4d   : >> { %1343 = vmatpush3.bf16.msra.mxu0 %v1425_v50 }
  0x4e   : >> { %1355 = vmatpush3.bf16.msra.mxu1 %v1426_v53  ;;  %1360 = vmatprep.subr.bf16.mxu0 %v1449_v2 }
  0x50   : >> { %1345 = vmatmul.mubr.msk.bf16.vlgmr.msra.gmra.mxu0 %vm281_vm1, %v1168_v54 }
  0x51   : >> { %1361 = vmatpush3.bf16.msra.mxu0 %v1427_v55  ;;  %1357 = vmatmul.mubr.msk.bf16.vlgmr.msra.gmra.mxu1 %vm281_vm1, %v825_v56 }
  0x52   : >> { %1362 = vmatprep.subr.bf16.mxu0 %v1449_v2  ;;  %1368 = vmatprep.mubr.msk.bf16.mxu0 %vm1450_vm0, %v1449_v2 }
  0x55   : >> { %1363 = vmatpush3.bf16.msra.mxu0 %v1429_v57 }
  0x56   : >> { %1364 = vmatprep.subr.bf16.mxu0 %v1449_v2 }
  0x59   : >> { %1365 = vmatpush3.bf16.msra.mxu0 %v1430_v58 }
  0x5a   : >> { %1366 = vmatprep.subr.bf16.mxu0 %v1449_v2 }
  0x5d   : >> { %1367 = vmatpush3.bf16.msra.mxu0 %v1431_v60 }
  0x60   : >> { %1369 = vmatmul.mubr.msk.bf16.vlgmr.msra.gmra.mxu0 %vm281_vm1, %v907_v61 }
  0xe0   : >> { %v319_v62 = vpop.f32.mrf.mxu0 }
  0xe1   : >> { %v386_v63 = vpop.f32.mrf.mxu1 }
  0xe2   : >> { %v1274_v1 = vpop.f32.mrf.mxu0  ;;  %v387_v23 = vadd.f32 %v386_v63, %v319_v62 }
  0xe3   : >> { %v1286_v3 = vpop.f32.mrf.mxu1 }
  0xe4   : >> { %v322_v4 = vpop.f32.mrf.mxu0 }
  0xe5   : >> { %v389_v5 = vpop.f32.mrf.mxu1 }
  0xe6   : >> { %v1275_v6 = vpop.f32.mrf.mxu0 }
  0xe7   : >> { %v1287_v7 = vpop.f32.mrf.mxu1 }
  0xf0   : >> { %v467_v8 = vpop.f32.mrf.mxu0 }
  0xf1   : >> { %v548_v9 = vpop.f32.mrf.mxu1  ;;  %v473_v24 = vadd.f32 %v467_v8, %v387_v23 }
  0xf2   : >> { %v1298_v10 = vpop.f32.mrf.mxu0 }
  0xf3   : >> { %v1310_v11 = vpop.f32.mrf.mxu1  ;;  %v554_v28 = vadd.f32 %v548_v9, %v473_v24 }
  0xf4   : >> { %v470_v12 = vpop.f32.mrf.mxu0 }
  0xf5   : >> { %v551_v13 = vpop.f32.mrf.mxu1 }
  0xf6   : >> { %v1299_v14 = vpop.f32.mrf.mxu0 }
  0xf7   : >> { %v1311_v2 = vpop.f32.mrf.mxu1 }
 0x100   : >> { %v636_v15 = vpop.f32.mrf.mxu0 }
 0x101   : >> { %v718_v16 = vpop.f32.mrf.mxu1  ;;  %v642_v31 = vadd.f32 %v636_v15, %v554_v28 }
 0x102   : >> { %v1322_v17 = vpop.f32.mrf.mxu0 }
 0x103   : >> { %v1334_v18 = vpop.f32.mrf.mxu1  ;;  %v724_v35 = vadd.f32 %v718_v16, %v642_v31 }
 0x104   : >> { %v639_v19 = vpop.f32.mrf.mxu0 }
 0x105   : >> { %v721_v20 = vpop.f32.mrf.mxu1 }
 0x106   : >> { %v1323_v21 = vpop.f32.mrf.mxu0 }
 0x107   : >> { %v1335_v22 = vpop.f32.mrf.mxu1 }
 0x110   : >> { %v799_v25 = vpop.f32.mrf.mxu0 }
 0x111   : >> { %v887_v26 = vpop.f32.mrf.mxu1  ;;  %v805_v36 = vadd.f32 %v799_v25, %v724_v35 }
 0x112   : >> { %v1346_v27 = vpop.f32.mrf.mxu0 }
 0x113   : >> { %v1358_v29 = vpop.f32.mrf.mxu1  ;;  %v893_v38 = vadd.f32 %v887_v26, %v805_v36 }
 0x114   : >> { %v802_v30 = vpop.f32.mrf.mxu0 }
 0x115   : >> { %v890_v32 = vpop.f32.mrf.mxu1 }
 0x116   : >> { %v1347_v33 = vpop.f32.mrf.mxu0 }
 0x117   : >> { %v1359_v34 = vpop.f32.mrf.mxu1 }
 0x120   : >> { %v969_v39 = vpop.f32.mrf.mxu0 }
 0x121   : >> { %v975_v40 = vadd.f32 %v969_v39, %v893_v38 }
 0x122   : >> { %v1370_v42 = vpop.f32.mrf.mxu0 }
 0x123   : >> { %v982_v43 = vadd.f32 %v1487_v0, %v975_v40 }
 0x124   : >> { %v972_v44 = vpop.f32.mrf.mxu0 }
 0x125   : >> { %v987_v45 = vadd.f32 %v986_v41, %v982_v43 }
 0x126   : >> { %v1371_v46 = vpop.f32.mrf.mxu0 }
 0x127   : >> { %v988_v47 = vmax.f32 %v987_v45, 0.0  ;;  %224 = sbr.rel (!%p222_p4) target bundleno = 15 (0xf), region = 89 }
 0x129   : >> { %v989_v48 = vpack.c.bf16 %v988_v47, %v988_v47 }
 0x12b   : >> { %993 = vst.msk [vmem:[%s991_s21] sm:$0x3] %vm992_vm2, %v989_v48 }
 0x12c PF: > { %s14_s15 = sadd.s32 1, %s1443_s15  }
 0x12d   : > { %p11_p5 = scmp.ge.s32.totalorder %s14_s15, 4  }
 0x12f   :  { %13 = sbr.rel (!%p11_p5) target bundleno = 1 (0x1), region = 100 }

</bundles_post_ra>
